<compile_context>
chip_gen: v6e
topology: v6e:2x2x1
jax: 0.10.0
libtpu: 0.0.40
codegen_flags: <defaults>
</compile_context>

<pallas_src>
import functools
import numpy as np

import jax
import jax.numpy as jnp
from jax.experimental import pallas as pl
from jax.experimental.pallas import tpu as pltpu

BN_EPS = 1e-5
HIDDEN_WIDTHS = (128, 256, 512, 1024)


def _round_up(x, m):
    return ((x + m - 1) // m) * m


def _small_param_layout(out_dim_pad):
    """Layout (name -> (offset, width)) of the packed small-parameter slab.

    Every width is a multiple of 128, so every slice below is lane-aligned.
    Order per hidden layer: bias, gamma, beta; final-layer bias last.
    """
    layout = {}
    off = 0
    for li, w in enumerate(HIDDEN_WIDTHS):
        for name in ("b", "g", "be"):
            layout[f"{name}{li + 1}"] = (off, w)
            off += w
    layout["b5"] = (off, out_dim_pad)
    off += out_dim_pad
    return layout, off


def _linear_relu_bn(x_bf16, w, b, gamma, beta):
    """Linear -> ReLU -> BatchNorm1d (training mode, whole-batch statistics).

    x_bf16: bf16 activations (MXU input), w: bf16 weights, b/gamma/beta: f32.
    Centered two-pass variance; BN application folded to one FMA whose result
    is emitted directly in bf16 for the next layer's dot.
    """
    h = jnp.dot(x_bf16, w, preferred_element_type=jnp.float32) + b
    h = jnp.maximum(h, 0.0)
    mean = jnp.mean(h, axis=0, keepdims=True)
    d = h - mean
    var = jnp.mean(d * d, axis=0, keepdims=True)        # biased var (torch train)
    scale = gamma * jax.lax.rsqrt(var + BN_EPS)
    return (d * scale + beta).astype(jnp.bfloat16)       # == (h-mean)*scale+beta


def generator_kernel(z_ref, w1_ref, w2_ref, w3_ref, w4_hbm, w5_hbm, small_ref,
                     out_ref, w4_buf, w5_buf, sems):
    out_dim_pad = out_ref.shape[1]
    layout, _ = _small_param_layout(out_dim_pad)

    def sp(name):
        off, width = layout[name]
        return small_ref[:, off:off + width]             # (1, width), lane-aligned

    # Kick off DMA of the two dominant weight slabs; they overlap with the
    # layer-1..3 compute below instead of serializing before it.
    cp4 = pltpu.make_async_copy(w4_hbm, w4_buf, sems.at[0])
    cp5 = pltpu.make_async_copy(w5_hbm, w5_buf, sems.at[1])
    cp4.start()
    cp5.start()

    x = z_ref[...].astype(jnp.bfloat16)
    x = _linear_relu_bn(x, w1_ref[...], sp("b1"), sp("g1"), sp("be1"))
    x = _linear_relu_bn(x, w2_ref[...], sp("b2"), sp("g2"), sp("be2"))
    x = _linear_relu_bn(x, w3_ref[...], sp("b3"), sp("g3"), sp("be3"))

    cp4.wait()
    x = _linear_relu_bn(x, w4_buf[...], sp("b4"), sp("g4"), sp("be4"))

    cp5.wait()
    logits = jnp.dot(x, w5_buf[...], preferred_element_type=jnp.float32) + sp("b5")
    out_ref[...] = jnp.tanh(logits).astype(out_ref.dtype)


def init_generator_params(key, latent, img_shape):
    """Deterministic init matching the PyTorch module's shapes.

    Weights are stored (in, out) in bf16 (storage / MXU-input format only);
    biases and BN affine params stay f32.
    """
    widths = [latent, *HIDDEN_WIDTHS, int(np.prod(img_shape))]
    params = {}
    for li in range(5):
        fan_in, fan_out = widths[li], widths[li + 1]
        key, kw, kb, kg, kbe = jax.random.split(key, 5)
        bound = 1.0 / np.sqrt(fan_in)
        w = jax.random.uniform(kw, (fan_in, fan_out), jnp.float32, -bound, bound)
        b = jax.random.uniform(kb, (1, fan_out), jnp.float32, -bound, bound)
        params[f"w{li + 1}"] = w.astype(jnp.bfloat16)
        params[f"b{li + 1}"] = b
        if li < 4:  # batchnorm affine params for the first 4 blocks
            params[f"g{li + 1}"] = (
                1.0 + 0.01 * jax.random.normal(kg, (1, fan_out), jnp.float32))
            params[f"be{li + 1}"] = (
                0.01 * jax.random.normal(kbe, (1, fan_out), jnp.float32))
    return params


@functools.partial(jax.jit, static_argnames=("img_shape",))
def generator_forward(z, params, img_shape):
    batch, latent = z.shape
    out_dim = int(np.prod(img_shape))
    out_dim_pad = _round_up(out_dim, 128)     # lane-dense (unmasked vst) output

    w5, b5 = params["w5"], params["b5"]
    pad = out_dim_pad - out_dim
    if pad:
        w5 = jnp.pad(w5, ((0, 0), (0, pad)))
        b5 = jnp.pad(b5, ((0, 0), (0, pad)))

    # Pack the 13 tiny (1, width) params into one lane-aligned f32 slab:
    # one DMA instead of 13, and no per-input (8, width) sublane-padding waste.
    layout, total = _small_param_layout(out_dim_pad)
    pieces = []
    for li in range(1, 5):
        pieces += [params[f"b{li}"], params[f"g{li}"], params[f"be{li}"]]
    pieces.append(b5)
    small = jnp.concatenate([p.astype(jnp.float32) for p in pieces], axis=1)
    assert small.shape == (1, total)

    # Advisory cost estimate: 5 matmuls + tanh; traffic mostly bf16 weight DMA.
    widths = [latent, *HIDDEN_WIDTHS, out_dim_pad]
    flops = 2 * batch * sum(widths[i] * widths[i + 1] for i in range(5))
    weight_bytes = sum(widths[i] * widths[i + 1] for i in range(5)) * 2  # bf16
    bytes_accessed = (weight_bytes + total * 4
                      + batch * latent * 4 + batch * out_dim_pad * 4)
    transcendentals = batch * out_dim_pad + sum(HIDDEN_WIDTHS)  # tanh + rsqrt

    vmem = pl.BlockSpec(memory_space=pltpu.MemorySpace.VMEM)
    anyspace = pl.BlockSpec(memory_space=pl.ANY)

    img_flat = pl.pallas_call(
        generator_kernel,
        out_shape=jax.ShapeDtypeStruct((batch, out_dim_pad), jnp.float32),
        in_specs=[vmem, vmem, vmem, vmem, anyspace, anyspace, vmem],
        out_specs=vmem,
        scratch_shapes=[
            pltpu.VMEM((HIDDEN_WIDTHS[2], HIDDEN_WIDTHS[3]), jnp.bfloat16),  # w4
            pltpu.VMEM((HIDDEN_WIDTHS[3], out_dim_pad), jnp.bfloat16),       # w5
            pltpu.SemaphoreType.DMA((2,)),
        ],
        compiler_params=pltpu.CompilerParams(vmem_limit_bytes=32 * 1024 * 1024),
        cost_estimate=pl.CostEstimate(
            flops=flops,
            transcendentals=transcendentals,
            bytes_accessed=bytes_accessed,
        ),
    )(z, params["w1"], params["w2"], params["w3"], params["w4"], w5, small)

    if pad:
        img_flat = img_flat[:, :out_dim]

    # Equivalent of torch's img.view(img.size(0), *img_shape)
    return img_flat.reshape((batch,) + tuple(img_shape))


if __name__ == "__main__":
    key = jax.random.PRNGKey(0)
    kz, kp = jax.random.split(key)

    batch = 8
    latent = 32
    img_shape = (1, 16, 16)  # C, H, W -> prod = 256 (already a multiple of 128)

    z = jax.random.normal(kz, (batch, latent), jnp.float32)
    params = init_generator_params(kp, latent, img_shape)

    img = generator_forward(z, params, img_shape)
    jax.block_until_ready(img)

    assert img.shape == (batch,) + img_shape, img.shape
    assert bool(jnp.all(jnp.isfinite(img)))
    assert bool(jnp.all(jnp.abs(img) <= 1.0))  # tanh output range

    print("KERNEL_OK")
</pallas_src>

<mosaic_0001>
module attributes {stable_mosaic.version = 11 : i64} {
  func.func @generator_kernel(%arg0: memref<8x32xf32, #tpu.memory_space<vmem>>, %arg1: memref<32x128xbf16, #tpu.memory_space<vmem>>, %arg2: memref<128x256xbf16, #tpu.memory_space<vmem>>, %arg3: memref<256x512xbf16, #tpu.memory_space<vmem>>, %arg4: memref<512x1024xbf16, #tpu.memory_space<any>>, %arg5: memref<1024x256xbf16, #tpu.memory_space<any>>, %arg6: memref<1x6016xf32, #tpu.memory_space<vmem>>, %arg7: memref<8x256xf32, #tpu.memory_space<vmem>>, %arg8: memref<512x1024xbf16, #tpu.memory_space<vmem>>, %arg9: memref<1024x256xbf16, #tpu.memory_space<vmem>>, %arg10: memref<2x!tpu.dma_semaphore, #tpu.memory_space<semaphore_mem>>) attributes {dimension_semantics = [], scalar_prefetch = 0 : i64, scratch_operands = 3 : i64, tpu.core_type = #tpu.core_type<tc>} {
    %c0_i32 = arith.constant 0 : i32
    %0 = tpu.memref_slice %arg10[%c0_i32] : memref<2x!tpu.dma_semaphore, #tpu.memory_space<semaphore_mem>> -> memref<1x!tpu.dma_semaphore, #tpu.memory_space<semaphore_mem>>
    %1 = tpu.memref_squeeze %0 : memref<1x!tpu.dma_semaphore, #tpu.memory_space<semaphore_mem>> -> memref<!tpu.dma_semaphore, #tpu.memory_space<semaphore_mem>>
    tpu.enqueue_dma source(%arg4 : memref<512x1024xbf16, #tpu.memory_space<any>>) target(%arg8 : memref<512x1024xbf16, #tpu.memory_space<vmem>>) target_semaphore(%1 : memref<!tpu.dma_semaphore, #tpu.memory_space<semaphore_mem>>)
    %c1_i32 = arith.constant 1 : i32
    %2 = tpu.memref_slice %arg10[%c1_i32] : memref<2x!tpu.dma_semaphore, #tpu.memory_space<semaphore_mem>> -> memref<1x!tpu.dma_semaphore, #tpu.memory_space<semaphore_mem>>
    %3 = tpu.memref_squeeze %2 : memref<1x!tpu.dma_semaphore, #tpu.memory_space<semaphore_mem>> -> memref<!tpu.dma_semaphore, #tpu.memory_space<semaphore_mem>>
    tpu.enqueue_dma source(%arg5 : memref<1024x256xbf16, #tpu.memory_space<any>>) target(%arg9 : memref<1024x256xbf16, #tpu.memory_space<vmem>>) target_semaphore(%3 : memref<!tpu.dma_semaphore, #tpu.memory_space<semaphore_mem>>)
    %c0 = arith.constant 0 : index
    %c0_0 = arith.constant 0 : index
    %4 = vector.load %arg0[%c0, %c0_0] : memref<8x32xf32, #tpu.memory_space<vmem>>, vector<8x32xf32>
    %5 = arith.truncf %4 : vector<8x32xf32> to vector<8x32xbf16>
    %c0_1 = arith.constant 0 : index
    %c0_2 = arith.constant 0 : index
    %6 = vector.load %arg1[%c0_1, %c0_2] : memref<32x128xbf16, #tpu.memory_space<vmem>>, vector<32x128xbf16>
    %c0_3 = arith.constant 0 : index
    %c0_4 = arith.constant 0 : index
    %7 = vector.load %arg6[%c0_3, %c0_4] : memref<1x6016xf32, #tpu.memory_space<vmem>>, vector<1x128xf32>
    %c0_5 = arith.constant 0 : index
    %c128 = arith.constant 128 : index
    %8 = vector.load %arg6[%c0_5, %c128] : memref<1x6016xf32, #tpu.memory_space<vmem>>, vector<1x128xf32>
    %c0_6 = arith.constant 0 : index
    %c256 = arith.constant 256 : index
    %9 = vector.load %arg6[%c0_6, %c256] : memref<1x6016xf32, #tpu.memory_space<vmem>>, vector<1x128xf32>
    %cst = arith.constant dense<0.000000e+00> : vector<8x128xf32>
    %10 = tpu.matmul %5, %6, %cst {dimension_numbers = #tpu.dot_dimension_numbers<[1], [0], [0], [1], [0, 0, 1, 1], [], []>} : vector<8x32xbf16>, vector<32x128xbf16>, vector<8x128xf32> -> vector<8x128xf32>
    %11 = vector.broadcast %7 : vector<1x128xf32> to vector<8x128xf32>
    %12 = arith.addf %10, %11 : vector<8x128xf32>
    %cst_7 = arith.constant 0.000000e+00 : f32
    %13 = vector.broadcast %cst_7 : f32 to vector<8x128xf32>
    %14 = arith.maximumf %12, %13 : vector<8x128xf32>
    %cst_8 = arith.constant dense<0.000000e+00> : vector<128xf32>
    %15 = vector.multi_reduction <add>, %14, %cst_8 [0] : vector<8x128xf32> to vector<128xf32>
    %16 = vector.shape_cast %15 : vector<128xf32> to vector<1x128xf32>
    %cst_9 = arith.constant 8.000000e+00 : f32
    %17 = vector.broadcast %cst_9 : f32 to vector<1x128xf32>
    %18 = arith.divf %16, %17 : vector<1x128xf32>
    %19 = vector.broadcast %18 : vector<1x128xf32> to vector<8x128xf32>
    %20 = arith.subf %14, %19 : vector<8x128xf32>
    %21 = arith.mulf %20, %20 : vector<8x128xf32>
    %cst_10 = arith.constant dense<0.000000e+00> : vector<128xf32>
    %22 = vector.multi_reduction <add>, %21, %cst_10 [0] : vector<8x128xf32> to vector<128xf32>
    %23 = vector.shape_cast %22 : vector<128xf32> to vector<1x128xf32>
    %cst_11 = arith.constant 8.000000e+00 : f32
    %24 = vector.broadcast %cst_11 : f32 to vector<1x128xf32>
    %25 = arith.divf %23, %24 : vector<1x128xf32>
    %cst_12 = arith.constant 9.99999974E-6 : f32
    %26 = vector.broadcast %cst_12 : f32 to vector<1x128xf32>
    %27 = arith.addf %25, %26 : vector<1x128xf32>
    %28 = math.rsqrt %27 : vector<1x128xf32>
    %29 = arith.mulf %8, %28 : vector<1x128xf32>
    %30 = vector.broadcast %29 : vector<1x128xf32> to vector<8x128xf32>
    %31 = arith.mulf %20, %30 : vector<8x128xf32>
    %32 = vector.broadcast %9 : vector<1x128xf32> to vector<8x128xf32>
    %33 = arith.addf %31, %32 : vector<8x128xf32>
    %34 = arith.truncf %33 : vector<8x128xf32> to vector<8x128xbf16>
    %c0_13 = arith.constant 0 : index
    %c0_14 = arith.constant 0 : index
    %35 = vector.load %arg2[%c0_13, %c0_14] : memref<128x256xbf16, #tpu.memory_space<vmem>>, vector<128x256xbf16>
    %c0_15 = arith.constant 0 : index
    %c384 = arith.constant 384 : index
    %36 = vector.load %arg6[%c0_15, %c384] : memref<1x6016xf32, #tpu.memory_space<vmem>>, vector<1x256xf32>
    %c0_16 = arith.constant 0 : index
    %c640 = arith.constant 640 : index
    %37 = vector.load %arg6[%c0_16, %c640] : memref<1x6016xf32, #tpu.memory_space<vmem>>, vector<1x256xf32>
    %c0_17 = arith.constant 0 : index
    %c896 = arith.constant 896 : index
    %38 = vector.load %arg6[%c0_17, %c896] : memref<1x6016xf32, #tpu.memory_space<vmem>>, vector<1x256xf32>
    %cst_18 = arith.constant dense<0.000000e+00> : vector<8x256xf32>
    %39 = tpu.matmul %34, %35, %cst_18 {dimension_numbers = #tpu.dot_dimension_numbers<[1], [0], [0], [1], [0, 0, 1, 1], [], []>} : vector<8x128xbf16>, vector<128x256xbf16>, vector<8x256xf32> -> vector<8x256xf32>
    %40 = vector.broadcast %36 : vector<1x256xf32> to vector<8x256xf32>
    %41 = arith.addf %39, %40 : vector<8x256xf32>
    %cst_19 = arith.constant 0.000000e+00 : f32
    %42 = vector.broadcast %cst_19 : f32 to vector<8x256xf32>
    %43 = arith.maximumf %41, %42 : vector<8x256xf32>
    %cst_20 = arith.constant dense<0.000000e+00> : vector<256xf32>
    %44 = vector.multi_reduction <add>, %43, %cst_20 [0] : vector<8x256xf32> to vector<256xf32>
    %45 = vector.shape_cast %44 : vector<256xf32> to vector<1x256xf32>
    %cst_21 = arith.constant 8.000000e+00 : f32
    %46 = vector.broadcast %cst_21 : f32 to vector<1x256xf32>
    %47 = arith.divf %45, %46 : vector<1x256xf32>
    %48 = vector.broadcast %47 : vector<1x256xf32> to vector<8x256xf32>
    %49 = arith.subf %43, %48 : vector<8x256xf32>
    %50 = arith.mulf %49, %49 : vector<8x256xf32>
    %cst_22 = arith.constant dense<0.000000e+00> : vector<256xf32>
    %51 = vector.multi_reduction <add>, %50, %cst_22 [0] : vector<8x256xf32> to vector<256xf32>
    %52 = vector.shape_cast %51 : vector<256xf32> to vector<1x256xf32>
    %cst_23 = arith.constant 8.000000e+00 : f32
    %53 = vector.broadcast %cst_23 : f32 to vector<1x256xf32>
    %54 = arith.divf %52, %53 : vector<1x256xf32>
    %cst_24 = arith.constant 9.99999974E-6 : f32
    %55 = vector.broadcast %cst_24 : f32 to vector<1x256xf32>
    %56 = arith.addf %54, %55 : vector<1x256xf32>
    %57 = math.rsqrt %56 : vector<1x256xf32>
    %58 = arith.mulf %37, %57 : vector<1x256xf32>
    %59 = vector.broadcast %58 : vector<1x256xf32> to vector<8x256xf32>
    %60 = arith.mulf %49, %59 : vector<8x256xf32>
    %61 = vector.broadcast %38 : vector<1x256xf32> to vector<8x256xf32>
    %62 = arith.addf %60, %61 : vector<8x256xf32>
    %63 = arith.truncf %62 : vector<8x256xf32> to vector<8x256xbf16>
    %c0_25 = arith.constant 0 : index
    %c0_26 = arith.constant 0 : index
    %64 = vector.load %arg3[%c0_25, %c0_26] : memref<256x512xbf16, #tpu.memory_space<vmem>>, vector<256x512xbf16>
    %c0_27 = arith.constant 0 : index
    %c1152 = arith.constant 1152 : index
    %65 = vector.load %arg6[%c0_27, %c1152] : memref<1x6016xf32, #tpu.memory_space<vmem>>, vector<1x512xf32>
    %c0_28 = arith.constant 0 : index
    %c1664 = arith.constant 1664 : index
    %66 = vector.load %arg6[%c0_28, %c1664] : memref<1x6016xf32, #tpu.memory_space<vmem>>, vector<1x512xf32>
    %c0_29 = arith.constant 0 : index
    %c2176 = arith.constant 2176 : index
    %67 = vector.load %arg6[%c0_29, %c2176] : memref<1x6016xf32, #tpu.memory_space<vmem>>, vector<1x512xf32>
    %cst_30 = arith.constant dense<0.000000e+00> : vector<8x512xf32>
    %68 = tpu.matmul %63, %64, %cst_30 {dimension_numbers = #tpu.dot_dimension_numbers<[1], [0], [0], [1], [0, 0, 1, 1], [], []>} : vector<8x256xbf16>, vector<256x512xbf16>, vector<8x512xf32> -> vector<8x512xf32>
    %69 = vector.broadcast %65 : vector<1x512xf32> to vector<8x512xf32>
    %70 = arith.addf %68, %69 : vector<8x512xf32>
    %cst_31 = arith.constant 0.000000e+00 : f32
    %71 = vector.broadcast %cst_31 : f32 to vector<8x512xf32>
    %72 = arith.maximumf %70, %71 : vector<8x512xf32>
    %cst_32 = arith.constant dense<0.000000e+00> : vector<512xf32>
    %73 = vector.multi_reduction <add>, %72, %cst_32 [0] : vector<8x512xf32> to vector<512xf32>
    %74 = vector.shape_cast %73 : vector<512xf32> to vector<1x512xf32>
    %cst_33 = arith.constant 8.000000e+00 : f32
    %75 = vector.broadcast %cst_33 : f32 to vector<1x512xf32>
    %76 = arith.divf %74, %75 : vector<1x512xf32>
    %77 = vector.broadcast %76 : vector<1x512xf32> to vector<8x512xf32>
    %78 = arith.subf %72, %77 : vector<8x512xf32>
    %79 = arith.mulf %78, %78 : vector<8x512xf32>
    %cst_34 = arith.constant dense<0.000000e+00> : vector<512xf32>
    %80 = vector.multi_reduction <add>, %79, %cst_34 [0] : vector<8x512xf32> to vector<512xf32>
    %81 = vector.shape_cast %80 : vector<512xf32> to vector<1x512xf32>
    %cst_35 = arith.constant 8.000000e+00 : f32
    %82 = vector.broadcast %cst_35 : f32 to vector<1x512xf32>
    %83 = arith.divf %81, %82 : vector<1x512xf32>
    %cst_36 = arith.constant 9.99999974E-6 : f32
    %84 = vector.broadcast %cst_36 : f32 to vector<1x512xf32>
    %85 = arith.addf %83, %84 : vector<1x512xf32>
    %86 = math.rsqrt %85 : vector<1x512xf32>
    %87 = arith.mulf %66, %86 : vector<1x512xf32>
    %88 = vector.broadcast %87 : vector<1x512xf32> to vector<8x512xf32>
    %89 = arith.mulf %78, %88 : vector<8x512xf32>
    %90 = vector.broadcast %67 : vector<1x512xf32> to vector<8x512xf32>
    %91 = arith.addf %89, %90 : vector<8x512xf32>
    %92 = arith.truncf %91 : vector<8x512xf32> to vector<8x512xbf16>
    %c0_i32_37 = arith.constant 0 : i32
    %93 = tpu.memref_slice %arg10[%c0_i32_37] : memref<2x!tpu.dma_semaphore, #tpu.memory_space<semaphore_mem>> -> memref<1x!tpu.dma_semaphore, #tpu.memory_space<semaphore_mem>>
    %94 = tpu.memref_squeeze %93 : memref<1x!tpu.dma_semaphore, #tpu.memory_space<semaphore_mem>> -> memref<!tpu.dma_semaphore, #tpu.memory_space<semaphore_mem>>
    tpu.wait_dma2 semaphore(%94 : memref<!tpu.dma_semaphore, #tpu.memory_space<semaphore_mem>>) src(%arg4 : memref<512x1024xbf16, #tpu.memory_space<any>>) dst(%arg8 : memref<512x1024xbf16, #tpu.memory_space<vmem>>)
    %c0_38 = arith.constant 0 : index
    %c0_39 = arith.constant 0 : index
    %95 = vector.load %arg8[%c0_38, %c0_39] : memref<512x1024xbf16, #tpu.memory_space<vmem>>, vector<512x1024xbf16>
    %c0_40 = arith.constant 0 : index
    %c2688 = arith.constant 2688 : index
    %96 = vector.load %arg6[%c0_40, %c2688] : memref<1x6016xf32, #tpu.memory_space<vmem>>, vector<1x1024xf32>
    %c0_41 = arith.constant 0 : index
    %c3712 = arith.constant 3712 : index
    %97 = vector.load %arg6[%c0_41, %c3712] : memref<1x6016xf32, #tpu.memory_space<vmem>>, vector<1x1024xf32>
    %c0_42 = arith.constant 0 : index
    %c4736 = arith.constant 4736 : index
    %98 = vector.load %arg6[%c0_42, %c4736] : memref<1x6016xf32, #tpu.memory_space<vmem>>, vector<1x1024xf32>
    %cst_43 = arith.constant dense<0.000000e+00> : vector<8x1024xf32>
    %99 = tpu.matmul %92, %95, %cst_43 {dimension_numbers = #tpu.dot_dimension_numbers<[1], [0], [0], [1], [0, 0, 1, 1], [], []>} : vector<8x512xbf16>, vector<512x1024xbf16>, vector<8x1024xf32> -> vector<8x1024xf32>
    %100 = vector.broadcast %96 : vector<1x1024xf32> to vector<8x1024xf32>
    %101 = arith.addf %99, %100 : vector<8x1024xf32>
    %cst_44 = arith.constant 0.000000e+00 : f32
    %102 = vector.broadcast %cst_44 : f32 to vector<8x1024xf32>
    %103 = arith.maximumf %101, %102 : vector<8x1024xf32>
    %cst_45 = arith.constant dense<0.000000e+00> : vector<1024xf32>
    %104 = vector.multi_reduction <add>, %103, %cst_45 [0] : vector<8x1024xf32> to vector<1024xf32>
    %105 = vector.shape_cast %104 : vector<1024xf32> to vector<1x1024xf32>
    %cst_46 = arith.constant 8.000000e+00 : f32
    %106 = vector.broadcast %cst_46 : f32 to vector<1x1024xf32>
    %107 = arith.divf %105, %106 : vector<1x1024xf32>
    %108 = vector.broadcast %107 : vector<1x1024xf32> to vector<8x1024xf32>
    %109 = arith.subf %103, %108 : vector<8x1024xf32>
    %110 = arith.mulf %109, %109 : vector<8x1024xf32>
    %cst_47 = arith.constant dense<0.000000e+00> : vector<1024xf32>
    %111 = vector.multi_reduction <add>, %110, %cst_47 [0] : vector<8x1024xf32> to vector<1024xf32>
    %112 = vector.shape_cast %111 : vector<1024xf32> to vector<1x1024xf32>
    %cst_48 = arith.constant 8.000000e+00 : f32
    %113 = vector.broadcast %cst_48 : f32 to vector<1x1024xf32>
    %114 = arith.divf %112, %113 : vector<1x1024xf32>
    %cst_49 = arith.constant 9.99999974E-6 : f32
    %115 = vector.broadcast %cst_49 : f32 to vector<1x1024xf32>
    %116 = arith.addf %114, %115 : vector<1x1024xf32>
    %117 = math.rsqrt %116 : vector<1x1024xf32>
    %118 = arith.mulf %97, %117 : vector<1x1024xf32>
    %119 = vector.broadcast %118 : vector<1x1024xf32> to vector<8x1024xf32>
    %120 = arith.mulf %109, %119 : vector<8x1024xf32>
    %121 = vector.broadcast %98 : vector<1x1024xf32> to vector<8x1024xf32>
    %122 = arith.addf %120, %121 : vector<8x1024xf32>
    %123 = arith.truncf %122 : vector<8x1024xf32> to vector<8x1024xbf16>
    %c1_i32_50 = arith.constant 1 : i32
    %124 = tpu.memref_slice %arg10[%c1_i32_50] : memref<2x!tpu.dma_semaphore, #tpu.memory_space<semaphore_mem>> -> memref<1x!tpu.dma_semaphore, #tpu.memory_space<semaphore_mem>>
    %125 = tpu.memref_squeeze %124 : memref<1x!tpu.dma_semaphore, #tpu.memory_space<semaphore_mem>> -> memref<!tpu.dma_semaphore, #tpu.memory_space<semaphore_mem>>
    tpu.wait_dma2 semaphore(%125 : memref<!tpu.dma_semaphore, #tpu.memory_space<semaphore_mem>>) src(%arg5 : memref<1024x256xbf16, #tpu.memory_space<any>>) dst(%arg9 : memref<1024x256xbf16, #tpu.memory_space<vmem>>)
    %c0_51 = arith.constant 0 : index
    %c0_52 = arith.constant 0 : index
    %126 = vector.load %arg9[%c0_51, %c0_52] : memref<1024x256xbf16, #tpu.memory_space<vmem>>, vector<1024x256xbf16>
    %cst_53 = arith.constant dense<0.000000e+00> : vector<8x256xf32>
    %127 = tpu.matmul %123, %126, %cst_53 {dimension_numbers = #tpu.dot_dimension_numbers<[1], [0], [0], [1], [0, 0, 1, 1], [], []>} : vector<8x1024xbf16>, vector<1024x256xbf16>, vector<8x256xf32> -> vector<8x256xf32>
    %c0_54 = arith.constant 0 : index
    %c5760 = arith.constant 5760 : index
    %128 = vector.load %arg6[%c0_54, %c5760] : memref<1x6016xf32, #tpu.memory_space<vmem>>, vector<1x256xf32>
    %129 = vector.broadcast %128 : vector<1x256xf32> to vector<8x256xf32>
    %130 = arith.addf %127, %129 : vector<8x256xf32>
    %131 = math.tanh %130 : vector<8x256xf32>
    %c0_55 = arith.constant 0 : index
    %c0_56 = arith.constant 0 : index
    %132 = vector.load %arg7[%c0_55, %c0_56] : memref<8x256xf32, #tpu.memory_space<vmem>>, vector<8x256xf32>
    tpu.vector_store %arg7[%c0_55, %c0_56], %131 {strides = array<i32>} : memref<8x256xf32, #tpu.memory_space<vmem>>, vector<8x256xf32>,
    return
  }
}

</mosaic_0001>

<bundles_post_ra>
// kernel: generator_forward.1
= control target key start
LH: loop header
LB: loop body
LE: loop exit
PB: predicated region body
PF: predicated region fallthrough
CT: control target
= control target key end

     0   :  { %12 = vsyncpa [#allocation6], 0  ;;  %s5530_s0 = inlined_call_operand.vmem [shape: f32[8,32], index: 0, kind: input, shape index: {}]   ;;  %s5531_s1 = inlined_call_operand.vmem [shape: bf16[32,128], index: 1, kind: input, shape index: {}]   ;;  %s5532_s2 = inlined_call_operand.hbm [shape: bf16[128,256], index: 2, kind: input, shape index: {}]   ;;  %s5533_s3 = inlined_call_operand.hbm [shape: bf16[256,512], index: 3, kind: input, shape index: {}]   ;;  %s5534_s4 = inlined_call_operand.hbm [shape: bf16[512,1024], index: 4, kind: input, shape index: {}]   ;;  %s5535_s5 = inlined_call_operand.hbm [shape: bf16[1024,256], index: 5, kind: input, shape index: {}]   ;;  %s5536_s6 = inlined_call_operand.vmem [shape: f32[1,6016], index: 6, kind: input, shape index: {}]   ;;  %s5537_s7 = inlined_call_operand.vmem [shape: f32[8,256], index: 7, kind: output, shape index: {}]  }
   0x1   :  { %13 = vsyncpa [#allocation8], 0  ;;  %s5197_s24 = smov [#allocation5]  }
   0x2   :  { %s23_s25 = sshll.u32 %s5197_s24, 4  ;;  %s24_s25 = int_to_ptr.vmem [resolvable:$true] %s23_s25 }
   0x3   :  { %s5117_s26 = scalar_lea.vmem %s24_s25, 2048  ;;  %p5122_p1 = scmp.lt.s32.totalorder %s24_s25, %s24_s25 }
   0x4   :  { %p5118_p0 = scmp.ne.s32.totalorder %s24_s25, %s5117_s26  ;;  %p5123_p2 = scmp.lt.s32.totalorder %s5117_s26, %s5117_s26 }
   0x6   :  { %p5124_p3 = por %p5123_p2, %p5122_p1 }
   0x8   :  { %p5125_p4 = pnand %p5124_p3, %p5118_p0 }
   0xa   :  { %5128 = shalt.err (!%p5125_p4)
}
   0xb   :  { %s5198_s27 = smov 128   ;;  %s5199_s28 = smov 8  }
   0xc   :  { %29 = dma.hbm_to_vmem [thread:$0]  %s5532_s2, 2048, %s24_s25, [#allocation6], %s5198_s27, %s5198_s27, %s5199_s28  }
   0xd   :  { %s5200_s8 = smov [#allocation7]  }
   0xe   :  { %s35_s9 = sshll.u32 %s5200_s8, 4  ;;  %s36_s9 = int_to_ptr.vmem [resolvable:$true] %s35_s9 }
   0xf   :  { %s5137_s10 = scalar_lea.vmem %s36_s9, 8192  ;;  %p5142_p6 = scmp.lt.s32.totalorder %s36_s9, %s36_s9 }
  0x10   :  { %p5138_p5 = scmp.ne.s32.totalorder %s36_s9, %s5137_s10  ;;  %p5143_p7 = scmp.lt.s32.totalorder %s5137_s10, %s5137_s10 }
  0x12   :  { %p5144_p8 = por %p5143_p7, %p5142_p6 }
  0x14   :  { %p5145_p9 = pnand %p5144_p8, %p5138_p5 }
  0x16   :  { %5148 = shalt.err (!%p5145_p9)
}
  0x17   :  { %s5201_s11 = smov 256   ;;  %s5202_s12 = smov 16  }
  0x18   :  { %41 = dma.hbm_to_vmem [thread:$0]  %s5533_s3, 8192, %s36_s9, [#allocation8], %s5201_s11, %s5201_s11, %s5202_s12  }
  0x19   :  { %5189 = dma.done.wait [#allocation6], 2048  }
  0x1a   :  { %5190 = vsyncadd [#allocation6], 4294965248 }
  0x1b   :  { %5191 = dma.done.wait [#allocation8], 8192  }
  0x1c   :  { %5192 = vsyncadd [#allocation8], 4294959104  ;;  %v5203_v0 = vmov 0.0   ;;  %vm5204_vm0 = vmmov 0   ;;  %v4761_v1 = vld [vmem:[%s5531_s1 + $0x8] sm:$0xff]   ;;  %v4762_v2 = vld [vmem:[%s5531_s1] sm:$0xff]   ;;  %v167_v46 = vlaneseq }
  0x1d   :  { %4741 = vmatprep.subr.bf16.mxu0 %v5203_v0  ;;  %4745 = vmatprep.mubr.msk.bf16.mxu0 %vm5204_vm0, %v5203_v0  ;;  %v74_v3 = vld [vmem:[%s5530_s0] sm:$0xff]  ;;  %vm101_vm1 = vcmask 261120   ;;  %v4763_v5 = vld [vmem:[#allocation5 + $0x74] ss:$8 sps:$4 sm:$0xff]   ;;  %v4765_v6 = vld [vmem:[#allocation5 + $0x70] ss:$8 sps:$4 sm:$0xff]  }
  0x1e   :  { %4742 = vmatpush3.bf16.msra.mxu0 %v4761_v1  ;;  %v75_v4 = vpack.c.bf16 %v74_v3, %v74_v3  ;;  %291 = vmatprep.subr.bf16.mxu1 %v4763_v5  ;;  %v4766_v7 = vld [vmem:[#allocation5 + $0x64] ss:$8 sps:$4 sm:$0xff]   ;;  %v4768_v8 = vld [vmem:[#allocation5 + $0x60] ss:$8 sps:$4 sm:$0xff]   ;;  %v4769_v9 = vld [vmem:[#allocation5 + $0x54] ss:$8 sps:$4 sm:$0xff]  }
  0x1f   :  { %4743 = vmatprep.subr.bf16.mxu0 %v5203_v0  ;;  %292 = vmatpush1.bf16.msra.mxu1 %v4765_v6  ;;  %v4771_v10 = vld [vmem:[#allocation5 + $0x50] ss:$8 sps:$4 sm:$0xff]   ;;  %v4772_v11 = vld [vmem:[#allocation5 + $0x44] ss:$8 sps:$4 sm:$0xff]   ;;  %v4774_v12 = vld [vmem:[#allocation5 + $0x40] ss:$8 sps:$4 sm:$0xff]  }
  0x20   :  { %293 = vmatprep.subr.bf16.mxu1 %v4766_v7  ;;  %v4775_v13 = vld [vmem:[#allocation5 + $0x34] ss:$8 sps:$4 sm:$0xff]   ;;  %v5205_v14 = vmov 0   ;;  %v4777_v15 = vld [vmem:[#allocation5 + $0x30] ss:$8 sps:$4 sm:$0xff]   ;;  %v5267_v47 = vshrl.u32 %v167_v46, 7 }
  0x21   :  { %323 = vmatprep.mubr.bf16.mxu1 %v5205_v14  ;;  %v4778_v16 = vld [vmem:[#allocation5 + $0x24] ss:$8 sps:$4 sm:$0xff]   ;;  %v4780_v17 = vld [vmem:[#allocation5 + $0x20] ss:$8 sps:$4 sm:$0xff]   ;;  %v4781_v18 = vld [vmem:[#allocation5 + $0x14] ss:$8 sps:$4 sm:$0xff]  }
  0x22   :  { %4744 = vmatpush3.bf16.msra.mxu0 %v4762_v2  ;;  %v4783_v19 = vld [vmem:[#allocation5 + $0x10] ss:$8 sps:$4 sm:$0xff]   ;;  %v4784_v20 = vld [vmem:[#allocation5 + $0x4] ss:$8 sps:$4 sm:$0xff]   ;;  %v4786_v21 = vld [vmem:[#allocation5] ss:$8 sps:$4 sm:$0xff]  }
  0x23   :  { %294 = vmatpush1.bf16.msra.mxu1 %v4768_v8  ;;  %v4267_v22 = vld [vmem:[%s5536_s6] ss:$0 sm:$0xff]  ;;  %v81_v48 = vld [vmem:[%s5536_s6 + $0x1] sm:$0x1]  ;;  %v5273_v49 = vsub.s32 0, %v5267_v47  ;;  %s5207_s29 = smov [#allocation2]  }
  0x24   :  { %295 = vmatprep.subr.bf16.mxu1 %v4769_v9  ;;  %v4271_v53 = vld [vmem:[%s5536_s6 + $0x2] ss:$0 sm:$0xff]  ;;  %v4789_v57 = vld [vmem:[#allocation7 + $0xe4] ss:$16 sps:$4 sm:$0xff]   ;;  %v4792_v58 = vld [vmem:[#allocation7 + $0xec] ss:$16 sps:$4 sm:$0xff]  }
  0x25   :  { %4746 = vmatmul.mubr.msk.bf16.vlgmr.msra.gmra.mxu0 %vm101_vm1, %v75_v4  ;;  %v4787_v59 = vld [vmem:[#allocation7 + $0xe0] ss:$16 sps:$4 sm:$0xff]   ;;  %v4790_v60 = vld [vmem:[#allocation7 + $0xe8] ss:$16 sps:$4 sm:$0xff]   ;;  %825 = vmatprep.subr.bf16.mxu0 %v4789_v57  ;;  %v4795_v61 = vld [vmem:[#allocation7 + $0xc4] ss:$16 sps:$4 sm:$0xff]  }
  0x26   :  { %826 = vmatpush1.bf16.msra.mxu0 %v4787_v59  ;;  %v4798_v62 = vld [vmem:[#allocation7 + $0xcc] ss:$16 sps:$4 sm:$0xff]   ;;  %v4793_v63 = vld [vmem:[#allocation7 + $0xc0] ss:$16 sps:$4 sm:$0xff]   ;;  %v4796_v0 = vld [vmem:[#allocation7 + $0xc8] ss:$16 sps:$4 sm:$0xff]  }
  0x27   :  { %296 = vmatpush1.bf16.msra.mxu1 %v4771_v10  ;;  %827 = vmatprep.subr.bf16.mxu0 %v4795_v61  ;;  %v4801_v1 = vld [vmem:[#allocation7 + $0xa4] ss:$16 sps:$4 sm:$0xff]   ;;  %v4804_v2 = vld [vmem:[#allocation7 + $0xac] ss:$16 sps:$4 sm:$0xff]   ;;  %v4799_v3 = vld [vmem:[#allocation7 + $0xa0] ss:$16 sps:$4 sm:$0xff]  }
  0x28   :  { %297 = vmatprep.subr.bf16.mxu1 %v4772_v11  ;;  %v4802_v4 = vld [vmem:[#allocation7 + $0xa8] ss:$16 sps:$4 sm:$0xff]   ;;  %v4807_v5 = vld [vmem:[#allocation7 + $0x84] ss:$16 sps:$4 sm:$0xff]   ;;  %v4810_v6 = vld [vmem:[#allocation7 + $0x8c] ss:$16 sps:$4 sm:$0xff]  }
  0x29   :  { %v4805_v7 = vld [vmem:[#allocation7 + $0x80] ss:$16 sps:$4 sm:$0xff]   ;;  %v4808_v8 = vld [vmem:[#allocation7 + $0x88] ss:$16 sps:$4 sm:$0xff]   ;;  %v4813_v9 = vld [vmem:[#allocation7 + $0x64] ss:$16 sps:$4 sm:$0xff]  }
  0x2a   :  { %828 = vmatpush1.bf16.msra.mxu0 %v4793_v63  ;;  %v4816_v10 = vld [vmem:[#allocation7 + $0x6c] ss:$16 sps:$4 sm:$0xff]   ;;  %v4811_v11 = vld [vmem:[#allocation7 + $0x60] ss:$16 sps:$4 sm:$0xff]   ;;  %s58_s30 = sshll.u32 %s5207_s29, 4  ;;  %s5208_s8 = smov [#allocation3]   ;;  %s59_s30 = int_to_ptr.vmem [resolvable:$true] %s58_s30 }
  0x2b   :  { %298 = vmatpush1.bf16.msra.mxu1 %v4774_v12  ;;  %829 = vmatprep.subr.bf16.mxu0 %v4801_v1  ;;  %v4814_v12 = vld [vmem:[#allocation7 + $0x68] ss:$16 sps:$4 sm:$0xff]   ;;  %v4822_v14 = vld [vmem:[#allocation7 + $0x4c] ss:$16 sps:$4 sm:$0xff]   ;;  %v4877_v57 = vld [vmem:[#allocation7 + $0x100] ss:$16 sps:$4 sm:$0xff]   ;;  %p5162_p11 = scmp.lt.s32.totalorder %s59_s30, %s59_s30 }
  0x2c   :  { %299 = vmatprep.subr.bf16.mxu1 %v4775_v13  ;;  %v4819_v13 = vld [vmem:[#allocation7 + $0x44] ss:$16 sps:$4 sm:$0xff]   ;;  %v4870_v46 = vld [vmem:[#allocation7 + $0x14c] ss:$16 sps:$4 sm:$0xff]   ;;  %s70_s9 = sshll.u32 %s5208_s8, 4  ;;  %s5157_s10 = scalar_lea.vmem %s59_s30, 32768  ;;  %s71_s9 = int_to_ptr.vmem [resolvable:$true] %s70_s9 }
  0x2d   :  { %v197_v59 = vld [vmem:[%s5536_s6 + $0x3] sm:$0x3]  ;;  %p5158_p10 = scmp.ne.s32.totalorder %s59_s30, %s5157_s10  ;;  %p5163_p12 = scmp.lt.s32.totalorder %s5157_s10, %s5157_s10 }
  0x2e   :  { %830 = vmatpush1.bf16.msra.mxu0 %v4799_v3  ;;  %v204_v61 = vrot.slane %v197_v59, %v5273_v49 }
  0x2f   :  { %300 = vmatpush1.bf16.msra.mxu1 %v4777_v15  ;;  %831 = vmatprep.subr.bf16.mxu0 %v4807_v5  ;;  %v4817_v15 = vld [vmem:[#allocation7 + $0x40] ss:$16 sps:$4 sm:$0xff]   ;;  %p5164_p13 = por %p5163_p12, %p5162_p11 }
  0x30   :  { %301 = vmatprep.subr.bf16.mxu1 %v4778_v16  ;;  %v4820_v16 = vld [vmem:[#allocation7 + $0x48] ss:$16 sps:$4 sm:$0xff]  }
  0x31   :  { %p5165_p0 = pnand %p5164_p13, %p5158_p10 }
  0x32   :  { %832 = vmatpush1.bf16.msra.mxu0 %v4805_v7 }
  0x33   :  { %302 = vmatpush1.bf16.msra.mxu1 %v4780_v17  ;;  %833 = vmatprep.subr.bf16.mxu0 %v4813_v9  ;;  %v4825_v17 = vld [vmem:[#allocation7 + $0x24] ss:$16 sps:$4 sm:$0xff]  }
  0x34   :  { %303 = vmatprep.subr.bf16.mxu1 %v4781_v18  ;;  %v4828_v18 = vld [vmem:[#allocation7 + $0x2c] ss:$16 sps:$4 sm:$0xff]  }
  0x36   :  { %834 = vmatpush1.bf16.msra.mxu0 %v4811_v11 }
  0x37   :  { %304 = vmatpush1.bf16.msra.mxu1 %v4783_v19  ;;  %835 = vmatprep.subr.bf16.mxu0 %v4819_v13  ;;  %v4823_v19 = vld [vmem:[#allocation7 + $0x20] ss:$16 sps:$4 sm:$0xff]  }
  0x38   :  { %305 = vmatprep.subr.bf16.mxu1 %v4784_v20  ;;  %v4826_v20 = vld [vmem:[#allocation7 + $0x28] ss:$16 sps:$4 sm:$0xff]  }
  0x3a   :  { %836 = vmatpush1.bf16.msra.mxu0 %v4817_v15 }
  0x3b   :  { %306 = vmatpush1.bf16.msra.mxu1 %v4786_v21  ;;  %837 = vmatprep.subr.bf16.mxu0 %v4825_v17  ;;  %v4831_v21 = vld [vmem:[#allocation7 + $0x4] ss:$16 sps:$4 sm:$0xff]  }
  0x3c   :  { %866 = vmatprep.subr.bf16.mxu1 %v4792_v58  ;;  %v4880_v58 = vld [vmem:[#allocation7 + $0x108] ss:$16 sps:$4 sm:$0xff]  }
  0x3e   :  { %838 = vmatpush1.bf16.msra.mxu0 %v4823_v19 }
  0x3f   :  { %839 = vmatprep.subr.bf16.mxu0 %v4831_v21 }
  0xe5   :  { %v139_v23 = vpop.f32.mrf.mxu0 }
  0xe6   :  { %v140_v24 = vadd.f32 %v4267_v22, %v139_v23  ;;  %v4834_v22 = vld [vmem:[#allocation7 + $0xc] ss:$16 sps:$4 sm:$0xff]   ;;  %v4829_v23 = vld [vmem:[#allocation7] ss:$16 sps:$4 sm:$0xff]  }
  0xe7   :  { %v4747_v25 = vpop.f32.mrf.mxu0  ;;  %840 = vmatpush1.bf16.msra.mxu0 %v4829_v23 }
  0xe8   :  { %v145_v26 = vmax.f32 %v140_v24, 0.0  ;;  %v4832_v24 = vld [vmem:[#allocation7 + $0x8] ss:$16 sps:$4 sm:$0xff]   ;;  %v4837_v25 = vld [vmem:[#allocation7 + $0x1e4] ss:$16 sps:$4 sm:$0xff]  }
  0xe9   :  { %v142_v27 = vpop.f32.mrf.mxu0  ;;  %841 = vmatprep.subr.bf16.mxu0 %v4837_v25 }
  0xea   :  { %v146_v28 = vrot.slane %v145_v26, 4  ;;  %v4835_v27 = vld [vmem:[#allocation7 + $0x1e0] ss:$16 sps:$4 sm:$0xff]  }
  0xeb   :  { %v4748_v29 = vpop.f32.mrf.mxu0  ;;  %842 = vmatpush2.bf16.msra.mxu0 %v4835_v27 }
  0xec   :  { %v147_v30 = vadd.f32 %v146_v28, %v145_v26  ;;  %v4838_v28 = vld [vmem:[#allocation7 + $0x1e8] ss:$16 sps:$4 sm:$0xff]   ;;  %v4841_v29 = vld [vmem:[#allocation7 + $0x1c0] ss:$16 sps:$4 sm:$0xff]  }
  0xee   :  { %v148_v31 = vrot.slane %v147_v30, 2 }
  0xf0   :  { %v149_v32 = vadd.f32 %v148_v31, %v147_v30  ;;  %v4843_v30 = vld [vmem:[#allocation7 + $0x1c4] ss:$16 sps:$4 sm:$0xff]   ;;  %v4844_v31 = vld [vmem:[#allocation7 + $0x1c8] ss:$16 sps:$4 sm:$0xff]  }
  0xf1   :  { %843 = vmatprep.subr.bf16.mxu0 %v4843_v30 }
  0xf2   :  { %v150_v33 = vrot.slane %v149_v32, 1  ;;  %844 = vmatpush2.bf16.msra.mxu0 %v4841_v29 }
  0xf4   :  { %v151_v34 = vadd.f32 %v150_v33, %v149_v32  ;;  %v4846_v32 = vld [vmem:[#allocation7 + $0x1cc] ss:$16 sps:$4 sm:$0xff]   ;;  %v4849_v33 = vld [vmem:[#allocation7 + $0x1a4] ss:$16 sps:$4 sm:$0xff]  }
  0xf5   :  { %845 = vmatprep.subr.bf16.mxu0 %v4849_v33 }
  0xf6   :  { %v153_v35 = vmul.f32 0.125, %v151_v34  ;;  %v4852_v34 = vld [vmem:[#allocation7 + $0x1ac] ss:$16 sps:$4 sm:$0xff]  }
  0xf8   :  { %v154_v36 = vsub.f32 %v145_v26, %v153_v35  ;;  %v4840_v26 = vld [vmem:[#allocation7 + $0x1ec] ss:$16 sps:$4 sm:$0xff]   ;;  %v4847_v35 = vld [vmem:[#allocation7 + $0x1a0] ss:$16 sps:$4 sm:$0xff]  }
  0xf9   :  { %846 = vmatpush2.bf16.msra.mxu0 %v4847_v35 }
  0xfa   :  { %v155_v37 = vmul.f32 %v154_v36, %v154_v36 }
  0xfc   :  { %v156_v38 = vrot.slane %v155_v37, 4 }
  0xfe   :  { %v157_v39 = vadd.f32 %v156_v38, %v155_v37  ;;  %v4855_v37 = vld [vmem:[#allocation7 + $0x184] ss:$16 sps:$4 sm:$0xff]   ;;  %v4858_v38 = vld [vmem:[#allocation7 + $0x18c] ss:$16 sps:$4 sm:$0xff]  }
  0xff   :  { %847 = vmatprep.subr.bf16.mxu0 %v4855_v37 }
 0x100   :  { %v158_v40 = vrot.slane %v157_v39, 2 }
 0x102   :  { %v159_v41 = vadd.f32 %v158_v40, %v157_v39  ;;  %v4853_v39 = vld [vmem:[#allocation7 + $0x180] ss:$16 sps:$4 sm:$0xff]   ;;  %v4856_v40 = vld [vmem:[#allocation7 + $0x188] ss:$16 sps:$4 sm:$0xff]  }
 0x103   :  { %848 = vmatpush2.bf16.msra.mxu0 %v4853_v39 }
 0x104   :  { %v160_v42 = vrot.slane %v159_v41, 1 }
 0x106   :  { %v161_v43 = vadd.f32 %v160_v42, %v159_v41  ;;  %v4861_v41 = vld [vmem:[#allocation7 + $0x164] ss:$16 sps:$4 sm:$0xff]   ;;  %v4864_v42 = vld [vmem:[#allocation7 + $0x16c] ss:$16 sps:$4 sm:$0xff]  }
 0x107   :  { %849 = vmatprep.subr.bf16.mxu0 %v4861_v41  ;;  %v5206_v41 = vmov 1966171168  }
 0x108   :  { %v162_v44 = vmul.f32 0.125, %v161_v43  ;;  %v4859_v43 = vld [vmem:[#allocation7 + $0x160] ss:$16 sps:$4 sm:$0xff]  }
 0x109   :  { %850 = vmatpush2.bf16.msra.mxu0 %v4859_v43 }
 0x10a   :  { %v163_v45 = vadd.f32 1e-05, %v162_v44  ;;  %v4862_v44 = vld [vmem:[#allocation7 + $0x168] ss:$16 sps:$4 sm:$0xff]  }
 0x10c   :  { %4883 = vrsqrt.f32 %v163_v45  ;;  %v4867_v45 = vld [vmem:[#allocation7 + $0x144] ss:$16 sps:$4 sm:$0xff]  }
 0x10d   :  { %851 = vmatprep.subr.bf16.mxu0 %v4867_v45 }
 0x119   :  { %v4884_v50 = vpop.eup %4883 }
 0x11a   :  { %v165_v51 = vmul.f32 %v4884_v50, %v81_v48  ;;  %v4865_v48 = vld [vmem:[#allocation7 + $0x140] ss:$16 sps:$4 sm:$0xff]   ;;  %v4868_v50 = vld [vmem:[#allocation7 + $0x148] ss:$16 sps:$4 sm:$0xff]  }
 0x11b   :  { %852 = vmatpush2.bf16.msra.mxu0 %v4865_v48 }
 0x11c   :  { %v170_v52 = vrot.slane %v165_v51, %v5273_v49  ;;  %v4873_v51 = vld [vmem:[#allocation7 + $0x124] ss:$16 sps:$4 sm:$0xff]  }
 0x11d   :  { %853 = vmatprep.subr.bf16.mxu0 %v4873_v51  ;;  %v198_v51 = vld [vmem:[%s5536_s6 + $0x5] sm:$0x3] }
 0x11e   :  { %v172_v54 = vmul.f32 %v170_v52, %v154_v36  ;;  %v4850_v36 = vld [vmem:[#allocation7 + $0x1a8] ss:$16 sps:$4 sm:$0xff]   ;;  %v4876_v52 = vld [vmem:[#allocation7 + $0x12c] ss:$16 sps:$4 sm:$0xff]  }
 0x120   :  { %v179_v55 = vadd.f32 %v4271_v53, %v172_v54  ;;  %v4871_v53 = vld [vmem:[#allocation7 + $0x120] ss:$16 sps:$4 sm:$0xff]   ;;  %v4874_v54 = vld [vmem:[#allocation7 + $0x128] ss:$16 sps:$4 sm:$0xff]  }
 0x121   :  { %854 = vmatpush2.bf16.msra.mxu0 %v4871_v53  ;;  %v199_v53 = vld [vmem:[%s5536_s6 + $0x7] sm:$0x3] }
 0x122   :  { %v180_v56 = vpack.c.bf16 %v179_v55, %v179_v55  ;;  %v4879_v55 = vld [vmem:[#allocation7 + $0x104] ss:$16 sps:$4 sm:$0xff]  }
 0x123   :  { %855 = vmatprep.subr.bf16.mxu0 %v4879_v55 }
 0x124   :  { %324 = vmatmul.mubr.bf16.vlgmr.msra.gmra.mxu1 %v180_v56  ;;  %v4882_v56 = vld [vmem:[#allocation7 + $0x10c] ss:$16 sps:$4 sm:$0xff]  }
 0x125   :  { %867 = vmatpush1.bf16.msra.mxu1 %v4790_v60  ;;  %856 = vmatpush2.bf16.msra.mxu0 %v4877_v57  ;;  %v5283_v60 = vsub.s32 1, %v5267_v47 }
 0x126   :  { %868 = vmatprep.subr.bf16.mxu1 %v4798_v62 }
 0x127   :  { %v208_v62 = vrot.slane %v197_v59, %v5283_v60  ;;  %v410_v57 = vrot.slane %v199_v53, %v5283_v60 }
 0x129   :  { %869 = vmatpush1.bf16.msra.mxu1 %v4796_v0 }
 0x12a   :  { %870 = vmatprep.subr.bf16.mxu1 %v4804_v2 }
 0x12d   :  { %871 = vmatpush1.bf16.msra.mxu1 %v4802_v4 }
 0x12e   :  { %872 = vmatprep.subr.bf16.mxu1 %v4810_v6 }
 0x131   :  { %873 = vmatpush1.bf16.msra.mxu1 %v4808_v8 }
 0x132   :  { %874 = vmatprep.subr.bf16.mxu1 %v4816_v10 }
 0x135   :  { %875 = vmatpush1.bf16.msra.mxu1 %v4814_v12 }
 0x136   :  { %876 = vmatprep.subr.bf16.mxu1 %v4822_v14 }
 0x139   :  { %877 = vmatpush1.bf16.msra.mxu1 %v4820_v16 }
 0x13a   :  { %878 = vmatprep.subr.bf16.mxu1 %v4828_v18 }
 0x13d   :  { %879 = vmatpush1.bf16.msra.mxu1 %v4826_v20 }
 0x13e   :  { %880 = vmatprep.subr.bf16.mxu1 %v4834_v22 }
 0x141   :  { %881 = vmatpush1.bf16.msra.mxu1 %v4832_v24 }
 0x142   :  { %882 = vmatprep.subr.bf16.mxu1 %v4840_v26 }
 0x145   :  { %883 = vmatpush2.bf16.msra.mxu1 %v4838_v28 }
 0x146   :  { %884 = vmatprep.subr.bf16.mxu1 %v4846_v32 }
 0x149   :  { %885 = vmatpush2.bf16.msra.mxu1 %v4844_v31 }
 0x14a   :  { %886 = vmatprep.subr.bf16.mxu1 %v4852_v34 }
 0x14d   :  { %887 = vmatpush2.bf16.msra.mxu1 %v4850_v36 }
 0x14e   :  { %888 = vmatprep.subr.bf16.mxu1 %v4858_v38 }
 0x151   :  { %889 = vmatpush2.bf16.msra.mxu1 %v4856_v40 }
 0x152   :  { %890 = vmatprep.subr.bf16.mxu1 %v4864_v42  ;;  %v374_v42 = vunpack.c.l.s4 %v5206_v41 }
 0x154   :  { %v375_v43 = vunpack.c.0.s8 %v374_v42 }
 0x155   :  { %891 = vmatpush2.bf16.msra.mxu1 %v4862_v44 }
 0x156   :  { %892 = vmatprep.subr.bf16.mxu1 %v4870_v46  ;;  %v5288_v45 = vsub.s32 %v375_v43, %v5267_v47 }
 0x159   :  { %893 = vmatpush2.bf16.msra.mxu1 %v4868_v50 }
 0x15a   :  { %894 = vmatprep.subr.bf16.mxu1 %v4876_v52 }
 0x15d   :  { %895 = vmatpush2.bf16.msra.mxu1 %v4874_v54 }
 0x15e   :  { %896 = vmatprep.subr.bf16.mxu1 %v4882_v56  ;;  %v406_v56 = vrot.slane %v199_v53, %v5273_v49 }
 0x161   :  { %897 = vmatpush2.bf16.msra.mxu1 %v4880_v58 }
 0x1e4   :  { %v325_v63 = vpop.f32.mrf.mxu1 }
 0x1e5   :  { %v326_v0 = vadd.f32 %v325_v63, %v204_v61 }
 0x1e6   :  { %v327_v1 = vpop.f32.mrf.mxu1 }
 0x1e7   :  { %v332_v2 = vmax.f32 %v326_v0, 0.0  ;;  %v328_v3 = vadd.f32 %v327_v1, %v208_v62 }
 0x1e8   :  { %v329_v4 = vpop.f32.mrf.mxu1 }
 0x1e9   :  { %v334_v5 = vrot.slane %v332_v2, 4  ;;  %v333_v6 = vmax.f32 %v328_v3, 0.0 }
 0x1ea   :  { %v330_v7 = vpop.f32.mrf.mxu1 }
 0x1eb   :  { %v335_v8 = vadd.f32 %v334_v5, %v332_v2  ;;  %v340_v9 = vrot.slane %v333_v6, 4 }
 0x1ed   :  { %v336_v10 = vrot.slane %v335_v8, 2  ;;  %v341_v11 = vadd.f32 %v340_v9, %v333_v6 }
 0x1ef   :  { %v337_v12 = vadd.f32 %v336_v10, %v335_v8  ;;  %v342_v13 = vrot.slane %v341_v11, 2 }
 0x1f1   :  { %v338_v14 = vrot.slane %v337_v12, 1  ;;  %v343_v15 = vadd.f32 %v342_v13, %v341_v11 }
 0x1f3   :  { %v339_v16 = vadd.f32 %v338_v14, %v337_v12  ;;  %v344_v17 = vrot.slane %v343_v15, 1 }
 0x1f5   :  { %v346_v18 = vmul.f32 0.125, %v339_v16  ;;  %v345_v19 = vadd.f32 %v344_v17, %v343_v15 }
 0x1f7   :  { %v348_v20 = vsub.f32 %v332_v2, %v346_v18  ;;  %v347_v21 = vmul.f32 0.125, %v345_v19 }
 0x1f9   :  { %v350_v22 = vmul.f32 %v348_v20, %v348_v20  ;;  %v349_v23 = vsub.f32 %v333_v6, %v347_v21 }
 0x1fb   :  { %v352_v24 = vrot.slane %v350_v22, 4  ;;  %v351_v25 = vmul.f32 %v349_v23, %v349_v23 }
 0x1fd   :  { %v353_v26 = vadd.f32 %v352_v24, %v350_v22  ;;  %v358_v27 = vrot.slane %v351_v25, 4 }
 0x1ff   :  { %v354_v28 = vrot.slane %v353_v26, 2  ;;  %v359_v29 = vadd.f32 %v358_v27, %v351_v25 }
 0x201   :  { %v355_v30 = vadd.f32 %v354_v28, %v353_v26  ;;  %v360_v31 = vrot.slane %v359_v29, 2 }
 0x203   :  { %v356_v32 = vrot.slane %v355_v30, 1  ;;  %v361_v33 = vadd.f32 %v360_v31, %v359_v29 }
 0x205   :  { %v357_v34 = vadd.f32 %v356_v32, %v355_v30  ;;  %v362_v35 = vrot.slane %v361_v33, 1 }
 0x207   :  { %v364_v36 = vmul.f32 0.125, %v357_v34  ;;  %v363_v37 = vadd.f32 %v362_v35, %v361_v33 }
 0x209   :  { %v366_v38 = vadd.f32 1e-05, %v364_v36  ;;  %v365_v39 = vmul.f32 0.125, %v363_v37 }
 0x20b   :  { %v367_v40 = vadd.f32 1e-05, %v365_v39  ;;  %4885 = vrsqrt.f32 %v366_v38 }
 0x20d   :  { %4887 = vrsqrt.f32 %v367_v40 }
 0x218   :  { %v4886_v44 = vpop.eup %4885 }
 0x21a   :  { %v4888_v46 = vpop.eup %4887 }
 0x21b   :  { %v372_v48 = vcombine.low %v4886_v44, %v4888_v46 }
 0x21d   :  { %v379_v50 = vrot.slane %v372_v48, %v5288_v45 }
 0x21f   :  { %v386_v52 = vrot.slane %v379_v50, %v5288_v45 }
 0x221   :  { %v388_v54 = vmul.f32 %v386_v52, %v198_v51 }
 0x223   :  { %v397_v55 = vrot.slane %v388_v54, %v5283_v60  ;;  %v393_v58 = vrot.slane %v388_v54, %v5273_v49 }
 0x225   :  { %v401_v59 = vmul.f32 %v397_v55, %v349_v23  ;;  %v400_v61 = vmul.f32 %v393_v58, %v348_v20 }
 0x227   :  { %v414_v62 = vadd.f32 %v410_v57, %v401_v59  ;;  %v413_v63 = vadd.f32 %v406_v56, %v400_v61 }
 0x229   :  { %v416_v0 = vpack.c.bf16 %v414_v62, %v414_v62  ;;  %v415_v1 = vpack.c.bf16 %v413_v63, %v413_v63 }
 0x22b   :  { %857 = vmatprep.mubr.bf16.mxu0 %v416_v0  ;;  %898 = vmatprep.mubr.bf16.mxu1 %v416_v0 }
 0x22c   :  { %858 = vmatmul.mubr.bf16.vlgmr.msra.gmra.mxu0 %v415_v1  ;;  %899 = vmatmul.mubr.bf16.vlgmr.msra.gmra.mxu1 %v415_v1 }
 0x22d   :  { %5168 = shalt.err (!%p5165_p0)  }
 0x22e   :  { %61 = dma.hbm_to_vmem [thread:$0]  %s5534_s4, 32768, %s59_s30, [#allocation4] }
 0x22f   :  { %s5177_s13 = scalar_lea.vmem %s71_s9, 16384  ;;  %p5182_p2 = scmp.lt.s32.totalorder %s71_s9, %s71_s9 }
 0x230   :  { %p5178_p1 = scmp.ne.s32.totalorder %s71_s9, %s5177_s13  ;;  %p5183_p3 = scmp.lt.s32.totalorder %s5177_s13, %s5177_s13 }
 0x232   :  { %p5184_p4 = por %p5183_p3, %p5182_p2 }
 0x234   :  { %p5185_p5 = pnand %p5184_p4, %p5178_p1 }
 0x236   :  { %5188 = shalt.err (!%p5185_p5)  }
 0x237   :  { %73 = dma.hbm_to_vmem [thread:$0]  %s5535_s5, 16384, %s71_s9, [#allocation4 + $0x1]  ;;  %v5309_v2 = vsub.s32 2, %v5267_v47  ;;  %v481_v3 = vld [vmem:[%s5536_s6 + $0x9] sm:$0xf]  ;;  %v5315_v4 = vsub.s32 3, %v5267_v47 }
 0x238   :  { %v488_v5 = vrot.slane %v481_v3, %v5273_v49  ;;  %v492_v7 = vrot.slane %v481_v3, %v5283_v60 }
 0x239   :  { %v496_v6 = vrot.slane %v481_v3, %v5309_v2  ;;  %v500_v8 = vrot.slane %v481_v3, %v5315_v4 }
 0x2ec   :  { %v859_v9 = vpop.f32.mrf.mxu0  ;;  %v900_v10 = vpop.f32.mrf.mxu1 }
 0x2ed   :  { %v860_v11 = vadd.f32 %v859_v9, %v488_v5  ;;  %v901_v12 = vadd.f32 %v900_v10, %v496_v6 }
 0x2ee   :  { %v861_v13 = vpop.f32.mrf.mxu0  ;;  %v902_v14 = vpop.f32.mrf.mxu1 }
 0x2ef   :  { %v907_v15 = vmax.f32 %v860_v11, 0.0  ;;  %v909_v16 = vmax.f32 %v901_v12, 0.0  ;;  %v862_v17 = vadd.f32 %v861_v13, %v492_v7  ;;  %v903_v18 = vadd.f32 %v902_v14, %v500_v8 }
 0x2f0   :  { %v863_v19 = vpop.f32.mrf.mxu0  ;;  %v904_v20 = vpop.f32.mrf.mxu1 }
 0x2f1   :  { %v911_v21 = vrot.slane %v907_v15, 4  ;;  %v923_v22 = vrot.slane %v909_v16, 4  ;;  %v908_v23 = vmax.f32 %v862_v17, 0.0  ;;  %v910_v24 = vmax.f32 %v903_v18, 0.0 }
 0x2f2   :  { %v864_v25 = vpop.f32.mrf.mxu0  ;;  %v905_v26 = vpop.f32.mrf.mxu1 }
 0x2f3   :  { %v912_v27 = vadd.f32 %v911_v21, %v907_v15  ;;  %v924_v28 = vadd.f32 %v923_v22, %v909_v16  ;;  %v917_v29 = vrot.slane %v908_v23, 4  ;;  %v929_v30 = vrot.slane %v910_v24, 4 }
 0x2f5   :  { %v913_v31 = vrot.slane %v912_v27, 2  ;;  %v925_v32 = vrot.slane %v924_v28, 2  ;;  %v918_v33 = vadd.f32 %v917_v29, %v908_v23  ;;  %v930_v34 = vadd.f32 %v929_v30, %v910_v24 }
 0x2f7   :  { %v914_v35 = vadd.f32 %v913_v31, %v912_v27  ;;  %v926_v36 = vadd.f32 %v925_v32, %v924_v28  ;;  %v919_v37 = vrot.slane %v918_v33, 2  ;;  %v931_v38 = vrot.slane %v930_v34, 2 }
 0x2f9   :  { %v915_v39 = vrot.slane %v914_v35, 1  ;;  %v927_v40 = vrot.slane %v926_v36, 1  ;;  %v920_v41 = vadd.f32 %v919_v37, %v918_v33  ;;  %v932_v42 = vadd.f32 %v931_v38, %v930_v34 }
 0x2fb   :  { %v916_v43 = vadd.f32 %v915_v39, %v914_v35  ;;  %v928_v44 = vadd.f32 %v927_v40, %v926_v36  ;;  %v921_v46 = vrot.slane %v920_v41, 1  ;;  %v933_v48 = vrot.slane %v932_v42, 1 }
 0x2fd   :  { %v935_v50 = vmul.f32 0.125, %v916_v43  ;;  %v937_v51 = vmul.f32 0.125, %v928_v44  ;;  %v922_v52 = vadd.f32 %v921_v46, %v920_v41  ;;  %v934_v53 = vadd.f32 %v933_v48, %v932_v42  ;;  %v482_v44 = vld [vmem:[%s5536_s6 + $0xd] sm:$0xf]  ;;  %v483_v46 = vld [vmem:[%s5536_s6 + $0x11] sm:$0xf] }
 0x2ff   :  { %v5321_v54 = vsub.f32 %v907_v15, %v935_v50  ;;  %v5323_v55 = vsub.f32 %v909_v16, %v937_v51  ;;  %v936_v56 = vmul.f32 0.125, %v922_v52  ;;  %v938_v57 = vmul.f32 0.125, %v934_v53 }
 0x300   :  { %v1042_v51 = vrot.slane %v483_v46, %v5273_v49  ;;  %v1046_v52 = vrot.slane %v483_v46, %v5283_v60  ;;  %v1050_v53 = vrot.slane %v483_v46, %v5309_v2 }
 0x301   :  { %v943_v58 = vmul.f32 %v5321_v54, %v5321_v54  ;;  %v945_v59 = vmul.f32 %v5323_v55, %v5323_v55  ;;  %v940_v61 = vsub.f32 %v908_v23, %v936_v56  ;;  %v5329_v62 = vsub.f32 %v910_v24, %v938_v57 }
 0x302   :  { %v1054_v56 = vrot.slane %v483_v46, %v5315_v4 }
 0x303   :  { %v947_v63 = vrot.slane %v943_v58, 4  ;;  %v959_v0 = vrot.slane %v945_v59, 4  ;;  %v944_v1 = vmul.f32 %v940_v61, %v940_v61  ;;  %v946_v3 = vmul.f32 %v5329_v62, %v5329_v62 }
 0x305   :  { %v948_v5 = vadd.f32 %v947_v63, %v943_v58  ;;  %v960_v6 = vadd.f32 %v959_v0, %v945_v59  ;;  %v953_v7 = vrot.slane %v944_v1, 4  ;;  %v965_v8 = vrot.slane %v946_v3, 4 }
 0x307   :  { %v949_v9 = vrot.slane %v948_v5, 2  ;;  %v961_v10 = vrot.slane %v960_v6, 2  ;;  %v954_v11 = vadd.f32 %v953_v7, %v944_v1  ;;  %v966_v12 = vadd.f32 %v965_v8, %v946_v3 }
 0x309   :  { %v950_v13 = vadd.f32 %v949_v9, %v948_v5  ;;  %v962_v14 = vadd.f32 %v961_v10, %v960_v6  ;;  %v955_v15 = vrot.slane %v954_v11, 2  ;;  %v967_v16 = vrot.slane %v966_v12, 2 }
 0x30b   :  { %v951_v17 = vrot.slane %v950_v13, 1  ;;  %v963_v18 = vrot.slane %v962_v14, 1  ;;  %v956_v19 = vadd.f32 %v955_v15, %v954_v11  ;;  %v968_v20 = vadd.f32 %v967_v16, %v966_v12 }
 0x30d   :  { %v952_v21 = vadd.f32 %v951_v17, %v950_v13  ;;  %v964_v22 = vadd.f32 %v963_v18, %v962_v14  ;;  %v957_v23 = vrot.slane %v956_v19, 1  ;;  %v969_v24 = vrot.slane %v968_v20, 1 }
 0x30f   :  { %v971_v25 = vmul.f32 0.125, %v952_v21  ;;  %v973_v26 = vmul.f32 0.125, %v964_v22  ;;  %v958_v27 = vadd.f32 %v957_v23, %v956_v19  ;;  %v970_v28 = vadd.f32 %v969_v24, %v968_v20 }
 0x311   :  { %v975_v29 = vadd.f32 1e-05, %v971_v25  ;;  %v977_v30 = vadd.f32 1e-05, %v973_v26  ;;  %v972_v31 = vmul.f32 0.125, %v958_v27  ;;  %v974_v32 = vmul.f32 0.125, %v970_v28 }
 0x313   :  { %4889 = vrsqrt.f32 %v975_v29  ;;  %v976_v33 = vadd.f32 1e-05, %v972_v31  ;;  %v978_v34 = vadd.f32 1e-05, %v974_v32 }
 0x314   :  { %4891 = vrsqrt.f32 %v977_v30 }
 0x315   :  { %4893 = vrsqrt.f32 %v976_v33 }
 0x316   :  { %4895 = vrsqrt.f32 %v978_v34 }
 0x320   :  { %v4890_v35 = vpop.eup %4889 }
 0x321   :  { %v4892_v36 = vpop.eup %4891 }
 0x322   :  { %v4894_v37 = vpop.eup %4893 }
 0x323   :  { %v4896_v38 = vpop.eup %4895  ;;  %v987_v39 = vcombine.low %v4890_v35, %v4894_v37 }
 0x324   :  { %v988_v40 = vcombine.low %v4892_v36, %v4896_v38 }
 0x325   :  { %v995_v41 = vrot.slane %v987_v39, %v5288_v45 }
 0x326   :  { %v1002_v42 = vrot.slane %v988_v40, %v5288_v45 }
 0x328   :  { %v1003_v43 = vcombine.low %v995_v41, %v1002_v42 }
 0x32a   :  { %v1010_v48 = vrot.slane %v1003_v43, %v5288_v45 }
 0x32c   :  { %v1012_v50 = vmul.f32 %v1010_v48, %v482_v44 }
 0x32e   :  { %v1017_v57 = vrot.slane %v1012_v50, %v5273_v49  ;;  %v1021_v58 = vrot.slane %v1012_v50, %v5283_v60  ;;  %v1025_v59 = vrot.slane %v1012_v50, %v5309_v2  ;;  %v1029_v63 = vrot.slane %v1012_v50, %v5315_v4 }
 0x330   :  { %v1034_v0 = vmul.f32 %v1017_v57, %v5321_v54  ;;  %v1035_v1 = vmul.f32 %v1021_v58, %v940_v61  ;;  %v1036_v3 = vmul.f32 %v1025_v59, %v5323_v55  ;;  %v1037_v5 = vmul.f32 %v1029_v63, %v5329_v62 }
 0x332   :  { %v1059_v6 = vadd.f32 %v1042_v51, %v1034_v0  ;;  %v1060_v7 = vadd.f32 %v1046_v52, %v1035_v1  ;;  %v1061_v8 = vadd.f32 %v1050_v53, %v1036_v3  ;;  %v1062_v9 = vadd.f32 %v1054_v56, %v1037_v5 }
 0x334   :  { %v5353_v10 = vpack.c.bf16 %v1059_v6, %v1059_v6  ;;  %v5355_v11 = vpack.c.bf16 %v1060_v7, %v1060_v7  ;;  %v5357_v12 = vpack.c.bf16 %v1061_v8, %v1061_v8  ;;  %v5359_v13 = vpack.c.bf16 %v1062_v9, %v1062_v9 }
 0x335   :  { %5193 = dma.done.wait [#allocation4], 32768 }
 0x336   :  { %5194 = vsyncadd [#allocation4], 4294934528  ;;  %2683 = vmatprep.mubr.bf16.mxu0 %v5355_v11  ;;  %2724 = vmatprep.mubr.bf16.mxu1 %v5359_v13  ;;  %v1127_v54 = vld [vmem:[#allocation2 + $0x1c0] sm:$0xff] }
 0x337   :  { %v1131_v55 = vld [vmem:[#allocation2 + $0x1e0] sm:$0xff] }
 0x338   :  { %v1255_v61 = vld [vmem:[#allocation2 + $0x5c0] sm:$0xff]  ;;  %v4409_v62 = vcombine.high %v1127_v54, %v1131_v55  ;;  %v4408_v15 = vcombine.low %v1127_v54, %v1131_v55 }
 0x339   :  { %v1259_v14 = vld [vmem:[#allocation2 + $0x5e0] sm:$0xff] }
 0x33a   :  { %v1119_v16 = vld [vmem:[#allocation2 + $0x180] sm:$0xff]  ;;  %v4537_v18 = vcombine.high %v1255_v61, %v1259_v14  ;;  %v4536_v19 = vcombine.low %v1255_v61, %v1259_v14  ;;  %2651 = vmatprep.subr.bf16.mxu0 %v4409_v62 }
 0x33b   :  { %v1123_v17 = vld [vmem:[#allocation2 + $0x1a0] sm:$0xff]  ;;  %2652 = vmatpush1.bf16.msra.mxu0 %v4408_v15 }
 0x33c   :  { %v4401_v20 = vcombine.high %v1119_v16, %v1123_v17  ;;  %v1247_v21 = vld [vmem:[#allocation2 + $0x580] sm:$0xff]  ;;  %2692 = vmatprep.subr.bf16.mxu1 %v4537_v18  ;;  %v4400_v28 = vcombine.low %v1119_v16, %v1123_v17 }
 0x33d   :  { %v1251_v22 = vld [vmem:[#allocation2 + $0x5a0] sm:$0xff]  ;;  %2693 = vmatpush1.bf16.msra.mxu1 %v4536_v19 }
 0x33e   :  { %v1111_v23 = vld [vmem:[#allocation2 + $0x140] sm:$0xff]  ;;  %v4529_v24 = vcombine.high %v1247_v21, %v1251_v22  ;;  %2653 = vmatprep.subr.bf16.mxu0 %v4401_v20  ;;  %v4528_v29 = vcombine.low %v1247_v21, %v1251_v22 }
 0x33f   :  { %v1115_v25 = vld [vmem:[#allocation2 + $0x160] sm:$0xff]  ;;  %2654 = vmatpush1.bf16.msra.mxu0 %v4400_v28 }
 0x340   :  { %v1239_v26 = vld [vmem:[#allocation2 + $0x540] sm:$0xff]  ;;  %v4393_v30 = vcombine.high %v1111_v23, %v1115_v25  ;;  %2694 = vmatprep.subr.bf16.mxu1 %v4529_v24  ;;  %v4392_v36 = vcombine.low %v1111_v23, %v1115_v25 }
 0x341   :  { %v1243_v27 = vld [vmem:[#allocation2 + $0x560] sm:$0xff]  ;;  %2695 = vmatpush1.bf16.msra.mxu1 %v4528_v29 }
 0x342   :  { %v4521_v31 = vcombine.high %v1239_v26, %v1243_v27  ;;  %v1103_v32 = vld [vmem:[#allocation2 + $0x100] sm:$0xff]  ;;  %2655 = vmatprep.subr.bf16.mxu0 %v4393_v30  ;;  %v4520_v37 = vcombine.low %v1239_v26, %v1243_v27 }
 0x343   :  { %v1107_v33 = vld [vmem:[#allocation2 + $0x120] sm:$0xff]  ;;  %2656 = vmatpush1.bf16.msra.mxu0 %v4392_v36 }
 0x344   :  { %v1231_v34 = vld [vmem:[#allocation2 + $0x500] sm:$0xff]  ;;  %v4385_v38 = vcombine.high %v1103_v32, %v1107_v33  ;;  %2696 = vmatprep.subr.bf16.mxu1 %v4521_v31  ;;  %v4384_v44 = vcombine.low %v1103_v32, %v1107_v33 }
 0x345   :  { %v1235_v35 = vld [vmem:[#allocation2 + $0x520] sm:$0xff]  ;;  %2697 = vmatpush1.bf16.msra.mxu1 %v4520_v37 }
 0x346   :  { %v4513_v39 = vcombine.high %v1231_v34, %v1235_v35  ;;  %v1095_v40 = vld [vmem:[#allocation2 + $0xc0] sm:$0xff]  ;;  %2657 = vmatprep.subr.bf16.mxu0 %v4385_v38  ;;  %v4512_v46 = vcombine.low %v1231_v34, %v1235_v35 }
 0x347   :  { %v1099_v41 = vld [vmem:[#allocation2 + $0xe0] sm:$0xff]  ;;  %2658 = vmatpush1.bf16.msra.mxu0 %v4384_v44 }
 0x348   :  { %v1223_v42 = vld [vmem:[#allocation2 + $0x4c0] sm:$0xff]  ;;  %v4377_v48 = vcombine.high %v1095_v40, %v1099_v41  ;;  %2698 = vmatprep.subr.bf16.mxu1 %v4513_v39  ;;  %v4376_v57 = vcombine.low %v1095_v40, %v1099_v41 }
 0x349   :  { %v1227_v43 = vld [vmem:[#allocation2 + $0x4e0] sm:$0xff]  ;;  %2699 = vmatpush1.bf16.msra.mxu1 %v4512_v46 }
 0x34a   :  { %v4505_v50 = vcombine.high %v1223_v42, %v1227_v43  ;;  %v1087_v51 = vld [vmem:[#allocation2 + $0x80] sm:$0xff]  ;;  %2659 = vmatprep.subr.bf16.mxu0 %v4377_v48  ;;  %v4504_v58 = vcombine.low %v1223_v42, %v1227_v43 }
 0x34b   :  { %v1091_v52 = vld [vmem:[#allocation2 + $0xa0] sm:$0xff]  ;;  %2660 = vmatpush1.bf16.msra.mxu0 %v4376_v57 }
 0x34c   :  { %v1215_v53 = vld [vmem:[#allocation2 + $0x480] sm:$0xff]  ;;  %v4369_v59 = vcombine.high %v1087_v51, %v1091_v52  ;;  %2700 = vmatprep.subr.bf16.mxu1 %v4505_v50  ;;  %v4368_v6 = vcombine.low %v1087_v51, %v1091_v52 }
 0x34d   :  { %v1219_v56 = vld [vmem:[#allocation2 + $0x4a0] sm:$0xff]  ;;  %2701 = vmatpush1.bf16.msra.mxu1 %v4504_v58 }
 0x34e   :  { %v4497_v63 = vcombine.high %v1215_v53, %v1219_v56  ;;  %v1079_v0 = vld [vmem:[#allocation2 + $0x40] sm:$0xff]  ;;  %2661 = vmatprep.subr.bf16.mxu0 %v4369_v59  ;;  %v4496_v7 = vcombine.low %v1215_v53, %v1219_v56 }
 0x34f   :  { %v1083_v1 = vld [vmem:[#allocation2 + $0x60] sm:$0xff]  ;;  %2662 = vmatpush1.bf16.msra.mxu0 %v4368_v6 }
 0x350   :  { %v1207_v3 = vld [vmem:[#allocation2 + $0x440] sm:$0xff]  ;;  %v4361_v8 = vcombine.high %v1079_v0, %v1083_v1  ;;  %2702 = vmatprep.subr.bf16.mxu1 %v4497_v63  ;;  %v4360_v14 = vcombine.low %v1079_v0, %v1083_v1 }
 0x351   :  { %v1211_v5 = vld [vmem:[#allocation2 + $0x460] sm:$0xff]  ;;  %2703 = vmatpush1.bf16.msra.mxu1 %v4496_v7 }
 0x352   :  { %v4489_v9 = vcombine.high %v1207_v3, %v1211_v5  ;;  %v1071_v54 = vld [vmem:[#allocation2] sm:$0xff]  ;;  %2663 = vmatprep.subr.bf16.mxu0 %v4361_v8  ;;  %v4488_v15 = vcombine.low %v1207_v3, %v1211_v5 }
 0x353   :  { %v1075_v55 = vld [vmem:[#allocation2 + $0x20] sm:$0xff]  ;;  %2664 = vmatpush1.bf16.msra.mxu0 %v4360_v14 }
 0x354   :  { %v1199_v61 = vld [vmem:[#allocation2 + $0x400] sm:$0xff]  ;;  %v4353_v16 = vcombine.high %v1071_v54, %v1075_v55  ;;  %2704 = vmatprep.subr.bf16.mxu1 %v4489_v9  ;;  %v4352_v22 = vcombine.low %v1071_v54, %v1075_v55 }
 0x355   :  { %v1203_v62 = vld [vmem:[#allocation2 + $0x420] sm:$0xff]  ;;  %2705 = vmatpush1.bf16.msra.mxu1 %v4488_v15 }
 0x356   :  { %v4481_v17 = vcombine.high %v1199_v61, %v1203_v62  ;;  %v1191_v18 = vld [vmem:[#allocation2 + $0x3c0] sm:$0xff]  ;;  %2665 = vmatprep.subr.bf16.mxu0 %v4353_v16  ;;  %v4480_v23 = vcombine.low %v1199_v61, %v1203_v62 }
 0x357   :  { %v1195_v19 = vld [vmem:[#allocation2 + $0x3e0] sm:$0xff]  ;;  %2666 = vmatpush1.bf16.msra.mxu0 %v4352_v22 }
 0x358   :  { %v1319_v20 = vld [vmem:[#allocation2 + $0x7c0] sm:$0xff]  ;;  %v4473_v24 = vcombine.high %v1191_v18, %v1195_v19  ;;  %2706 = vmatprep.subr.bf16.mxu1 %v4481_v17  ;;  %v4472_v30 = vcombine.low %v1191_v18, %v1195_v19 }
 0x359   :  { %v1323_v21 = vld [vmem:[#allocation2 + $0x7e0] sm:$0xff]  ;;  %2707 = vmatpush1.bf16.msra.mxu1 %v4480_v23 }
 0x35a   :  { %v4601_v25 = vcombine.high %v1319_v20, %v1323_v21  ;;  %v1183_v26 = vld [vmem:[#allocation2 + $0x380] sm:$0xff]  ;;  %2667 = vmatprep.subr.bf16.mxu0 %v4473_v24  ;;  %v4600_v31 = vcombine.low %v1319_v20, %v1323_v21 }
 0x35b   :  { %v1187_v27 = vld [vmem:[#allocation2 + $0x3a0] sm:$0xff]  ;;  %2668 = vmatpush2.bf16.msra.mxu0 %v4472_v30  ;;  %v1256_v30 = vld [vmem:[#allocation2 + $0x5c8] sm:$0xff] }
 0x35c   :  { %v1311_v28 = vld [vmem:[#allocation2 + $0x780] sm:$0xff]  ;;  %v4465_v32 = vcombine.high %v1183_v26, %v1187_v27  ;;  %2708 = vmatprep.subr.bf16.mxu1 %v4601_v25  ;;  %v4464_v38 = vcombine.low %v1183_v26, %v1187_v27 }
 0x35d   :  { %v1315_v29 = vld [vmem:[#allocation2 + $0x7a0] sm:$0xff]  ;;  %2709 = vmatpush2.bf16.msra.mxu1 %v4600_v31  ;;  %v1260_v31 = vld [vmem:[#allocation2 + $0x5e8] sm:$0xff] }
 0x35e   :  { %v4593_v33 = vcombine.high %v1311_v28, %v1315_v29  ;;  %v1175_v34 = vld [vmem:[#allocation2 + $0x340] sm:$0xff]  ;;  %2669 = vmatprep.subr.bf16.mxu0 %v4465_v32  ;;  %v4592_v39 = vcombine.low %v1311_v28, %v1315_v29  ;;  %v1128_v28 = vld [vmem:[#allocation2 + $0x1c8] sm:$0xff] }
 0x35f   :  { %v1179_v35 = vld [vmem:[#allocation2 + $0x360] sm:$0xff]  ;;  %2670 = vmatpush2.bf16.msra.mxu0 %v4464_v38  ;;  %v1132_v29 = vld [vmem:[#allocation2 + $0x1e8] sm:$0xff] }
 0x360   :  { %v1303_v36 = vld [vmem:[#allocation2 + $0x740] sm:$0xff]  ;;  %v4457_v40 = vcombine.high %v1175_v34, %v1179_v35  ;;  %2710 = vmatprep.subr.bf16.mxu1 %v4593_v33  ;;  %v4456_v48 = vcombine.low %v1175_v34, %v1179_v35  ;;  %v4411_v34 = vcombine.high %v1128_v28, %v1132_v29  ;;  %v4539_v35 = vcombine.high %v1256_v30, %v1260_v31  ;;  %v1248_v38 = vld [vmem:[#allocation2 + $0x588] sm:$0xff] }
 0x361   :  { %v1307_v37 = vld [vmem:[#allocation2 + $0x760] sm:$0xff]  ;;  %2711 = vmatpush2.bf16.msra.mxu1 %v4592_v39  ;;  %v1252_v39 = vld [vmem:[#allocation2 + $0x5a8] sm:$0xff] }
 0x362   :  { %v4585_v41 = vcombine.high %v1303_v36, %v1307_v37  ;;  %v1167_v42 = vld [vmem:[#allocation2 + $0x300] sm:$0xff]  ;;  %2671 = vmatprep.subr.bf16.mxu0 %v4457_v40  ;;  %v4584_v50 = vcombine.low %v1303_v36, %v1307_v37  ;;  %v1120_v36 = vld [vmem:[#allocation2 + $0x188] sm:$0xff]  ;;  %v4410_v40 = vcombine.low %v1128_v28, %v1132_v29 }
 0x363   :  { %v1171_v43 = vld [vmem:[#allocation2 + $0x320] sm:$0xff]  ;;  %2672 = vmatpush2.bf16.msra.mxu0 %v4456_v48  ;;  %v1124_v37 = vld [vmem:[#allocation2 + $0x1a8] sm:$0xff] }
 0x364   :  { %v1295_v44 = vld [vmem:[#allocation2 + $0x700] sm:$0xff]  ;;  %v4449_v51 = vcombine.high %v1167_v42, %v1171_v43  ;;  %2712 = vmatprep.subr.bf16.mxu1 %v4585_v41  ;;  %v4448_v59 = vcombine.low %v1167_v42, %v1171_v43  ;;  %v4538_v41 = vcombine.low %v1256_v30, %v1260_v31  ;;  %v4403_v42 = vcombine.high %v1120_v36, %v1124_v37  ;;  %v1240_v48 = vld [vmem:[#allocation2 + $0x548] sm:$0xff] }
 0x365   :  { %v1299_v46 = vld [vmem:[#allocation2 + $0x720] sm:$0xff]  ;;  %2713 = vmatpush2.bf16.msra.mxu1 %v4584_v50  ;;  %v4531_v43 = vcombine.high %v1248_v38, %v1252_v39  ;;  %v1244_v50 = vld [vmem:[#allocation2 + $0x568] sm:$0xff] }
 0x366   :  { %v4577_v52 = vcombine.high %v1295_v44, %v1299_v46  ;;  %v1159_v53 = vld [vmem:[#allocation2 + $0x2c0] sm:$0xff]  ;;  %2673 = vmatprep.subr.bf16.mxu0 %v4449_v51  ;;  %v4576_v63 = vcombine.low %v1295_v44, %v1299_v46  ;;  %v1112_v44 = vld [vmem:[#allocation2 + $0x148] sm:$0xff]  ;;  %v4402_v51 = vcombine.low %v1120_v36, %v1124_v37 }
 0x367   :  { %v1163_v56 = vld [vmem:[#allocation2 + $0x2e0] sm:$0xff]  ;;  %2674 = vmatpush2.bf16.msra.mxu0 %v4448_v59  ;;  %v1116_v46 = vld [vmem:[#allocation2 + $0x168] sm:$0xff] }
 0x368   :  { %v1287_v57 = vld [vmem:[#allocation2 + $0x6c0] sm:$0xff]  ;;  %v4441_v0 = vcombine.high %v1159_v53, %v1163_v56  ;;  %2714 = vmatprep.subr.bf16.mxu1 %v4577_v52  ;;  %v4440_v8 = vcombine.low %v1159_v53, %v1163_v56  ;;  %v4530_v52 = vcombine.low %v1248_v38, %v1252_v39  ;;  %v4395_v53 = vcombine.high %v1112_v44, %v1116_v46  ;;  %v1232_v59 = vld [vmem:[#allocation2 + $0x508] sm:$0xff] }
 0x369   :  { %v1291_v58 = vld [vmem:[#allocation2 + $0x6e0] sm:$0xff]  ;;  %2715 = vmatpush2.bf16.msra.mxu1 %v4576_v63  ;;  %v4523_v56 = vcombine.high %v1240_v48, %v1244_v50  ;;  %v1236_v63 = vld [vmem:[#allocation2 + $0x528] sm:$0xff] }
 0x36a   :  { %v4569_v1 = vcombine.high %v1287_v57, %v1291_v58  ;;  %v1151_v3 = vld [vmem:[#allocation2 + $0x280] sm:$0xff]  ;;  %2675 = vmatprep.subr.bf16.mxu0 %v4441_v0  ;;  %v4568_v9 = vcombine.low %v1287_v57, %v1291_v58  ;;  %v1104_v57 = vld [vmem:[#allocation2 + $0x108] sm:$0xff]  ;;  %v4394_v0 = vcombine.low %v1112_v44, %v1116_v46 }
 0x36b   :  { %v1155_v5 = vld [vmem:[#allocation2 + $0x2a0] sm:$0xff]  ;;  %2676 = vmatpush2.bf16.msra.mxu0 %v4440_v8  ;;  %v1108_v58 = vld [vmem:[#allocation2 + $0x128] sm:$0xff] }
 0x36c   :  { %v1279_v6 = vld [vmem:[#allocation2 + $0x680] sm:$0xff]  ;;  %v4433_v54 = vcombine.high %v1151_v3, %v1155_v5  ;;  %2716 = vmatprep.subr.bf16.mxu1 %v4569_v1  ;;  %v4432_v16 = vcombine.low %v1151_v3, %v1155_v5  ;;  %v4522_v1 = vcombine.low %v1240_v48, %v1244_v50  ;;  %v4387_v3 = vcombine.high %v1104_v57, %v1108_v58  ;;  %v1224_v8 = vld [vmem:[#allocation2 + $0x4c8] sm:$0xff] }
 0x36d   :  { %v1283_v7 = vld [vmem:[#allocation2 + $0x6a0] sm:$0xff]  ;;  %2717 = vmatpush2.bf16.msra.mxu1 %v4568_v9  ;;  %v4515_v5 = vcombine.high %v1232_v59, %v1236_v63  ;;  %v1228_v9 = vld [vmem:[#allocation2 + $0x4e8] sm:$0xff] }
 0x36e   :  { %v4561_v55 = vcombine.high %v1279_v6, %v1283_v7  ;;  %v1143_v61 = vld [vmem:[#allocation2 + $0x240] sm:$0xff]  ;;  %2677 = vmatprep.subr.bf16.mxu0 %v4433_v54  ;;  %v4560_v17 = vcombine.low %v1279_v6, %v1283_v7  ;;  %v1096_v6 = vld [vmem:[#allocation2 + $0xc8] sm:$0xff]  ;;  %v4386_v54 = vcombine.low %v1104_v57, %v1108_v58 }
 0x36f   :  { %v1147_v62 = vld [vmem:[#allocation2 + $0x260] sm:$0xff]  ;;  %2678 = vmatpush2.bf16.msra.mxu0 %v4432_v16  ;;  %v1100_v7 = vld [vmem:[#allocation2 + $0xe8] sm:$0xff] }
 0x370   :  { %v1271_v14 = vld [vmem:[#allocation2 + $0x640] sm:$0xff]  ;;  %v4425_v18 = vcombine.high %v1143_v61, %v1147_v62  ;;  %2718 = vmatprep.subr.bf16.mxu1 %v4561_v55  ;;  %v4424_v24 = vcombine.low %v1143_v61, %v1147_v62  ;;  %v4514_v55 = vcombine.low %v1232_v59, %v1236_v63  ;;  %v4379_v61 = vcombine.high %v1096_v6, %v1100_v7  ;;  %v1216_v16 = vld [vmem:[#allocation2 + $0x488] sm:$0xff] }
 0x371   :  { %v1275_v15 = vld [vmem:[#allocation2 + $0x660] sm:$0xff]  ;;  %2719 = vmatpush2.bf16.msra.mxu1 %v4560_v17  ;;  %v4507_v62 = vcombine.high %v1224_v8, %v1228_v9  ;;  %v1220_v17 = vld [vmem:[#allocation2 + $0x4a8] sm:$0xff] }
 0x372   :  { %v4553_v19 = vcombine.high %v1271_v14, %v1275_v15  ;;  %v1135_v20 = vld [vmem:[#allocation2 + $0x200] sm:$0xff]  ;;  %2679 = vmatprep.subr.bf16.mxu0 %v4425_v18  ;;  %v4552_v25 = vcombine.low %v1271_v14, %v1275_v15  ;;  %v1088_v14 = vld [vmem:[#allocation2 + $0x88] sm:$0xff]  ;;  %v4378_v18 = vcombine.low %v1096_v6, %v1100_v7 }
 0x373   :  { %v1139_v21 = vld [vmem:[#allocation2 + $0x220] sm:$0xff]  ;;  %2680 = vmatpush2.bf16.msra.mxu0 %v4424_v24  ;;  %v1092_v15 = vld [vmem:[#allocation2 + $0xa8] sm:$0xff] }
 0x374   :  { %v1263_v22 = vld [vmem:[#allocation2 + $0x600] sm:$0xff]  ;;  %v4417_v26 = vcombine.high %v1135_v20, %v1139_v21  ;;  %2720 = vmatprep.subr.bf16.mxu1 %v4553_v19  ;;  %v4416_v32 = vcombine.low %v1135_v20, %v1139_v21  ;;  %v4506_v19 = vcombine.low %v1224_v8, %v1228_v9  ;;  %v4371_v20 = vcombine.high %v1088_v14, %v1092_v15  ;;  %v1208_v24 = vld [vmem:[#allocation2 + $0x448] sm:$0xff] }
 0x375   :  { %v1267_v23 = vld [vmem:[#allocation2 + $0x620] sm:$0xff]  ;;  %2721 = vmatpush2.bf16.msra.mxu1 %v4552_v25  ;;  %v4499_v21 = vcombine.high %v1216_v16, %v1220_v17  ;;  %v1212_v25 = vld [vmem:[#allocation2 + $0x468] sm:$0xff] }
 0x376   :  { %v4545_v27 = vcombine.high %v1263_v22, %v1267_v23  ;;  %2681 = vmatprep.subr.bf16.mxu0 %v4417_v26  ;;  %v4544_v33 = vcombine.low %v1263_v22, %v1267_v23  ;;  %v1080_v22 = vld [vmem:[#allocation2 + $0x48] sm:$0xff]  ;;  %v4370_v26 = vcombine.low %v1088_v14, %v1092_v15  ;;  %v4491_v29 = vcombine.high %v1208_v24, %v1212_v25 }
 0x377   :  { %2682 = vmatpush2.bf16.msra.mxu0 %v4416_v32  ;;  %v1084_v23 = vld [vmem:[#allocation2 + $0x68] sm:$0xff] }
 0x378   :  { %2722 = vmatprep.subr.bf16.mxu1 %v4545_v27  ;;  %2733 = vmatprep.subr.bf16.mxu0 %v4411_v34  ;;  %v4498_v27 = vcombine.low %v1216_v16, %v1220_v17  ;;  %v4363_v28 = vcombine.high %v1080_v22, %v1084_v23  ;;  %v1072_v30 = vld [vmem:[#allocation2 + $0x8] sm:$0xff]  ;;  %v4362_v34 = vcombine.low %v1080_v22, %v1084_v23 }
 0x379   :  { %2723 = vmatpush2.bf16.msra.mxu1 %v4544_v33  ;;  %v1076_v31 = vld [vmem:[#allocation2 + $0x28] sm:$0xff] }
 0x37a   :  { %2774 = vmatprep.subr.bf16.mxu1 %v4539_v35  ;;  %2684 = vmatmul.mubr.bf16.vlgmr.msra.gmra.mxu0 %v5353_v10  ;;  %v1200_v32 = vld [vmem:[#allocation2 + $0x408] sm:$0xff]  ;;  %v4490_v35 = vcombine.low %v1208_v24, %v1212_v25  ;;  %v4355_v36 = vcombine.high %v1072_v30, %v1076_v31 }
 0x37b   :  { %2734 = vmatpush1.bf16.msra.mxu0 %v4410_v40  ;;  %2765 = vmatprep.mubr.bf16.mxu0 %v5355_v11  ;;  %v1204_v33 = vld [vmem:[#allocation2 + $0x428] sm:$0xff] }
 0x37c   :  { %2725 = vmatmul.mubr.bf16.vlgmr.msra.gmra.mxu1 %v5357_v12  ;;  %2735 = vmatprep.subr.bf16.mxu0 %v4403_v42  ;;  %v4483_v37 = vcombine.high %v1200_v32, %v1204_v33  ;;  %v1192_v38 = vld [vmem:[#allocation2 + $0x3c8] sm:$0xff]  ;;  %v4354_v42 = vcombine.low %v1072_v30, %v1076_v31 }
 0x37d   :  { %2775 = vmatpush1.bf16.msra.mxu1 %v4538_v41  ;;  %2806 = vmatprep.mubr.bf16.mxu1 %v5359_v13  ;;  %v1196_v39 = vld [vmem:[#allocation2 + $0x3e8] sm:$0xff] }
 0x37e   :  { %2776 = vmatprep.subr.bf16.mxu1 %v4531_v43  ;;  %v1320_v40 = vld [vmem:[#allocation2 + $0x7c8] sm:$0xff]  ;;  %v4482_v43 = vcombine.low %v1200_v32, %v1204_v33  ;;  %v4475_v44 = vcombine.high %v1192_v38, %v1196_v39 }
 0x37f   :  { %2736 = vmatpush1.bf16.msra.mxu0 %v4402_v51  ;;  %v1324_v41 = vld [vmem:[#allocation2 + $0x7e8] sm:$0xff] }
 0x380   :  { %2737 = vmatprep.subr.bf16.mxu0 %v4395_v53  ;;  %v4603_v46 = vcombine.high %v1320_v40, %v1324_v41  ;;  %v1184_v48 = vld [vmem:[#allocation2 + $0x388] sm:$0xff]  ;;  %v4474_v53 = vcombine.low %v1192_v38, %v1196_v39 }
 0x381   :  { %2777 = vmatpush1.bf16.msra.mxu1 %v4530_v52  ;;  %v1188_v50 = vld [vmem:[#allocation2 + $0x3a8] sm:$0xff] }
 0x382   :  { %2778 = vmatprep.subr.bf16.mxu1 %v4523_v56  ;;  %v1312_v51 = vld [vmem:[#allocation2 + $0x788] sm:$0xff]  ;;  %v4602_v56 = vcombine.low %v1320_v40, %v1324_v41  ;;  %v4467_v57 = vcombine.high %v1184_v48, %v1188_v50 }
 0x383   :  { %2738 = vmatpush1.bf16.msra.mxu0 %v4394_v0  ;;  %v1316_v52 = vld [vmem:[#allocation2 + $0x7a8] sm:$0xff] }
 0x384   :  { %2739 = vmatprep.subr.bf16.mxu0 %v4387_v3  ;;  %v4595_v58 = vcombine.high %v1312_v51, %v1316_v52  ;;  %v1176_v59 = vld [vmem:[#allocation2 + $0x348] sm:$0xff]  ;;  %v4466_v3 = vcombine.low %v1184_v48, %v1188_v50 }
 0x385   :  { %2779 = vmatpush1.bf16.msra.mxu1 %v4522_v1  ;;  %v1180_v63 = vld [vmem:[#allocation2 + $0x368] sm:$0xff] }
 0x386   :  { %2780 = vmatprep.subr.bf16.mxu1 %v4515_v5  ;;  %v1304_v0 = vld [vmem:[#allocation2 + $0x748] sm:$0xff]  ;;  %v4594_v5 = vcombine.low %v1312_v51, %v1316_v52  ;;  %v4459_v6 = vcombine.high %v1176_v59, %v1180_v63  ;;  %v1129_v51 = vld [vmem:[#allocation2 + $0x1d0] sm:$0xff] }
 0x387   :  { %2740 = vmatpush1.bf16.msra.mxu0 %v4386_v54  ;;  %v1308_v1 = vld [vmem:[#allocation2 + $0x768] sm:$0xff]  ;;  %v1133_v52 = vld [vmem:[#allocation2 + $0x1f0] sm:$0xff] }
 0x388   :  { %2741 = vmatprep.subr.bf16.mxu0 %v4379_v61  ;;  %v4587_v7 = vcombine.high %v1304_v0, %v1308_v1  ;;  %v1168_v8 = vld [vmem:[#allocation2 + $0x308] sm:$0xff]  ;;  %v4458_v61 = vcombine.low %v1176_v59, %v1180_v63  ;;  %v4413_v59 = vcombine.high %v1129_v51, %v1133_v52 }
 0x389   :  { %2781 = vmatpush1.bf16.msra.mxu1 %v4514_v55  ;;  %v1172_v9 = vld [vmem:[#allocation2 + $0x328] sm:$0xff] }
 0x38a   :  { %2782 = vmatprep.subr.bf16.mxu1 %v4507_v62  ;;  %v1296_v54 = vld [vmem:[#allocation2 + $0x708] sm:$0xff]  ;;  %v4586_v62 = vcombine.low %v1304_v0, %v1308_v1  ;;  %v4451_v14 = vcombine.high %v1168_v8, %v1172_v9  ;;  %v1121_v0 = vld [vmem:[#allocation2 + $0x190] sm:$0xff] }
 0x38b   :  { %2742 = vmatpush1.bf16.msra.mxu0 %v4378_v18  ;;  %v1300_v55 = vld [vmem:[#allocation2 + $0x728] sm:$0xff]  ;;  %v1125_v1 = vld [vmem:[#allocation2 + $0x1b0] sm:$0xff] }
 0x38c   :  { %2743 = vmatprep.subr.bf16.mxu0 %v4371_v20  ;;  %v4579_v15 = vcombine.high %v1296_v54, %v1300_v55  ;;  %v1160_v16 = vld [vmem:[#allocation2 + $0x2c8] sm:$0xff]  ;;  %v4450_v20 = vcombine.low %v1168_v8, %v1172_v9  ;;  %v4405_v8 = vcombine.high %v1121_v0, %v1125_v1 }
 0x38d   :  { %2783 = vmatpush1.bf16.msra.mxu1 %v4506_v19  ;;  %v1164_v17 = vld [vmem:[#allocation2 + $0x2e8] sm:$0xff] }
 0x38e   :  { %2784 = vmatprep.subr.bf16.mxu1 %v4499_v21  ;;  %v1288_v18 = vld [vmem:[#allocation2 + $0x6c8] sm:$0xff]  ;;  %v4578_v21 = vcombine.low %v1296_v54, %v1300_v55  ;;  %v4443_v22 = vcombine.high %v1160_v16, %v1164_v17  ;;  %v1113_v54 = vld [vmem:[#allocation2 + $0x150] sm:$0xff] }
 0x38f   :  { %2744 = vmatpush1.bf16.msra.mxu0 %v4370_v26  ;;  %v1292_v19 = vld [vmem:[#allocation2 + $0x6e8] sm:$0xff]  ;;  %v1117_v55 = vld [vmem:[#allocation2 + $0x170] sm:$0xff] }
 0x390   :  { %2745 = vmatprep.subr.bf16.mxu0 %v4363_v28  ;;  %v4571_v23 = vcombine.high %v1288_v18, %v1292_v19  ;;  %v1152_v24 = vld [vmem:[#allocation2 + $0x288] sm:$0xff]  ;;  %v4442_v28 = vcombine.low %v1160_v16, %v1164_v17  ;;  %v4397_v16 = vcombine.high %v1113_v54, %v1117_v55 }
 0x391   :  { %2785 = vmatpush1.bf16.msra.mxu1 %v4498_v27  ;;  %v1156_v25 = vld [vmem:[#allocation2 + $0x2a8] sm:$0xff] }
 0x392   :  { %2786 = vmatprep.subr.bf16.mxu1 %v4491_v29  ;;  %v1280_v26 = vld [vmem:[#allocation2 + $0x688] sm:$0xff]  ;;  %v4570_v29 = vcombine.low %v1288_v18, %v1292_v19  ;;  %v4435_v30 = vcombine.high %v1152_v24, %v1156_v25  ;;  %v1105_v18 = vld [vmem:[#allocation2 + $0x110] sm:$0xff] }
 0x393   :  { %2746 = vmatpush1.bf16.msra.mxu0 %v4362_v34  ;;  %v1284_v27 = vld [vmem:[#allocation2 + $0x6a8] sm:$0xff]  ;;  %v1109_v19 = vld [vmem:[#allocation2 + $0x130] sm:$0xff] }
 0x394   :  { %2747 = vmatprep.subr.bf16.mxu0 %v4355_v36  ;;  %v4563_v31 = vcombine.high %v1280_v26, %v1284_v27  ;;  %v1144_v32 = vld [vmem:[#allocation2 + $0x248] sm:$0xff]  ;;  %v4434_v36 = vcombine.low %v1152_v24, %v1156_v25  ;;  %v4389_v24 = vcombine.high %v1105_v18, %v1109_v19 }
 0x395   :  { %2787 = vmatpush1.bf16.msra.mxu1 %v4490_v35  ;;  %v1148_v33 = vld [vmem:[#allocation2 + $0x268] sm:$0xff] }
 0x396   :  { %2788 = vmatprep.subr.bf16.mxu1 %v4483_v37  ;;  %v1272_v34 = vld [vmem:[#allocation2 + $0x648] sm:$0xff]  ;;  %v4562_v37 = vcombine.low %v1280_v26, %v1284_v27  ;;  %v4427_v38 = vcombine.high %v1144_v32, %v1148_v33  ;;  %v1097_v26 = vld [vmem:[#allocation2 + $0xd0] sm:$0xff] }
 0x397   :  { %2748 = vmatpush1.bf16.msra.mxu0 %v4354_v42  ;;  %v1276_v35 = vld [vmem:[#allocation2 + $0x668] sm:$0xff]  ;;  %v1101_v27 = vld [vmem:[#allocation2 + $0xf0] sm:$0xff] }
 0x398   :  { %2749 = vmatprep.subr.bf16.mxu0 %v4475_v44  ;;  %v4555_v39 = vcombine.high %v1272_v34, %v1276_v35  ;;  %v1136_v40 = vld [vmem:[#allocation2 + $0x208] sm:$0xff]  ;;  %v4426_v44 = vcombine.low %v1144_v32, %v1148_v33  ;;  %v4381_v32 = vcombine.high %v1097_v26, %v1101_v27 }
 0x399   :  { %2789 = vmatpush1.bf16.msra.mxu1 %v4482_v43  ;;  %v1140_v41 = vld [vmem:[#allocation2 + $0x228] sm:$0xff] }
 0x39a   :  { %2790 = vmatprep.subr.bf16.mxu1 %v4603_v46  ;;  %v1264_v42 = vld [vmem:[#allocation2 + $0x608] sm:$0xff]  ;;  %v4554_v46 = vcombine.low %v1272_v34, %v1276_v35  ;;  %v4419_v48 = vcombine.high %v1136_v40, %v1140_v41  ;;  %v1089_v34 = vld [vmem:[#allocation2 + $0x90] sm:$0xff] }
 0x39b   :  { %2750 = vmatpush2.bf16.msra.mxu0 %v4474_v53  ;;  %v1268_v43 = vld [vmem:[#allocation2 + $0x628] sm:$0xff]  ;;  %v1257_v53 = vld [vmem:[#allocation2 + $0x5d0] sm:$0xff] }
 0x39c   :  { %2751 = vmatprep.subr.bf16.mxu0 %v4467_v57  ;;  %v4547_v50 = vcombine.high %v1264_v42, %v1268_v43  ;;  %v4418_v57 = vcombine.low %v1136_v40, %v1140_v41  ;;  %v1093_v35 = vld [vmem:[#allocation2 + $0xb0] sm:$0xff] }
 0x39d   :  { %2791 = vmatpush2.bf16.msra.mxu1 %v4602_v56  ;;  %v1261_v56 = vld [vmem:[#allocation2 + $0x5f0] sm:$0xff]  ;;  %v4373_v40 = vcombine.high %v1089_v34, %v1093_v35 }
 0x39e   :  { %2792 = vmatprep.subr.bf16.mxu1 %v4595_v58  ;;  %v4546_v58 = vcombine.low %v1264_v42, %v1268_v43  ;;  %v4541_v63 = vcombine.high %v1257_v53, %v1261_v56  ;;  %v1081_v42 = vld [vmem:[#allocation2 + $0x50] sm:$0xff] }
 0x39f   :  { %2752 = vmatpush2.bf16.msra.mxu0 %v4466_v3  ;;  %v1249_v3 = vld [vmem:[#allocation2 + $0x590] sm:$0xff] }
 0x3a0   :  { %2753 = vmatprep.subr.bf16.mxu0 %v4459_v6  ;;  %v4412_v6 = vcombine.low %v1129_v51, %v1133_v52  ;;  %v1085_v43 = vld [vmem:[#allocation2 + $0x70] sm:$0xff] }
 0x3a1   :  { %2793 = vmatpush2.bf16.msra.mxu1 %v4594_v5  ;;  %v1253_v5 = vld [vmem:[#allocation2 + $0x5b0] sm:$0xff]  ;;  %v4365_v51 = vcombine.high %v1081_v42, %v1085_v43 }
 0x3a2   :  { %2794 = vmatprep.subr.bf16.mxu1 %v4587_v7  ;;  %v4540_v7 = vcombine.low %v1257_v53, %v1261_v56  ;;  %v4533_v9 = vcombine.high %v1249_v3, %v1253_v5  ;;  %v1073_v53 = vld [vmem:[#allocation2 + $0x10] sm:$0xff] }
 0x3a3   :  { %2754 = vmatpush2.bf16.msra.mxu0 %v4458_v61  ;;  %v1241_v61 = vld [vmem:[#allocation2 + $0x550] sm:$0xff] }
 0x3a4   :  { %2755 = vmatprep.subr.bf16.mxu0 %v4451_v14  ;;  %v4404_v14 = vcombine.low %v1121_v0, %v1125_v1  ;;  %v1077_v56 = vld [vmem:[#allocation2 + $0x30] sm:$0xff] }
 0x3a5   :  { %2795 = vmatpush2.bf16.msra.mxu1 %v4586_v62  ;;  %v1245_v62 = vld [vmem:[#allocation2 + $0x570] sm:$0xff]  ;;  %v4357_v0 = vcombine.high %v1073_v53, %v1077_v56 }
 0x3a6   :  { %2796 = vmatprep.subr.bf16.mxu1 %v4579_v15  ;;  %v4532_v15 = vcombine.low %v1249_v3, %v1253_v5  ;;  %v4525_v17 = vcombine.high %v1241_v61, %v1245_v62  ;;  %v1193_v3 = vld [vmem:[#allocation2 + $0x3d0] sm:$0xff] }
 0x3a7   :  { %2756 = vmatpush2.bf16.msra.mxu0 %v4450_v20  ;;  %v1233_v20 = vld [vmem:[#allocation2 + $0x510] sm:$0xff] }
 0x3a8   :  { %2757 = vmatprep.subr.bf16.mxu0 %v4443_v22  ;;  %v4396_v22 = vcombine.low %v1113_v54, %v1117_v55  ;;  %v1197_v5 = vld [vmem:[#allocation2 + $0x3f0] sm:$0xff] }
 0x3a9   :  { %2797 = vmatpush2.bf16.msra.mxu1 %v4578_v21  ;;  %v1237_v21 = vld [vmem:[#allocation2 + $0x530] sm:$0xff]  ;;  %v4477_v54 = vcombine.high %v1193_v3, %v1197_v5 }
 0x3aa   :  { %2798 = vmatprep.subr.bf16.mxu1 %v4571_v23  ;;  %v4524_v23 = vcombine.low %v1241_v61, %v1245_v62  ;;  %v4517_v25 = vcombine.high %v1233_v20, %v1237_v21  ;;  %v1185_v61 = vld [vmem:[#allocation2 + $0x390] sm:$0xff] }
 0x3ab   :  { %2758 = vmatpush2.bf16.msra.mxu0 %v4442_v28  ;;  %v1225_v28 = vld [vmem:[#allocation2 + $0x4d0] sm:$0xff] }
 0x3ac   :  { %2759 = vmatprep.subr.bf16.mxu0 %v4435_v30  ;;  %v4388_v30 = vcombine.low %v1105_v18, %v1109_v19  ;;  %v1189_v62 = vld [vmem:[#allocation2 + $0x3b0] sm:$0xff] }
 0x3ad   :  { %2799 = vmatpush2.bf16.msra.mxu1 %v4570_v29  ;;  %v1229_v29 = vld [vmem:[#allocation2 + $0x4f0] sm:$0xff]  ;;  %v4469_v18 = vcombine.high %v1185_v61, %v1189_v62 }
 0x3ae   :  { %2800 = vmatprep.subr.bf16.mxu1 %v4563_v31  ;;  %v4516_v31 = vcombine.low %v1233_v20, %v1237_v21  ;;  %v4509_v33 = vcombine.high %v1225_v28, %v1229_v29  ;;  %v1177_v20 = vld [vmem:[#allocation2 + $0x350] sm:$0xff] }
 0x3af   :  { %2760 = vmatpush2.bf16.msra.mxu0 %v4434_v36  ;;  %v1217_v36 = vld [vmem:[#allocation2 + $0x490] sm:$0xff] }
 0x3b0   :  { %2761 = vmatprep.subr.bf16.mxu0 %v4427_v38  ;;  %v4380_v38 = vcombine.low %v1097_v26, %v1101_v27  ;;  %v1181_v21 = vld [vmem:[#allocation2 + $0x370] sm:$0xff] }
 0x3b1   :  { %2801 = vmatpush2.bf16.msra.mxu1 %v4562_v37  ;;  %v1221_v37 = vld [vmem:[#allocation2 + $0x4b0] sm:$0xff]  ;;  %v4461_v26 = vcombine.high %v1177_v20, %v1181_v21 }
 0x3b2   :  { %2802 = vmatprep.subr.bf16.mxu1 %v4555_v39  ;;  %v4508_v39 = vcombine.low %v1225_v28, %v1229_v29  ;;  %v4501_v41 = vcombine.high %v1217_v36, %v1221_v37  ;;  %v1169_v28 = vld [vmem:[#allocation2 + $0x310] sm:$0xff] }
 0x3b3   :  { %2762 = vmatpush2.bf16.msra.mxu0 %v4426_v44  ;;  %v1209_v44 = vld [vmem:[#allocation2 + $0x450] sm:$0xff] }
 0x3b4   :  { %2763 = vmatprep.subr.bf16.mxu0 %v4419_v48  ;;  %v4372_v48 = vcombine.low %v1089_v34, %v1093_v35  ;;  %v1173_v29 = vld [vmem:[#allocation2 + $0x330] sm:$0xff] }
 0x3b5   :  { %2803 = vmatpush2.bf16.msra.mxu1 %v4554_v46  ;;  %v1213_v46 = vld [vmem:[#allocation2 + $0x470] sm:$0xff]  ;;  %v4453_v34 = vcombine.high %v1169_v28, %v1173_v29 }
 0x3b6   :  { %2804 = vmatprep.subr.bf16.mxu1 %v4547_v50  ;;  %v4500_v50 = vcombine.low %v1217_v36, %v1221_v37  ;;  %v4493_v52 = vcombine.high %v1209_v44, %v1213_v46  ;;  %v1161_v36 = vld [vmem:[#allocation2 + $0x2d0] sm:$0xff] }
 0x3b7   :  { %2764 = vmatpush2.bf16.msra.mxu0 %v4418_v57  ;;  %v1201_v57 = vld [vmem:[#allocation2 + $0x410] sm:$0xff] }
 0x3b8   :  { %2815 = vmatprep.subr.bf16.mxu0 %v4413_v59  ;;  %v4364_v59 = vcombine.low %v1081_v42, %v1085_v43  ;;  %v1165_v37 = vld [vmem:[#allocation2 + $0x2f0] sm:$0xff] }
 0x3b9   :  { %2805 = vmatpush2.bf16.msra.mxu1 %v4546_v58  ;;  %v1205_v58 = vld [vmem:[#allocation2 + $0x430] sm:$0xff]  ;;  %v4445_v42 = vcombine.high %v1161_v36, %v1165_v37 }
 0x3ba   :  { %2856 = vmatprep.subr.bf16.mxu1 %v4541_v63  ;;  %2766 = vmatmul.mubr.bf16.vlgmr.msra.gmra.mxu0 %v5353_v10  ;;  %v4492_v63 = vcombine.low %v1209_v44, %v1213_v46  ;;  %v4485_v1 = vcombine.high %v1201_v57, %v1205_v58  ;;  %v1153_v44 = vld [vmem:[#allocation2 + $0x290] sm:$0xff] }
 0x3bb   :  { %2816 = vmatpush1.bf16.msra.mxu0 %v4412_v6  ;;  %2847 = vmatprep.mubr.bf16.mxu0 %v5355_v11  ;;  %v1321_v6 = vld [vmem:[#allocation2 + $0x7d0] sm:$0xff] }
 0x3bc   :  { %2807 = vmatmul.mubr.bf16.vlgmr.msra.gmra.mxu1 %v5357_v12  ;;  %2817 = vmatprep.subr.bf16.mxu0 %v4405_v8  ;;  %v4356_v8 = vcombine.low %v1073_v53, %v1077_v56  ;;  %v1157_v46 = vld [vmem:[#allocation2 + $0x2b0] sm:$0xff] }
 0x3bd   :  { %2857 = vmatpush1.bf16.msra.mxu1 %v4540_v7  ;;  %2888 = vmatprep.mubr.bf16.mxu1 %v5359_v13  ;;  %v1325_v7 = vld [vmem:[#allocation2 + $0x7f0] sm:$0xff]  ;;  %v4437_v53 = vcombine.high %v1153_v44, %v1157_v46 }
 0x3be   :  { %2858 = vmatprep.subr.bf16.mxu1 %v4533_v9  ;;  %v4484_v9 = vcombine.low %v1201_v57, %v1205_v58  ;;  %v4605_v55 = vcombine.high %v1321_v6, %v1325_v7  ;;  %v1145_v57 = vld [vmem:[#allocation2 + $0x250] sm:$0xff] }
 0x3bf   :  { %2818 = vmatpush1.bf16.msra.mxu0 %v4404_v14  ;;  %v1313_v14 = vld [vmem:[#allocation2 + $0x790] sm:$0xff] }
 0x3c0   :  { %2819 = vmatprep.subr.bf16.mxu0 %v4397_v16  ;;  %v4476_v16 = vcombine.low %v1193_v3, %v1197_v5  ;;  %v1149_v58 = vld [vmem:[#allocation2 + $0x270] sm:$0xff] }
 0x3c1   :  { %2859 = vmatpush1.bf16.msra.mxu1 %v4532_v15  ;;  %v1317_v15 = vld [vmem:[#allocation2 + $0x7b0] sm:$0xff]  ;;  %v4429_v3 = vcombine.high %v1145_v57, %v1149_v58 }
 0x3c2   :  { %2860 = vmatprep.subr.bf16.mxu1 %v4525_v17  ;;  %v4604_v17 = vcombine.low %v1321_v6, %v1325_v7  ;;  %v4597_v19 = vcombine.high %v1313_v14, %v1317_v15  ;;  %v1137_v6 = vld [vmem:[#allocation2 + $0x210] sm:$0xff] }
 0x3c3   :  { %2820 = vmatpush1.bf16.msra.mxu0 %v4396_v22  ;;  %v1305_v22 = vld [vmem:[#allocation2 + $0x750] sm:$0xff] }
 0x3c4   :  { %2821 = vmatprep.subr.bf16.mxu0 %v4389_v24  ;;  %v4468_v24 = vcombine.low %v1185_v61, %v1189_v62  ;;  %v1141_v7 = vld [vmem:[#allocation2 + $0x230] sm:$0xff] }
 0x3c5   :  { %2861 = vmatpush1.bf16.msra.mxu1 %v4524_v23  ;;  %v1309_v23 = vld [vmem:[#allocation2 + $0x770] sm:$0xff]  ;;  %v4421_v61 = vcombine.high %v1137_v6, %v1141_v7 }
 0x3c6   :  { %2862 = vmatprep.subr.bf16.mxu1 %v4517_v25  ;;  %v4596_v25 = vcombine.low %v1313_v14, %v1317_v15  ;;  %v4589_v27 = vcombine.high %v1305_v22, %v1309_v23  ;;  %v1130_v14 = vld [vmem:[#allocation2 + $0x1d8] sm:$0xff] }
 0x3c7   :  { %2822 = vmatpush1.bf16.msra.mxu0 %v4388_v30  ;;  %v1297_v30 = vld [vmem:[#allocation2 + $0x710] sm:$0xff]  ;;  %v1134_v15 = vld [vmem:[#allocation2 + $0x1f8] sm:$0xff] }
 0x3c8   :  { %2823 = vmatprep.subr.bf16.mxu0 %v4381_v32  ;;  %v4460_v32 = vcombine.low %v1177_v20, %v1181_v21  ;;  %v4415_v20 = vcombine.high %v1130_v14, %v1134_v15 }
 0x3c9   :  { %2863 = vmatpush1.bf16.msra.mxu1 %v4516_v31  ;;  %v1301_v31 = vld [vmem:[#allocation2 + $0x730] sm:$0xff] }
 0x3ca   :  { %2864 = vmatprep.subr.bf16.mxu1 %v4509_v33  ;;  %v4588_v33 = vcombine.low %v1305_v22, %v1309_v23  ;;  %v4581_v35 = vcombine.high %v1297_v30, %v1301_v31  ;;  %v1122_v22 = vld [vmem:[#allocation2 + $0x198] sm:$0xff] }
 0x3cb   :  { %2824 = vmatpush1.bf16.msra.mxu0 %v4380_v38  ;;  %v1289_v38 = vld [vmem:[#allocation2 + $0x6d0] sm:$0xff]  ;;  %v1126_v23 = vld [vmem:[#allocation2 + $0x1b8] sm:$0xff] }
 0x3cc   :  { %2825 = vmatprep.subr.bf16.mxu0 %v4373_v40  ;;  %v4452_v40 = vcombine.low %v1169_v28, %v1173_v29  ;;  %v4407_v28 = vcombine.high %v1122_v22, %v1126_v23 }
 0x3cd   :  { %2865 = vmatpush1.bf16.msra.mxu1 %v4508_v39  ;;  %v1293_v39 = vld [vmem:[#allocation2 + $0x6f0] sm:$0xff] }
 0x3ce   :  { %2866 = vmatprep.subr.bf16.mxu1 %v4501_v41  ;;  %v4580_v41 = vcombine.low %v1297_v30, %v1301_v31  ;;  %v4573_v43 = vcombine.high %v1289_v38, %v1293_v39  ;;  %v1114_v30 = vld [vmem:[#allocation2 + $0x158] sm:$0xff] }
 0x3cf   :  { %2826 = vmatpush1.bf16.msra.mxu0 %v4372_v48  ;;  %v1281_v48 = vld [vmem:[#allocation2 + $0x690] sm:$0xff]  ;;  %v1118_v31 = vld [vmem:[#allocation2 + $0x178] sm:$0xff] }
 0x3d0   :  { %2827 = vmatprep.subr.bf16.mxu0 %v4365_v51  ;;  %v4444_v51 = vcombine.low %v1161_v36, %v1165_v37  ;;  %v4399_v36 = vcombine.high %v1114_v30, %v1118_v31 }
 0x3d1   :  { %2867 = vmatpush1.bf16.msra.mxu1 %v4500_v50  ;;  %v1285_v50 = vld [vmem:[#allocation2 + $0x6b0] sm:$0xff] }
 0x3d2   :  { %2868 = vmatprep.subr.bf16.mxu1 %v4493_v52  ;;  %v4572_v52 = vcombine.low %v1289_v38, %v1293_v39  ;;  %v4565_v56 = vcombine.high %v1281_v48, %v1285_v50  ;;  %v1106_v38 = vld [vmem:[#allocation2 + $0x118] sm:$0xff] }
 0x3d3   :  { %2828 = vmatpush1.bf16.msra.mxu0 %v4364_v59  ;;  %v1273_v59 = vld [vmem:[#allocation2 + $0x650] sm:$0xff]  ;;  %v1110_v39 = vld [vmem:[#allocation2 + $0x138] sm:$0xff] }
 0x3d4   :  { %2829 = vmatprep.subr.bf16.mxu0 %v4357_v0  ;;  %v4436_v0 = vcombine.low %v1153_v44, %v1157_v46  ;;  %v4391_v44 = vcombine.high %v1106_v38, %v1110_v39 }
 0x3d5   :  { %2869 = vmatpush1.bf16.msra.mxu1 %v4492_v63  ;;  %v1277_v63 = vld [vmem:[#allocation2 + $0x670] sm:$0xff] }
 0x3d6   :  { %2870 = vmatprep.subr.bf16.mxu1 %v4485_v1  ;;  %v4564_v1 = vcombine.low %v1281_v48, %v1285_v50  ;;  %v4557_v5 = vcombine.high %v1273_v59, %v1277_v63  ;;  %v1098_v48 = vld [vmem:[#allocation2 + $0xd8] sm:$0xff] }
 0x3d7   :  { %2830 = vmatpush1.bf16.msra.mxu0 %v4356_v8  ;;  %v1265_v8 = vld [vmem:[#allocation2 + $0x610] sm:$0xff]  ;;  %v1102_v50 = vld [vmem:[#allocation2 + $0xf8] sm:$0xff] }
 0x3d8   :  { %2831 = vmatprep.subr.bf16.mxu0 %v4477_v54  ;;  %v4428_v54 = vcombine.low %v1145_v57, %v1149_v58  ;;  %v1090_v57 = vld [vmem:[#allocation2 + $0x98] sm:$0xff] }
 0x3d9   :  { %2871 = vmatpush1.bf16.msra.mxu1 %v4484_v9  ;;  %v1269_v9 = vld [vmem:[#allocation2 + $0x630] sm:$0xff]  ;;  %v1094_v58 = vld [vmem:[#allocation2 + $0xb8] sm:$0xff] }
 0x3da   :  { %2872 = vmatprep.subr.bf16.mxu1 %v4605_v55  ;;  %v4556_v55 = vcombine.low %v1273_v59, %v1277_v63  ;;  %v4549_v62 = vcombine.high %v1265_v8, %v1269_v9  ;;  %v1218_v59 = vld [vmem:[#allocation2 + $0x498] sm:$0xff] }
 0x3db   :  { %2832 = vmatpush2.bf16.msra.mxu0 %v4476_v16  ;;  %v1258_v16 = vld [vmem:[#allocation2 + $0x5d8] sm:$0xff] }
 0x3dc   :  { %2833 = vmatprep.subr.bf16.mxu0 %v4469_v18  ;;  %v4420_v18 = vcombine.low %v1137_v6, %v1141_v7  ;;  %v1222_v63 = vld [vmem:[#allocation2 + $0x4b8] sm:$0xff] }
 0x3dd   :  { %2873 = vmatpush2.bf16.msra.mxu1 %v4604_v17  ;;  %v1262_v17 = vld [vmem:[#allocation2 + $0x5f8] sm:$0xff] }
 0x3de   :  { %2874 = vmatprep.subr.bf16.mxu1 %v4597_v19  ;;  %v4548_v19 = vcombine.low %v1265_v8, %v1269_v9  ;;  %v4543_v21 = vcombine.high %v1258_v16, %v1262_v17  ;;  %v1082_v6 = vld [vmem:[#allocation2 + $0x58] sm:$0xff] }
 0x3df   :  { %2834 = vmatpush2.bf16.msra.mxu0 %v4468_v24  ;;  %v1250_v24 = vld [vmem:[#allocation2 + $0x598] sm:$0xff] }
 0x3e0   :  { %2835 = vmatprep.subr.bf16.mxu0 %v4461_v26  ;;  %v4414_v26 = vcombine.low %v1130_v14, %v1134_v15  ;;  %v1086_v7 = vld [vmem:[#allocation2 + $0x78] sm:$0xff] }
 0x3e1   :  { %2875 = vmatpush2.bf16.msra.mxu1 %v4596_v25  ;;  %v1254_v25 = vld [vmem:[#allocation2 + $0x5b8] sm:$0xff] }
 0x3e2   :  { %2876 = vmatprep.subr.bf16.mxu1 %v4589_v27  ;;  %v4542_v27 = vcombine.low %v1258_v16, %v1262_v17  ;;  %v4535_v29 = vcombine.high %v1250_v24, %v1254_v25  ;;  %v1210_v8 = vld [vmem:[#allocation2 + $0x458] sm:$0xff] }
 0x3e3   :  { %2836 = vmatpush2.bf16.msra.mxu0 %v4460_v32  ;;  %v1242_v32 = vld [vmem:[#allocation2 + $0x558] sm:$0xff] }
 0x3e4   :  { %2837 = vmatprep.subr.bf16.mxu0 %v4453_v34  ;;  %v4406_v34 = vcombine.low %v1122_v22, %v1126_v23  ;;  %v1214_v9 = vld [vmem:[#allocation2 + $0x478] sm:$0xff] }
 0x3e5   :  { %2877 = vmatpush2.bf16.msra.mxu1 %v4588_v33  ;;  %v1246_v33 = vld [vmem:[#allocation2 + $0x578] sm:$0xff] }
 0x3e6   :  { %2878 = vmatprep.subr.bf16.mxu1 %v4581_v35  ;;  %v4534_v35 = vcombine.low %v1250_v24, %v1254_v25  ;;  %v4527_v37 = vcombine.high %v1242_v32, %v1246_v33  ;;  %v1074_v14 = vld [vmem:[#allocation2 + $0x18] sm:$0xff] }
 0x3e7   :  { %2838 = vmatpush2.bf16.msra.mxu0 %v4452_v40  ;;  %v1234_v40 = vld [vmem:[#allocation2 + $0x518] sm:$0xff] }
 0x3e8   :  { %2839 = vmatprep.subr.bf16.mxu0 %v4445_v42  ;;  %v4398_v42 = vcombine.low %v1114_v30, %v1118_v31  ;;  %v1078_v15 = vld [vmem:[#allocation2 + $0x38] sm:$0xff] }
 0x3e9   :  { %2879 = vmatpush2.bf16.msra.mxu1 %v4580_v41  ;;  %v1238_v41 = vld [vmem:[#allocation2 + $0x538] sm:$0xff] }
 0x3ea   :  { %2880 = vmatprep.subr.bf16.mxu1 %v4573_v43  ;;  %v4526_v43 = vcombine.low %v1242_v32, %v1246_v33  ;;  %v4519_v46 = vcombine.high %v1234_v40, %v1238_v41  ;;  %v1202_v16 = vld [vmem:[#allocation2 + $0x418] sm:$0xff] }
 0x3eb   :  { %2840 = vmatpush2.bf16.msra.mxu0 %v4444_v51  ;;  %v1226_v51 = vld [vmem:[#allocation2 + $0x4d8] sm:$0xff] }
 0x3ec   :  { %2841 = vmatprep.subr.bf16.mxu0 %v4437_v53  ;;  %v4390_v53 = vcombine.low %v1106_v38, %v1110_v39  ;;  %v1206_v17 = vld [vmem:[#allocation2 + $0x438] sm:$0xff] }
 0x3ed   :  { %2881 = vmatpush2.bf16.msra.mxu1 %v4572_v52  ;;  %v1230_v52 = vld [vmem:[#allocation2 + $0x4f8] sm:$0xff] }
 0x3ee   :  { %2882 = vmatprep.subr.bf16.mxu1 %v4565_v56  ;;  %v4383_v56 = vcombine.high %v1098_v48, %v1102_v50  ;;  %v1194_v22 = vld [vmem:[#allocation2 + $0x3d8] sm:$0xff] }
 0x3ef   :  { %2842 = vmatpush2.bf16.msra.mxu0 %v4436_v0  ;;  %v4382_v0 = vcombine.low %v1098_v48, %v1102_v50  ;;  %v1198_v23 = vld [vmem:[#allocation2 + $0x3f8] sm:$0xff] }
 0x3f0   :  { %2843 = vmatprep.subr.bf16.mxu0 %v4429_v3  ;;  %v4375_v3 = vcombine.high %v1090_v57, %v1094_v58  ;;  %v1322_v24 = vld [vmem:[#allocation2 + $0x7d8] sm:$0xff] }
 0x3f1   :  { %2883 = vmatpush2.bf16.msra.mxu1 %v4564_v1  ;;  %v4510_v1 = vcombine.low %v1226_v51, %v1230_v52  ;;  %v1326_v25 = vld [vmem:[#allocation2 + $0x7f8] sm:$0xff] }
 0x3f2   :  { %2884 = vmatprep.subr.bf16.mxu1 %v4557_v5  ;;  %v4503_v5 = vcombine.high %v1218_v59, %v1222_v63  ;;  %v1186_v30 = vld [vmem:[#allocation2 + $0x398] sm:$0xff] }
 0x3f3   :  { %2844 = vmatpush2.bf16.msra.mxu0 %v4428_v54  ;;  %v4374_v54 = vcombine.low %v1090_v57, %v1094_v58  ;;  %v1190_v31 = vld [vmem:[#allocation2 + $0x3b8] sm:$0xff] }
 0x3f4   :  { %2845 = vmatprep.subr.bf16.mxu0 %v4421_v61  ;;  %v4367_v61 = vcombine.high %v1082_v6, %v1086_v7  ;;  %v1314_v32 = vld [vmem:[#allocation2 + $0x798] sm:$0xff] }
 0x3f5   :  { %2885 = vmatpush2.bf16.msra.mxu1 %v4556_v55  ;;  %v4502_v55 = vcombine.low %v1218_v59, %v1222_v63  ;;  %v1318_v33 = vld [vmem:[#allocation2 + $0x7b8] sm:$0xff] }
 0x3f6   :  { %2886 = vmatprep.subr.bf16.mxu1 %v4549_v62  ;;  %v4495_v62 = vcombine.high %v1210_v8, %v1214_v9  ;;  %v1178_v38 = vld [vmem:[#allocation2 + $0x358] sm:$0xff] }
 0x3f7   :  { %2846 = vmatpush2.bf16.msra.mxu0 %v4420_v18  ;;  %v4366_v18 = vcombine.low %v1082_v6, %v1086_v7  ;;  %v1182_v39 = vld [vmem:[#allocation2 + $0x378] sm:$0xff] }
 0x3f8   :  { %2897 = vmatprep.subr.bf16.mxu0 %v4415_v20  ;;  %v4359_v20 = vcombine.high %v1074_v14, %v1078_v15  ;;  %v1170_v48 = vld [vmem:[#allocation2 + $0x318] sm:$0xff] }
 0x3f9   :  { %2887 = vmatpush2.bf16.msra.mxu1 %v4548_v19  ;;  %v4494_v19 = vcombine.low %v1210_v8, %v1214_v9  ;;  %v1174_v50 = vld [vmem:[#allocation2 + $0x338] sm:$0xff] }
 0x3fa   :  { %2938 = vmatprep.subr.bf16.mxu1 %v4543_v21  ;;  %2848 = vmatmul.mubr.bf16.vlgmr.msra.gmra.mxu0 %v5353_v10  ;;  %v4487_v21 = vcombine.high %v1202_v16, %v1206_v17  ;;  %v1162_v57 = vld [vmem:[#allocation2 + $0x2d8] sm:$0xff] }
 0x3fb   :  { %2898 = vmatpush1.bf16.msra.mxu0 %v4414_v26  ;;  %2929 = vmatprep.mubr.bf16.mxu0 %v5355_v11  ;;  %v4518_v11 = vcombine.low %v1234_v40, %v1238_v41  ;;  %v4358_v26 = vcombine.low %v1074_v14, %v1078_v15  ;;  %v1306_v40 = vld [vmem:[#allocation2 + $0x758] sm:$0xff] }
 0x3fc   :  { %2889 = vmatmul.mubr.bf16.vlgmr.msra.gmra.mxu1 %v5357_v12  ;;  %2899 = vmatprep.subr.bf16.mxu0 %v4407_v28  ;;  %v4479_v28 = vcombine.high %v1194_v22, %v1198_v23  ;;  %v1310_v41 = vld [vmem:[#allocation2 + $0x778] sm:$0xff] }
 0x3fd   :  { %2939 = vmatpush1.bf16.msra.mxu1 %v4542_v27  ;;  %2970 = vmatprep.mubr.bf16.mxu1 %v5359_v13  ;;  %v4511_v13 = vcombine.high %v1226_v51, %v1230_v52  ;;  %v4486_v27 = vcombine.low %v1202_v16, %v1206_v17  ;;  %v1298_v51 = vld [vmem:[#allocation2 + $0x718] sm:$0xff] }
 0x3fe   :  { %2940 = vmatprep.subr.bf16.mxu1 %v4535_v29  ;;  %v4607_v29 = vcombine.high %v1322_v24, %v1326_v25  ;;  %v1302_v52 = vld [vmem:[#allocation2 + $0x738] sm:$0xff] }
 0x3ff   :  { %2900 = vmatpush1.bf16.msra.mxu0 %v4406_v34  ;;  %v4478_v34 = vcombine.low %v1194_v22, %v1198_v23  ;;  %v1166_v58 = vld [vmem:[#allocation2 + $0x2f8] sm:$0xff] }
 0x400   :  { %2901 = vmatprep.subr.bf16.mxu0 %v4399_v36  ;;  %v4471_v36 = vcombine.high %v1186_v30, %v1190_v31  ;;  %v1290_v59 = vld [vmem:[#allocation2 + $0x6d8] sm:$0xff] }
 0x401   :  { %2941 = vmatpush1.bf16.msra.mxu1 %v4534_v35  ;;  %v4606_v35 = vcombine.low %v1322_v24, %v1326_v25  ;;  %v1294_v63 = vld [vmem:[#allocation2 + $0x6f8] sm:$0xff] }
 0x402   :  { %2942 = vmatprep.subr.bf16.mxu1 %v4527_v37  ;;  %v4599_v37 = vcombine.high %v1314_v32, %v1318_v33  ;;  %v1154_v6 = vld [vmem:[#allocation2 + $0x298] sm:$0xff] }
 0x403   :  { %2902 = vmatpush1.bf16.msra.mxu0 %v4398_v42  ;;  %v4470_v42 = vcombine.low %v1186_v30, %v1190_v31  ;;  %v1158_v7 = vld [vmem:[#allocation2 + $0x2b8] sm:$0xff] }
 0x404   :  { %2903 = vmatprep.subr.bf16.mxu0 %v4391_v44  ;;  %v4463_v44 = vcombine.high %v1178_v38, %v1182_v39  ;;  %v1282_v8 = vld [vmem:[#allocation2 + $0x698] sm:$0xff] }
 0x405   :  { %2943 = vmatpush1.bf16.msra.mxu1 %v4526_v43  ;;  %v4598_v43 = vcombine.low %v1314_v32, %v1318_v33  ;;  %v1286_v9 = vld [vmem:[#allocation2 + $0x6b8] sm:$0xff] }
 0x406   :  { %2944 = vmatprep.subr.bf16.mxu1 %v4519_v46  ;;  %v4591_v46 = vcombine.high %v1306_v40, %v1310_v41  ;;  %v1146_v14 = vld [vmem:[#allocation2 + $0x258] sm:$0xff] }
 0x407   :  { %2904 = vmatpush1.bf16.msra.mxu0 %v4390_v53  ;;  %v4462_v53 = vcombine.low %v1178_v38, %v1182_v39  ;;  %v1150_v15 = vld [vmem:[#allocation2 + $0x278] sm:$0xff] }
 0x408   :  { %2905 = vmatprep.subr.bf16.mxu0 %v4383_v56  ;;  %v4455_v56 = vcombine.high %v1170_v48, %v1174_v50  ;;  %v1274_v16 = vld [vmem:[#allocation2 + $0x658] sm:$0xff] }
 0x409   :  { %2945 = vmatpush1.bf16.msra.mxu1 %v4518_v11  ;;  %v4590_v11 = vcombine.low %v1306_v40, %v1310_v41  ;;  %v1278_v17 = vld [vmem:[#allocation2 + $0x678] sm:$0xff] }
 0x40a   :  { %2946 = vmatprep.subr.bf16.mxu1 %v4511_v13  ;;  %v4583_v13 = vcombine.high %v1298_v51, %v1302_v52  ;;  %v1138_v22 = vld [vmem:[#allocation2 + $0x218] sm:$0xff] }
 0x40b   :  { %2906 = vmatpush1.bf16.msra.mxu0 %v4382_v0  ;;  %v4454_v0 = vcombine.low %v1170_v48, %v1174_v50  ;;  %v1142_v23 = vld [vmem:[#allocation2 + $0x238] sm:$0xff] }
 0x40c   :  { %2907 = vmatprep.subr.bf16.mxu0 %v4375_v3  ;;  %v4447_v3 = vcombine.high %v1162_v57, %v1166_v58  ;;  %v1266_v24 = vld [vmem:[#allocation2 + $0x618] sm:$0xff]  ;;  %v4422_v30 = vcombine.low %v1138_v22, %v1142_v23 }
 0x40d   :  { %2947 = vmatpush1.bf16.msra.mxu1 %v4510_v1  ;;  %v4582_v1 = vcombine.low %v1298_v51, %v1302_v52  ;;  %v1270_v25 = vld [vmem:[#allocation2 + $0x638] sm:$0xff] }
 0x40e   :  { %2948 = vmatprep.subr.bf16.mxu1 %v4503_v5  ;;  %v4575_v5 = vcombine.high %v1290_v59, %v1294_v63  ;;  %v4550_v31 = vcombine.low %v1266_v24, %v1270_v25  ;;  %v5378_v32 = vld [vmem:[%s5536_s6 + $0x15] sm:$0xff] }
 0x40f   :  { %2908 = vmatpush1.bf16.msra.mxu0 %v4374_v54  ;;  %v4446_v54 = vcombine.low %v1162_v57, %v1166_v58  ;;  %v1334_v33 = vrot.slane %v5378_v32, %v5273_v49 }
 0x410   :  { %2909 = vmatprep.subr.bf16.mxu0 %v4367_v61  ;;  %v4439_v61 = vcombine.high %v1154_v6, %v1158_v7 }
 0x411   :  { %2949 = vmatpush1.bf16.msra.mxu1 %v4502_v55  ;;  %v4574_v55 = vcombine.low %v1290_v59, %v1294_v63 }
 0x412   :  { %2950 = vmatprep.subr.bf16.mxu1 %v4495_v62  ;;  %v4567_v62 = vcombine.high %v1282_v8, %v1286_v9 }
 0x413   :  { %2910 = vmatpush1.bf16.msra.mxu0 %v4366_v18  ;;  %v4438_v18 = vcombine.low %v1154_v6, %v1158_v7 }
 0x414   :  { %2911 = vmatprep.subr.bf16.mxu0 %v4359_v20  ;;  %v4431_v20 = vcombine.high %v1146_v14, %v1150_v15 }
 0x415   :  { %2951 = vmatpush1.bf16.msra.mxu1 %v4494_v19  ;;  %v4566_v19 = vcombine.low %v1282_v8, %v1286_v9 }
 0x416   :  { %2952 = vmatprep.subr.bf16.mxu1 %v4487_v21  ;;  %v4559_v21 = vcombine.high %v1274_v16, %v1278_v17 }
 0x417   :  { %2912 = vmatpush1.bf16.msra.mxu0 %v4358_v26  ;;  %v4430_v26 = vcombine.low %v1146_v14, %v1150_v15 }
 0x418   :  { %2913 = vmatprep.subr.bf16.mxu0 %v4479_v28  ;;  %v4423_v28 = vcombine.high %v1138_v22, %v1142_v23 }
 0x419   :  { %2953 = vmatpush1.bf16.msra.mxu1 %v4486_v27  ;;  %v4558_v27 = vcombine.low %v1274_v16, %v1278_v17 }
 0x41a   :  { %2954 = vmatprep.subr.bf16.mxu1 %v4607_v29  ;;  %v4551_v29 = vcombine.high %v1266_v24, %v1270_v25 }
 0x41b   :  { %2914 = vmatpush2.bf16.msra.mxu0 %v4478_v34  ;;  %v1338_v34 = vrot.slane %v5378_v32, %v5283_v60 }
 0x41c   :  { %2915 = vmatprep.subr.bf16.mxu0 %v4471_v36 }
 0x41d   :  { %2955 = vmatpush2.bf16.msra.mxu1 %v4606_v35 }
 0x41e   :  { %2956 = vmatprep.subr.bf16.mxu1 %v4599_v37 }
 0x41f   :  { %2916 = vmatpush2.bf16.msra.mxu0 %v4470_v42 }
 0x420   :  { %2917 = vmatprep.subr.bf16.mxu0 %v4463_v44 }
 0x421   :  { %2957 = vmatpush2.bf16.msra.mxu1 %v4598_v43 }
 0x422   :  { %2958 = vmatprep.subr.bf16.mxu1 %v4591_v46 }
 0x423   :  { %2918 = vmatpush2.bf16.msra.mxu0 %v4462_v53 }
 0x424   :  { %2919 = vmatprep.subr.bf16.mxu0 %v4455_v56 }
 0x425   :  { %2959 = vmatpush2.bf16.msra.mxu1 %v4590_v11 }
 0x426   :  { %2960 = vmatprep.subr.bf16.mxu1 %v4583_v13 }
 0x427   :  { %2920 = vmatpush2.bf16.msra.mxu0 %v4454_v0 }
 0x428   :  { %2921 = vmatprep.subr.bf16.mxu0 %v4447_v3 }
 0x429   :  { %2961 = vmatpush2.bf16.msra.mxu1 %v4582_v1 }
 0x42a   :  { %2962 = vmatprep.subr.bf16.mxu1 %v4575_v5 }
 0x42b   :  { %2922 = vmatpush2.bf16.msra.mxu0 %v4446_v54 }
 0x42c   :  { %2923 = vmatprep.subr.bf16.mxu0 %v4439_v61 }
 0x42d   :  { %2963 = vmatpush2.bf16.msra.mxu1 %v4574_v55 }
 0x42e   :  { %2964 = vmatprep.subr.bf16.mxu1 %v4567_v62 }
 0x42f   :  { %2924 = vmatpush2.bf16.msra.mxu0 %v4438_v18 }
 0x430   :  { %2925 = vmatprep.subr.bf16.mxu0 %v4431_v20 }
 0x431   :  { %2965 = vmatpush2.bf16.msra.mxu1 %v4566_v19 }
 0x432   :  { %2966 = vmatprep.subr.bf16.mxu1 %v4559_v21 }
 0x433   :  { %2926 = vmatpush2.bf16.msra.mxu0 %v4430_v26 }
 0x434   :  { %2927 = vmatprep.subr.bf16.mxu0 %v4423_v28  ;;  %v1342_v28 = vrot.slane %v5378_v32, %v5309_v2 }
 0x435   :  { %2967 = vmatpush2.bf16.msra.mxu1 %v4558_v27 }
 0x436   :  { %2968 = vmatprep.subr.bf16.mxu1 %v4551_v29  ;;  %v1346_v29 = vrot.slane %v5378_v32, %v5315_v4 }
 0x437   :  { %2928 = vmatpush2.bf16.msra.mxu0 %v4422_v30 }
 0x439   :  { %2969 = vmatpush2.bf16.msra.mxu1 %v4550_v31 }
 0x43a   :  { %v2685_v35 = vpop.f32.mrf.mxu0  ;;  %2930 = vmatmul.mubr.bf16.vlgmr.msra.gmra.mxu0 %v5353_v10 }
 0x43b   :  { %v2686_v36 = vadd.f32 %v2685_v35, %v1334_v33 }
 0x43c   :  { %v2726_v37 = vpop.f32.mrf.mxu1  ;;  %2971 = vmatmul.mubr.bf16.vlgmr.msra.gmra.mxu1 %v5357_v12  ;;  %v2687_v38 = vpop.f32.mrf.mxu0 }
 0x43d   :  { %v2727_v39 = vadd.f32 %v2726_v37, %v2686_v36  ;;  %v2688_v40 = vadd.f32 %v2687_v38, %v1338_v34 }
 0x43e   :  { %v2728_v41 = vpop.f32.mrf.mxu1  ;;  %v2689_v42 = vpop.f32.mrf.mxu0 }
 0x43f   :  { %v2979_v43 = vmax.f32 %v2727_v39, 0.0  ;;  %v2729_v44 = vadd.f32 %v2728_v41, %v2688_v40 }
 0x440   :  { %v2730_v46 = vpop.f32.mrf.mxu1  ;;  %v2690_v48 = vpop.f32.mrf.mxu0 }
 0x441   :  { %v2987_v50 = vrot.slane %v2979_v43, 4  ;;  %v2980_v51 = vmax.f32 %v2729_v44, 0.0 }
 0x442   :  { %v2731_v52 = vpop.f32.mrf.mxu1 }
 0x443   :  { %v2988_v53 = vadd.f32 %v2987_v50, %v2979_v43  ;;  %v2993_v11 = vrot.slane %v2980_v51, 4 }
 0x445   :  { %v2989_v56 = vrot.slane %v2988_v53, 2  ;;  %v2994_v10 = vadd.f32 %v2993_v11, %v2980_v51 }
 0x447   :  { %v2990_v13 = vadd.f32 %v2989_v56, %v2988_v53  ;;  %v2995_v57 = vrot.slane %v2994_v10, 2 }
 0x449   :  { %v2991_v58 = vrot.slane %v2990_v13, 1  ;;  %v2996_v12 = vadd.f32 %v2995_v57, %v2994_v10 }
 0x44b   :  { %v2992_v59 = vadd.f32 %v2991_v58, %v2990_v13  ;;  %v2997_v63 = vrot.slane %v2996_v12, 1 }
 0x44d   :  { %v3035_v0 = vmul.f32 0.125, %v2992_v59  ;;  %v2998_v1 = vadd.f32 %v2997_v63, %v2996_v12 }
 0x44f   :  { %v5386_v3 = vsub.f32 %v2979_v43, %v3035_v0  ;;  %v3036_v5 = vmul.f32 0.125, %v2998_v1 }
 0x451   :  { %v3051_v6 = vmul.f32 %v5386_v3, %v5386_v3  ;;  %v5390_v7 = vsub.f32 %v2980_v51, %v3036_v5 }
 0x453   :  { %v3059_v8 = vrot.slane %v3051_v6, 4  ;;  %v3052_v9 = vmul.f32 %v5390_v7, %v5390_v7 }
 0x455   :  { %v3060_v54 = vadd.f32 %v3059_v8, %v3051_v6  ;;  %v3065_v55 = vrot.slane %v3052_v9, 4 }
 0x457   :  { %v3061_v61 = vrot.slane %v3060_v54, 2  ;;  %v3066_v62 = vadd.f32 %v3065_v55, %v3052_v9 }
 0x459   :  { %v3062_v14 = vadd.f32 %v3061_v61, %v3060_v54  ;;  %v3067_v15 = vrot.slane %v3066_v62, 2 }
 0x45b   :  { %v3063_v16 = vrot.slane %v3062_v14, 1  ;;  %v3068_v17 = vadd.f32 %v3067_v15, %v3066_v62 }
 0x45d   :  { %v3064_v18 = vadd.f32 %v3063_v16, %v3062_v14  ;;  %v3069_v19 = vrot.slane %v3068_v17, 1 }
 0x45f   :  { %v3107_v20 = vmul.f32 0.125, %v3064_v18  ;;  %v3070_v21 = vadd.f32 %v3069_v19, %v3068_v17 }
 0x461   :  { %v3115_v22 = vadd.f32 1e-05, %v3107_v20  ;;  %v3108_v23 = vmul.f32 0.125, %v3070_v21 }
 0x463   :  { %v3116_v24 = vadd.f32 1e-05, %v3108_v23  ;;  %4897 = vrsqrt.f32 %v3115_v22 }
 0x465   :  { %4899 = vrsqrt.f32 %v3116_v24 }
 0x470   :  { %v4898_v25 = vpop.eup %4897 }
 0x472   :  { %v4900_v26 = vpop.eup %4899 }
 0x473   :  { %v3139_v27 = vcombine.low %v4898_v25, %v4900_v26  ;;  %v5407_v26 = vsub.s32 4, %v5267_v47 }
 0x47a   :  { %v2767_v30 = vpop.f32.mrf.mxu0 }
 0x47b   :  { %v2768_v31 = vadd.f32 %v2767_v30, %v1342_v28  ;;  %v5410_v28 = vrot.slane %v3139_v27, %v5288_v45  ;;  %v5416_v30 = vsub.s32 5, %v5267_v47 }
 0x47c   :  { %v2808_v33 = vpop.f32.mrf.mxu1  ;;  %v2769_v34 = vpop.f32.mrf.mxu0 }
 0x47d   :  { %v2809_v35 = vadd.f32 %v2808_v33, %v2768_v31  ;;  %v2770_v36 = vadd.f32 %v2769_v34, %v1346_v29  ;;  %v1350_v33 = vrot.slane %v5378_v32, %v5407_v26  ;;  %v1354_v34 = vrot.slane %v5378_v32, %v5416_v30 }
 0x47e   :  { %v2810_v37 = vpop.f32.mrf.mxu1  ;;  %v2771_v38 = vpop.f32.mrf.mxu0 }
 0x47f   :  { %v2981_v39 = vmax.f32 %v2809_v35, 0.0  ;;  %v2811_v40 = vadd.f32 %v2810_v37, %v2770_v36 }
 0x480   :  { %v2812_v41 = vpop.f32.mrf.mxu1  ;;  %v2772_v42 = vpop.f32.mrf.mxu0 }
 0x481   :  { %v2999_v43 = vrot.slane %v2981_v39, 4  ;;  %v2982_v44 = vmax.f32 %v2811_v40, 0.0 }
 0x482   :  { %v2813_v46 = vpop.f32.mrf.mxu1 }
 0x483   :  { %v3000_v48 = vadd.f32 %v2999_v43, %v2981_v39  ;;  %v3005_v50 = vrot.slane %v2982_v44, 4 }
 0x485   :  { %v3001_v51 = vrot.slane %v3000_v48, 2  ;;  %v3006_v52 = vadd.f32 %v3005_v50, %v2982_v44 }
 0x487   :  { %v3002_v53 = vadd.f32 %v3001_v51, %v3000_v48  ;;  %v3007_v11 = vrot.slane %v3006_v52, 2 }
 0x489   :  { %v3003_v56 = vrot.slane %v3002_v53, 1  ;;  %v3008_v10 = vadd.f32 %v3007_v11, %v3006_v52 }
 0x48b   :  { %v3004_v13 = vadd.f32 %v3003_v56, %v3002_v53  ;;  %v3009_v57 = vrot.slane %v3008_v10, 1 }
 0x48d   :  { %v3037_v58 = vmul.f32 0.125, %v3004_v13  ;;  %v3010_v12 = vadd.f32 %v3009_v57, %v3008_v10 }
 0x48f   :  { %v5398_v59 = vsub.f32 %v2981_v39, %v3037_v58  ;;  %v3038_v63 = vmul.f32 0.125, %v3010_v12 }
 0x491   :  { %v3053_v0 = vmul.f32 %v5398_v59, %v5398_v59  ;;  %v5402_v1 = vsub.f32 %v2982_v44, %v3038_v63 }
 0x493   :  { %v3071_v5 = vrot.slane %v3053_v0, 4  ;;  %v3054_v6 = vmul.f32 %v5402_v1, %v5402_v1 }
 0x495   :  { %v3072_v8 = vadd.f32 %v3071_v5, %v3053_v0  ;;  %v3077_v9 = vrot.slane %v3054_v6, 4 }
 0x497   :  { %v3073_v54 = vrot.slane %v3072_v8, 2  ;;  %v3078_v55 = vadd.f32 %v3077_v9, %v3054_v6 }
 0x499   :  { %v3074_v61 = vadd.f32 %v3073_v54, %v3072_v8  ;;  %v3079_v62 = vrot.slane %v3078_v55, 2 }
 0x49b   :  { %v3075_v14 = vrot.slane %v3074_v61, 1  ;;  %v3080_v15 = vadd.f32 %v3079_v62, %v3078_v55 }
 0x49d   :  { %v3076_v16 = vadd.f32 %v3075_v14, %v3074_v61  ;;  %v3081_v17 = vrot.slane %v3080_v15, 1 }
 0x49f   :  { %v3109_v18 = vmul.f32 0.125, %v3076_v16  ;;  %v3082_v19 = vadd.f32 %v3081_v17, %v3080_v15 }
 0x4a1   :  { %v3117_v20 = vadd.f32 1e-05, %v3109_v18  ;;  %v3110_v21 = vmul.f32 0.125, %v3082_v19 }
 0x4a3   :  { %v3118_v22 = vadd.f32 1e-05, %v3110_v21  ;;  %4901 = vrsqrt.f32 %v3117_v20 }
 0x4a5   :  { %4903 = vrsqrt.f32 %v3118_v22 }
 0x4b0   :  { %v4902_v23 = vpop.eup %4901 }
 0x4b2   :  { %v4904_v24 = vpop.eup %4903 }
 0x4b3   :  { %v3140_v25 = vcombine.low %v4902_v23, %v4904_v24 }
 0x4b5   :  { %v5413_v29 = vrot.slane %v3140_v25, %v5288_v45 }
 0x4b7   :  { %v3171_v31 = vcombine.low %v5410_v28, %v5413_v29 }
 0x4ba   :  { %v2849_v35 = vpop.f32.mrf.mxu0 }
 0x4bb   :  { %v2850_v36 = vadd.f32 %v2849_v35, %v1350_v33 }
 0x4bc   :  { %v2890_v37 = vpop.f32.mrf.mxu1  ;;  %v2851_v27 = vpop.f32.mrf.mxu0 }
 0x4bd   :  { %v2891_v38 = vadd.f32 %v2890_v37, %v2850_v36  ;;  %v2852_v39 = vadd.f32 %v2851_v27, %v1354_v34  ;;  %v5433_v27 = vsub.s32 6, %v5267_v47 }
 0x4be   :  { %v2892_v40 = vpop.f32.mrf.mxu1  ;;  %v2853_v41 = vpop.f32.mrf.mxu0 }
 0x4bf   :  { %v2983_v42 = vmax.f32 %v2891_v38, 0.0  ;;  %v2893_v43 = vadd.f32 %v2892_v40, %v2852_v39  ;;  %v5436_v38 = vsub.s32 7, %v5267_v47  ;;  %v1358_v39 = vrot.slane %v5378_v32, %v5433_v27 }
 0x4c0   :  { %v2894_v44 = vpop.f32.mrf.mxu1  ;;  %v2854_v46 = vpop.f32.mrf.mxu0 }
 0x4c1   :  { %v3011_v48 = vrot.slane %v2983_v42, 4  ;;  %v2984_v50 = vmax.f32 %v2893_v43, 0.0  ;;  %v1362_v40 = vrot.slane %v5378_v32, %v5436_v38 }
 0x4c2   :  { %v2895_v51 = vpop.f32.mrf.mxu1 }
 0x4c3   :  { %v3012_v52 = vadd.f32 %v3011_v48, %v2983_v42  ;;  %v3017_v53 = vrot.slane %v2984_v50, 4 }
 0x4c5   :  { %v3013_v11 = vrot.slane %v3012_v52, 2  ;;  %v3018_v56 = vadd.f32 %v3017_v53, %v2984_v50 }
 0x4c7   :  { %v3014_v10 = vadd.f32 %v3013_v11, %v3012_v52  ;;  %v3019_v13 = vrot.slane %v3018_v56, 2 }
 0x4c9   :  { %v3015_v57 = vrot.slane %v3014_v10, 1  ;;  %v3020_v58 = vadd.f32 %v3019_v13, %v3018_v56 }
 0x4cb   :  { %v3016_v12 = vadd.f32 %v3015_v57, %v3014_v10  ;;  %v3021_v63 = vrot.slane %v3020_v58, 1 }
 0x4cd   :  { %v3039_v0 = vmul.f32 0.125, %v3016_v12  ;;  %v3022_v5 = vadd.f32 %v3021_v63, %v3020_v58 }
 0x4cf   :  { %v5424_v6 = vsub.f32 %v2983_v42, %v3039_v0  ;;  %v3040_v8 = vmul.f32 0.125, %v3022_v5 }
 0x4d1   :  { %v3055_v9 = vmul.f32 %v5424_v6, %v5424_v6  ;;  %v5428_v54 = vsub.f32 %v2984_v50, %v3040_v8 }
 0x4d3   :  { %v3083_v55 = vrot.slane %v3055_v9, 4  ;;  %v3056_v61 = vmul.f32 %v5428_v54, %v5428_v54 }
 0x4d5   :  { %v3084_v62 = vadd.f32 %v3083_v55, %v3055_v9  ;;  %v3089_v14 = vrot.slane %v3056_v61, 4 }
 0x4d7   :  { %v3085_v15 = vrot.slane %v3084_v62, 2  ;;  %v3090_v16 = vadd.f32 %v3089_v14, %v3056_v61 }
 0x4d9   :  { %v3086_v17 = vadd.f32 %v3085_v15, %v3084_v62  ;;  %v3091_v18 = vrot.slane %v3090_v16, 2 }
 0x4db   :  { %v3087_v19 = vrot.slane %v3086_v17, 1  ;;  %v3092_v20 = vadd.f32 %v3091_v18, %v3090_v16 }
 0x4dd   :  { %v3088_v21 = vadd.f32 %v3087_v19, %v3086_v17  ;;  %v3093_v22 = vrot.slane %v3092_v20, 1 }
 0x4df   :  { %v3111_v23 = vmul.f32 0.125, %v3088_v21  ;;  %v3094_v24 = vadd.f32 %v3093_v22, %v3092_v20 }
 0x4e1   :  { %v3119_v25 = vadd.f32 1e-05, %v3111_v23  ;;  %v3112_v33 = vmul.f32 0.125, %v3094_v24 }
 0x4e3   :  { %v3120_v34 = vadd.f32 1e-05, %v3112_v33  ;;  %4905 = vrsqrt.f32 %v3119_v25 }
 0x4e5   :  { %4907 = vrsqrt.f32 %v3120_v34 }
 0x4f0   :  { %v4906_v35 = vpop.eup %4905 }
 0x4f2   :  { %v4908_v36 = vpop.eup %4907 }
 0x4f3   :  { %v3141_v37 = vcombine.low %v4906_v35, %v4908_v36 }
 0x4fa   :  { %v2931_v41 = vpop.f32.mrf.mxu0 }
 0x4fb   :  { %v2932_v42 = vadd.f32 %v2931_v41, %v1358_v39 }
 0x4fc   :  { %v2972_v43 = vpop.f32.mrf.mxu1  ;;  %v2933_v44 = vpop.f32.mrf.mxu0 }
 0x4fd   :  { %v2973_v46 = vadd.f32 %v2972_v43, %v2932_v42  ;;  %v2934_v48 = vadd.f32 %v2933_v44, %v1362_v40 }
 0x4fe   :  { %v2974_v50 = vpop.f32.mrf.mxu1  ;;  %v2935_v51 = vpop.f32.mrf.mxu0 }
 0x4ff   :  { %v2985_v52 = vmax.f32 %v2973_v46, 0.0  ;;  %v2975_v53 = vadd.f32 %v2974_v50, %v2934_v48  ;;  %v3163_v50 = vrot.slane %v3141_v37, %v5288_v45 }
 0x500   :  { %v2976_v11 = vpop.f32.mrf.mxu1  ;;  %v2936_v56 = vpop.f32.mrf.mxu0 }
 0x501   :  { %v3023_v47 = vrot.slane %v2985_v52, 4  ;;  %v2986_v10 = vmax.f32 %v2975_v53, 0.0  ;;  %v3179_v53 = vrot.slane %v3171_v31, %v5288_v45  ;;  %v1329_v11 = vld [vmem:[%s5536_s6 + $0x25] sm:$0xff] }
 0x502   :  { %v2977_v13 = vpop.f32.mrf.mxu1  ;;  %v3243_v37 = vrot.slane %v1329_v11, %v5273_v49  ;;  %v3255_v28 = vrot.slane %v1329_v11, %v5315_v4  ;;  %v3259_v31 = vrot.slane %v1329_v11, %v5407_v26 }
 0x503   :  { %v3024_v57 = vadd.f32 %v3023_v47, %v2985_v52  ;;  %v3029_v58 = vrot.slane %v2986_v10, 4  ;;  %v1328_v47 = vld [vmem:[%s5536_s6 + $0x1d] sm:$0xff]  ;;  %v3247_v13 = vrot.slane %v1329_v11, %v5283_v60 }
 0x505   :  { %v3025_v12 = vrot.slane %v3024_v57, 2  ;;  %v3030_v63 = vadd.f32 %v3029_v58, %v2986_v10  ;;  %v3263_v58 = vrot.slane %v1329_v11, %v5416_v30 }
 0x507   :  { %v3026_v32 = vadd.f32 %v3025_v12, %v3024_v57  ;;  %v3031_v0 = vrot.slane %v3030_v63, 2  ;;  %v3251_v57 = vrot.slane %v1329_v11, %v5309_v2  ;;  %v3271_v12 = vrot.slane %v1329_v11, %v5436_v38 }
 0x509   :  { %v3027_v5 = vrot.slane %v3026_v32, 1  ;;  %v3032_v8 = vadd.f32 %v3031_v0, %v3030_v63 }
 0x50b   :  { %v3028_v9 = vadd.f32 %v3027_v5, %v3026_v32  ;;  %v3033_v55 = vrot.slane %v3032_v8, 1 }
 0x50d   :  { %v3041_v61 = vmul.f32 0.125, %v3028_v9  ;;  %v3034_v62 = vadd.f32 %v3033_v55, %v3032_v8 }
 0x50f   :  { %v3049_v14 = vsub.f32 %v2985_v52, %v3041_v61  ;;  %v3042_v15 = vmul.f32 0.125, %v3034_v62 }
 0x511   :  { %v3057_v16 = vmul.f32 %v3049_v14, %v3049_v14  ;;  %v3050_v17 = vsub.f32 %v2986_v10, %v3042_v15 }
 0x513   :  { %v3095_v18 = vrot.slane %v3057_v16, 4  ;;  %v3058_v19 = vmul.f32 %v3050_v17, %v3050_v17 }
 0x515   :  { %v3096_v20 = vadd.f32 %v3095_v18, %v3057_v16  ;;  %v3101_v21 = vrot.slane %v3058_v19, 4 }
 0x517   :  { %v3097_v22 = vrot.slane %v3096_v20, 2  ;;  %v3102_v23 = vadd.f32 %v3101_v21, %v3058_v19 }
 0x519   :  { %v3098_v24 = vadd.f32 %v3097_v22, %v3096_v20  ;;  %v3103_v25 = vrot.slane %v3102_v23, 2 }
 0x51b   :  { %v3099_v33 = vrot.slane %v3098_v24, 1  ;;  %v3104_v34 = vadd.f32 %v3103_v25, %v3102_v23 }
 0x51d   :  { %v3100_v35 = vadd.f32 %v3099_v33, %v3098_v24  ;;  %v3105_v36 = vrot.slane %v3104_v34, 1 }
 0x51f   :  { %v3113_v39 = vmul.f32 0.125, %v3100_v35  ;;  %v3106_v40 = vadd.f32 %v3105_v36, %v3104_v34 }
 0x521   :  { %v3121_v41 = vadd.f32 1e-05, %v3113_v39  ;;  %v3114_v42 = vmul.f32 0.125, %v3106_v40 }
 0x523   :  { %v3122_v43 = vadd.f32 1e-05, %v3114_v42  ;;  %4909 = vrsqrt.f32 %v3121_v41 }
 0x525   :  { %4911 = vrsqrt.f32 %v3122_v43 }
 0x530   :  { %v4910_v44 = vpop.eup %4909 }
 0x532   :  { %v4912_v46 = vpop.eup %4911 }
 0x533   :  { %v3142_v48 = vcombine.low %v4910_v44, %v4912_v46 }
 0x535   :  { %v3170_v51 = vrot.slane %v3142_v48, %v5288_v45 }
 0x537   :  { %v3172_v52 = vcombine.low %v3163_v50, %v3170_v51 }
 0x539   :  { %v3186_v56 = vrot.slane %v3172_v52, %v5288_v45  ;;  %v3267_v45 = vrot.slane %v1329_v11, %v5433_v27 }
 0x53b   :  { %v3187_v10 = vcombine.low %v3179_v53, %v3186_v56 }
 0x53d   :  { %v3189_v29 = vmul.f32 %v3187_v10, %v1328_v47 }
 0x53f   :  { %v3194_v63 = vrot.slane %v3189_v29, %v5273_v49  ;;  %v3198_v32 = vrot.slane %v3189_v29, %v5283_v60  ;;  %v3202_v0 = vrot.slane %v3189_v29, %v5309_v2  ;;  %v3206_v5 = vrot.slane %v3189_v29, %v5315_v4 }
 0x540   :  { %v3210_v8 = vrot.slane %v3189_v29, %v5407_v26  ;;  %v3214_v9 = vrot.slane %v3189_v29, %v5416_v30  ;;  %v3218_v55 = vrot.slane %v3189_v29, %v5433_v27  ;;  %v3222_v61 = vrot.slane %v3189_v29, %v5436_v38 }
 0x541   :  { %v3231_v62 = vmul.f32 %v3194_v63, %v5386_v3  ;;  %v3232_v15 = vmul.f32 %v3198_v32, %v5390_v7  ;;  %v3233_v16 = vmul.f32 %v3202_v0, %v5398_v59  ;;  %v3234_v18 = vmul.f32 %v3206_v5, %v5402_v1 }
 0x542   :  { %v3235_v2 = vmul.f32 %v3210_v8, %v5424_v6  ;;  %v3236_v4 = vmul.f32 %v3214_v9, %v5428_v54  ;;  %v3237_v19 = vmul.f32 %v3218_v55, %v3049_v14  ;;  %v3238_v26 = vmul.f32 %v3222_v61, %v3050_v17 }
 0x543   :  { %v5477_v20 = vadd.f32 %v3243_v37, %v3231_v62  ;;  %v3281_v30 = vadd.f32 %v3247_v13, %v3232_v15  ;;  %v5479_v27 = vadd.f32 %v3251_v57, %v3233_v16  ;;  %v3283_v38 = vadd.f32 %v3255_v28, %v3234_v18 }
 0x544   :  { %v5481_v21 = vadd.f32 %v3259_v31, %v3235_v2  ;;  %v5483_v3 = vadd.f32 %v3263_v58, %v3236_v4  ;;  %v5485_v7 = vadd.f32 %v3267_v45, %v3237_v19  ;;  %v5487_v59 = vadd.f32 %v3271_v12, %v3238_v26 }
 0x545   :  { %v3288_v1 = vpack.c.bf16 %v5477_v20, %v5477_v20  ;;  %v3289_v6 = vpack.c.bf16 %v3281_v30, %v3281_v30  ;;  %v3290_v54 = vpack.c.bf16 %v5479_v27, %v5479_v27  ;;  %v3291_v14 = vpack.c.bf16 %v3283_v38, %v3283_v38 }
 0x546   :  { %v3292_v17 = vpack.c.bf16 %v5481_v21, %v5481_v21  ;;  %v3293_v22 = vpack.c.bf16 %v5483_v3, %v5483_v3  ;;  %v3294_v23 = vpack.c.bf16 %v5485_v7, %v5485_v7  ;;  %v3295_v24 = vpack.c.bf16 %v5487_v59, %v5487_v59 }
 0x547   :  { %5195 = dma.done.wait [#allocation4 + $0x1], 16384 }
 0x548   :  { %5196 = vsyncadd [#allocation4 + $0x1], 4294950912  ;;  %4112 = vmatprep.mubr.bf16.mxu0 %v3289_v6  ;;  %4153 = vmatprep.mubr.bf16.mxu1 %v3291_v14  ;;  %v4913_v25 = vld [vmem:[#allocation3 + $0x74] ss:$8 sps:$4 sm:$0xff]   ;;  %v4917_v34 = vld [vmem:[#allocation3 + $0x70] ss:$8 sps:$4 sm:$0xff]  }
 0x549   :  { %v4915_v33 = vld [vmem:[#allocation3 + $0x174] ss:$8 sps:$4 sm:$0xff]   ;;  %4080 = vmatprep.subr.bf16.mxu0 %v4913_v25  ;;  %v4918_v35 = vld [vmem:[#allocation3 + $0x170] ss:$8 sps:$4 sm:$0xff]   ;;  %v4919_v36 = vld [vmem:[#allocation3 + $0x64] ss:$8 sps:$4 sm:$0xff]  }
 0x54a   :  { %4121 = vmatprep.subr.bf16.mxu1 %v4915_v33  ;;  %4081 = vmatpush1.bf16.msra.mxu0 %v4917_v34  ;;  %v4921_v39 = vld [vmem:[#allocation3 + $0x164] ss:$8 sps:$4 sm:$0xff]   ;;  %v4923_v40 = vld [vmem:[#allocation3 + $0x60] ss:$8 sps:$4 sm:$0xff]   ;;  %v4925_v42 = vld [vmem:[#allocation3 + $0x54] ss:$8 sps:$4 sm:$0xff]  }
 0x54b   :  { %4122 = vmatpush1.bf16.msra.mxu1 %v4918_v35  ;;  %4082 = vmatprep.subr.bf16.mxu0 %v4919_v36  ;;  %v4924_v41 = vld [vmem:[#allocation3 + $0x160] ss:$8 sps:$4 sm:$0xff]   ;;  %v4927_v43 = vld [vmem:[#allocation3 + $0x154] ss:$8 sps:$4 sm:$0xff]   ;;  %v4929_v44 = vld [vmem:[#allocation3 + $0x50] ss:$8 sps:$4 sm:$0xff]  }
 0x54c   :  { %4123 = vmatprep.subr.bf16.mxu1 %v4921_v39  ;;  %v4930_v46 = vld [vmem:[#allocation3 + $0x150] ss:$8 sps:$4 sm:$0xff]   ;;  %v4931_v48 = vld [vmem:[#allocation3 + $0x44] ss:$8 sps:$4 sm:$0xff]   ;;  %v4935_v51 = vld [vmem:[#allocation3 + $0x40] ss:$8 sps:$4 sm:$0xff]  }
 0x54d   :  { %v4933_v50 = vld [vmem:[#allocation3 + $0x144] ss:$8 sps:$4 sm:$0xff]   ;;  %v4936_v52 = vld [vmem:[#allocation3 + $0x140] ss:$8 sps:$4 sm:$0xff]   ;;  %v4937_v53 = vld [vmem:[#allocation3 + $0x34] ss:$8 sps:$4 sm:$0xff]  }
 0x54e   :  { %4083 = vmatpush1.bf16.msra.mxu0 %v4923_v40  ;;  %v4939_v11 = vld [vmem:[#allocation3 + $0x134] ss:$8 sps:$4 sm:$0xff]   ;;  %v4941_v56 = vld [vmem:[#allocation3 + $0x30] ss:$8 sps:$4 sm:$0xff]   ;;  %v4943_v10 = vld [vmem:[#allocation3 + $0x24] ss:$8 sps:$4 sm:$0xff]  }
 0x54f   :  { %4124 = vmatpush1.bf16.msra.mxu1 %v4924_v41  ;;  %4084 = vmatprep.subr.bf16.mxu0 %v4925_v42  ;;  %v4942_v47 = vld [vmem:[#allocation3 + $0x130] ss:$8 sps:$4 sm:$0xff]   ;;  %v4945_v37 = vld [vmem:[#allocation3 + $0x124] ss:$8 sps:$4 sm:$0xff]   ;;  %v4947_v13 = vld [vmem:[#allocation3 + $0x20] ss:$8 sps:$4 sm:$0xff]  }
 0x550   :  { %4125 = vmatprep.subr.bf16.mxu1 %v4927_v43  ;;  %v4948_v57 = vld [vmem:[#allocation3 + $0x120] ss:$8 sps:$4 sm:$0xff]   ;;  %v4949_v28 = vld [vmem:[#allocation3 + $0x14] ss:$8 sps:$4 sm:$0xff]   ;;  %v4953_v31 = vld [vmem:[#allocation3 + $0x10] ss:$8 sps:$4 sm:$0xff]  }
 0x551   :  { %v4951_v29 = vld [vmem:[#allocation3 + $0x114] ss:$8 sps:$4 sm:$0xff]   ;;  %v4954_v58 = vld [vmem:[#allocation3 + $0x110] ss:$8 sps:$4 sm:$0xff]   ;;  %v4955_v45 = vld [vmem:[#allocation3 + $0x4] ss:$8 sps:$4 sm:$0xff]  }
 0x552   :  { %4085 = vmatpush1.bf16.msra.mxu0 %v4929_v44  ;;  %v4957_v12 = vld [vmem:[#allocation3 + $0x104] ss:$8 sps:$4 sm:$0xff]   ;;  %v4959_v63 = vld [vmem:[#allocation3] ss:$8 sps:$4 sm:$0xff]   ;;  %v4961_v0 = vld [vmem:[#allocation3 + $0xf4] ss:$8 sps:$4 sm:$0xff]  }
 0x553   :  { %4126 = vmatpush1.bf16.msra.mxu1 %v4930_v46  ;;  %4086 = vmatprep.subr.bf16.mxu0 %v4931_v48  ;;  %v4960_v32 = vld [vmem:[#allocation3 + $0x100] ss:$8 sps:$4 sm:$0xff]   ;;  %v4963_v5 = vld [vmem:[#allocation3 + $0x1f4] ss:$8 sps:$4 sm:$0xff]   ;;  %v4965_v8 = vld [vmem:[#allocation3 + $0xf0] ss:$8 sps:$4 sm:$0xff]  }
 0x554   :  { %4127 = vmatprep.subr.bf16.mxu1 %v4933_v50  ;;  %v4966_v9 = vld [vmem:[#allocation3 + $0x1f0] ss:$8 sps:$4 sm:$0xff]   ;;  %v4967_v55 = vld [vmem:[#allocation3 + $0xe4] ss:$8 sps:$4 sm:$0xff]   ;;  %v4971_v62 = vld [vmem:[#allocation3 + $0xe0] ss:$8 sps:$4 sm:$0xff]  }
 0x555   :  { %v4969_v61 = vld [vmem:[#allocation3 + $0x1e4] ss:$8 sps:$4 sm:$0xff]   ;;  %v4972_v15 = vld [vmem:[#allocation3 + $0x1e0] ss:$8 sps:$4 sm:$0xff]   ;;  %v4973_v16 = vld [vmem:[#allocation3 + $0xd4] ss:$8 sps:$4 sm:$0xff]  }
 0x556   :  { %4087 = vmatpush1.bf16.msra.mxu0 %v4935_v51  ;;  %v4975_v18 = vld [vmem:[#allocation3 + $0x1d4] ss:$8 sps:$4 sm:$0xff]   ;;  %v4977_v2 = vld [vmem:[#allocation3 + $0xd0] ss:$8 sps:$4 sm:$0xff]   ;;  %v4979_v19 = vld [vmem:[#allocation3 + $0xc4] ss:$8 sps:$4 sm:$0xff]  }
 0x557   :  { %4128 = vmatpush1.bf16.msra.mxu1 %v4936_v52  ;;  %4088 = vmatprep.subr.bf16.mxu0 %v4937_v53  ;;  %v4978_v4 = vld [vmem:[#allocation3 + $0x1d0] ss:$8 sps:$4 sm:$0xff]   ;;  %v4981_v26 = vld [vmem:[#allocation3 + $0x1c4] ss:$8 sps:$4 sm:$0xff]   ;;  %v4983_v30 = vld [vmem:[#allocation3 + $0xc0] ss:$8 sps:$4 sm:$0xff]  }
 0x558   :  { %4129 = vmatprep.subr.bf16.mxu1 %v4939_v11  ;;  %v4984_v38 = vld [vmem:[#allocation3 + $0x1c0] ss:$8 sps:$4 sm:$0xff]   ;;  %v4985_v6 = vld [vmem:[#allocation3 + $0xb4] ss:$8 sps:$4 sm:$0xff]   ;;  %v4989_v25 = vld [vmem:[#allocation3 + $0xb0] ss:$8 sps:$4 sm:$0xff]  }
 0x559   :  { %v4987_v14 = vld [vmem:[#allocation3 + $0x1b4] ss:$8 sps:$4 sm:$0xff]   ;;  %v4990_v33 = vld [vmem:[#allocation3 + $0x1b0] ss:$8 sps:$4 sm:$0xff]   ;;  %v4991_v34 = vld [vmem:[#allocation3 + $0xa4] ss:$8 sps:$4 sm:$0xff]  }
 0x55a   :  { %4089 = vmatpush1.bf16.msra.mxu0 %v4941_v56  ;;  %v4993_v35 = vld [vmem:[#allocation3 + $0x1a4] ss:$8 sps:$4 sm:$0xff]   ;;  %v4995_v36 = vld [vmem:[#allocation3 + $0xa0] ss:$8 sps:$4 sm:$0xff]   ;;  %v4997_v40 = vld [vmem:[#allocation3 + $0x94] ss:$8 sps:$4 sm:$0xff]  }
 0x55b   :  { %4130 = vmatpush1.bf16.msra.mxu1 %v4942_v47  ;;  %4090 = vmatprep.subr.bf16.mxu0 %v4943_v10  ;;  %v4996_v39 = vld [vmem:[#allocation3 + $0x1a0] ss:$8 sps:$4 sm:$0xff]   ;;  %v4999_v41 = vld [vmem:[#allocation3 + $0x194] ss:$8 sps:$4 sm:$0xff]   ;;  %v5001_v42 = vld [vmem:[#allocation3 + $0x90] ss:$8 sps:$4 sm:$0xff]  }
 0x55c   :  { %4131 = vmatprep.subr.bf16.mxu1 %v4945_v37  ;;  %v5002_v43 = vld [vmem:[#allocation3 + $0x190] ss:$8 sps:$4 sm:$0xff]   ;;  %v5003_v44 = vld [vmem:[#allocation3 + $0x84] ss:$8 sps:$4 sm:$0xff]   ;;  %v5007_v48 = vld [vmem:[#allocation3 + $0x80] ss:$8 sps:$4 sm:$0xff]  }
 0x55d   :  { %v5005_v46 = vld [vmem:[#allocation3 + $0x184] ss:$8 sps:$4 sm:$0xff]   ;;  %v5008_v50 = vld [vmem:[#allocation3 + $0x180] ss:$8 sps:$4 sm:$0xff]   ;;  %v5011_v51 = vld [vmem:[#allocation3 + $0x274] ss:$8 sps:$4 sm:$0xff]  }
 0x55e   :  { %4091 = vmatpush1.bf16.msra.mxu0 %v4947_v13  ;;  %v5014_v52 = vld [vmem:[#allocation3 + $0x374] ss:$8 sps:$4 sm:$0xff]   ;;  %v5009_v53 = vld [vmem:[#allocation3 + $0x270] ss:$8 sps:$4 sm:$0xff]   ;;  %v5017_v56 = vld [vmem:[#allocation3 + $0x264] ss:$8 sps:$4 sm:$0xff]  }
 0x55f   :  { %4132 = vmatpush1.bf16.msra.mxu1 %v4948_v57  ;;  %4092 = vmatprep.subr.bf16.mxu0 %v4949_v28  ;;  %v5012_v11 = vld [vmem:[#allocation3 + $0x370] ss:$8 sps:$4 sm:$0xff]   ;;  %v5020_v47 = vld [vmem:[#allocation3 + $0x364] ss:$8 sps:$4 sm:$0xff]   ;;  %v5015_v10 = vld [vmem:[#allocation3 + $0x260] ss:$8 sps:$4 sm:$0xff]  }
 0x560   :  { %4133 = vmatprep.subr.bf16.mxu1 %v4951_v29  ;;  %v5018_v37 = vld [vmem:[#allocation3 + $0x360] ss:$8 sps:$4 sm:$0xff]   ;;  %v5023_v13 = vld [vmem:[#allocation3 + $0x254] ss:$8 sps:$4 sm:$0xff]   ;;  %v5021_v20 = vld [vmem:[#allocation3 + $0x250] ss:$8 sps:$4 sm:$0xff]  }
 0x561   :  { %v5026_v57 = vld [vmem:[#allocation3 + $0x354] ss:$8 sps:$4 sm:$0xff]   ;;  %v5029_v27 = vld [vmem:[#allocation3 + $0x244] ss:$8 sps:$4 sm:$0xff]   ;;  %v5027_v28 = vld [vmem:[#allocation3 + $0x240] ss:$8 sps:$4 sm:$0xff]  }
 0x562   :  { %4093 = vmatpush1.bf16.msra.mxu0 %v4953_v31  ;;  %v5030_v29 = vld [vmem:[#allocation3 + $0x340] ss:$8 sps:$4 sm:$0xff]   ;;  %v5035_v31 = vld [vmem:[#allocation3 + $0x234] ss:$8 sps:$4 sm:$0xff]   ;;  %v5041_v59 = vld [vmem:[#allocation3 + $0x224] ss:$8 sps:$4 sm:$0xff]  }
 0x563   :  { %4134 = vmatpush1.bf16.msra.mxu1 %v4954_v58  ;;  %4094 = vmatprep.subr.bf16.mxu0 %v4955_v45  ;;  %v5038_v3 = vld [vmem:[#allocation3 + $0x334] ss:$8 sps:$4 sm:$0xff]   ;;  %v5036_v58 = vld [vmem:[#allocation3 + $0x330] ss:$8 sps:$4 sm:$0xff]   ;;  %v5039_v45 = vld [vmem:[#allocation3 + $0x220] ss:$8 sps:$4 sm:$0xff]  }
 0x564   :  { %4135 = vmatprep.subr.bf16.mxu1 %v4957_v12  ;;  %v5042_v12 = vld [vmem:[#allocation3 + $0x320] ss:$8 sps:$4 sm:$0xff]  }
 0x566   :  { %4095 = vmatpush1.bf16.msra.mxu0 %v4959_v63  ;;  %v5047_v63 = vld [vmem:[#allocation3 + $0x214] ss:$8 sps:$4 sm:$0xff]  }
 0x567   :  { %4136 = vmatpush1.bf16.msra.mxu1 %v4960_v32  ;;  %4096 = vmatprep.subr.bf16.mxu0 %v4961_v0  ;;  %v5050_v32 = vld [vmem:[#allocation3 + $0x314] ss:$8 sps:$4 sm:$0xff]   ;;  %v5045_v0 = vld [vmem:[#allocation3 + $0x210] ss:$8 sps:$4 sm:$0xff]  }
 0x568   :  { %4137 = vmatprep.subr.bf16.mxu1 %v4963_v5  ;;  %v5048_v5 = vld [vmem:[#allocation3 + $0x310] ss:$8 sps:$4 sm:$0xff]  }
 0x56a   :  { %4097 = vmatpush2.bf16.msra.mxu0 %v4965_v8  ;;  %v5053_v8 = vld [vmem:[#allocation3 + $0x204] ss:$8 sps:$4 sm:$0xff]  }
 0x56b   :  { %4138 = vmatpush2.bf16.msra.mxu1 %v4966_v9  ;;  %4098 = vmatprep.subr.bf16.mxu0 %v4967_v55  ;;  %v5056_v9 = vld [vmem:[#allocation3 + $0x304] ss:$8 sps:$4 sm:$0xff]   ;;  %v5051_v55 = vld [vmem:[#allocation3 + $0x200] ss:$8 sps:$4 sm:$0xff]  }
 0x56c   :  { %4139 = vmatprep.subr.bf16.mxu1 %v4969_v61  ;;  %v5054_v61 = vld [vmem:[#allocation3 + $0x300] ss:$8 sps:$4 sm:$0xff]  }
 0x56e   :  { %4099 = vmatpush2.bf16.msra.mxu0 %v4971_v62  ;;  %v5059_v62 = vld [vmem:[#allocation3 + $0x2f4] ss:$8 sps:$4 sm:$0xff]  }
 0x56f   :  { %4140 = vmatpush2.bf16.msra.mxu1 %v4972_v15  ;;  %4100 = vmatprep.subr.bf16.mxu0 %v4973_v16  ;;  %v5062_v15 = vld [vmem:[#allocation3 + $0x3f4] ss:$8 sps:$4 sm:$0xff]   ;;  %v5057_v16 = vld [vmem:[#allocation3 + $0x2f0] ss:$8 sps:$4 sm:$0xff]  }
 0x570   :  { %4141 = vmatprep.subr.bf16.mxu1 %v4975_v18  ;;  %v5060_v18 = vld [vmem:[#allocation3 + $0x3f0] ss:$8 sps:$4 sm:$0xff]  }
 0x572   :  { %4101 = vmatpush2.bf16.msra.mxu0 %v4977_v2  ;;  %v5065_v2 = vld [vmem:[#allocation3 + $0x2e4] ss:$8 sps:$4 sm:$0xff]  }
 0x573   :  { %4142 = vmatpush2.bf16.msra.mxu1 %v4978_v4  ;;  %4102 = vmatprep.subr.bf16.mxu0 %v4979_v19  ;;  %v5068_v4 = vld [vmem:[#allocation3 + $0x3e4] ss:$8 sps:$4 sm:$0xff]   ;;  %v5063_v19 = vld [vmem:[#allocation3 + $0x2e0] ss:$8 sps:$4 sm:$0xff]  }
 0x574   :  { %4143 = vmatprep.subr.bf16.mxu1 %v4981_v26  ;;  %v5066_v26 = vld [vmem:[#allocation3 + $0x3e0] ss:$8 sps:$4 sm:$0xff]  }
 0x576   :  { %4103 = vmatpush2.bf16.msra.mxu0 %v4983_v30  ;;  %v5071_v30 = vld [vmem:[#allocation3 + $0x2d4] ss:$8 sps:$4 sm:$0xff]  }
 0x577   :  { %4144 = vmatpush2.bf16.msra.mxu1 %v4984_v38  ;;  %4104 = vmatprep.subr.bf16.mxu0 %v4985_v6  ;;  %v5074_v38 = vld [vmem:[#allocation3 + $0x3d4] ss:$8 sps:$4 sm:$0xff]   ;;  %v5069_v6 = vld [vmem:[#allocation3 + $0x2d0] ss:$8 sps:$4 sm:$0xff]  }
 0x578   :  { %4145 = vmatprep.subr.bf16.mxu1 %v4987_v14  ;;  %v5072_v14 = vld [vmem:[#allocation3 + $0x3d0] ss:$8 sps:$4 sm:$0xff]  }
 0x57a   :  { %4105 = vmatpush2.bf16.msra.mxu0 %v4989_v25  ;;  %v5077_v25 = vld [vmem:[#allocation3 + $0x2c4] ss:$8 sps:$4 sm:$0xff]  }
 0x57b   :  { %4146 = vmatpush2.bf16.msra.mxu1 %v4990_v33  ;;  %4106 = vmatprep.subr.bf16.mxu0 %v4991_v34  ;;  %v5080_v33 = vld [vmem:[#allocation3 + $0x3c4] ss:$8 sps:$4 sm:$0xff]   ;;  %v5075_v34 = vld [vmem:[#allocation3 + $0x2c0] ss:$8 sps:$4 sm:$0xff]  }
 0x57c   :  { %4147 = vmatprep.subr.bf16.mxu1 %v4993_v35  ;;  %v5078_v35 = vld [vmem:[#allocation3 + $0x3c0] ss:$8 sps:$4 sm:$0xff]  }
 0x57e   :  { %4107 = vmatpush2.bf16.msra.mxu0 %v4995_v36  ;;  %v5083_v36 = vld [vmem:[#allocation3 + $0x2b4] ss:$8 sps:$4 sm:$0xff]  }
 0x57f   :  { %4148 = vmatpush2.bf16.msra.mxu1 %v4996_v39  ;;  %4108 = vmatprep.subr.bf16.mxu0 %v4997_v40  ;;  %v5086_v39 = vld [vmem:[#allocation3 + $0x3b4] ss:$8 sps:$4 sm:$0xff]   ;;  %v5081_v40 = vld [vmem:[#allocation3 + $0x2b0] ss:$8 sps:$4 sm:$0xff]  }
 0x580   :  { %4149 = vmatprep.subr.bf16.mxu1 %v4999_v41  ;;  %v5084_v41 = vld [vmem:[#allocation3 + $0x3b0] ss:$8 sps:$4 sm:$0xff]  }
 0x582   :  { %4109 = vmatpush2.bf16.msra.mxu0 %v5001_v42  ;;  %v5089_v42 = vld [vmem:[#allocation3 + $0x2a4] ss:$8 sps:$4 sm:$0xff]  }
 0x583   :  { %4150 = vmatpush2.bf16.msra.mxu1 %v5002_v43  ;;  %4110 = vmatprep.subr.bf16.mxu0 %v5003_v44  ;;  %v5092_v43 = vld [vmem:[#allocation3 + $0x3a4] ss:$8 sps:$4 sm:$0xff]   ;;  %v5087_v44 = vld [vmem:[#allocation3 + $0x2a0] ss:$8 sps:$4 sm:$0xff]  }
 0x584   :  { %4151 = vmatprep.subr.bf16.mxu1 %v5005_v46  ;;  %v5090_v46 = vld [vmem:[#allocation3 + $0x3a0] ss:$8 sps:$4 sm:$0xff]  }
 0x586   :  { %4111 = vmatpush2.bf16.msra.mxu0 %v5007_v48  ;;  %v5095_v48 = vld [vmem:[#allocation3 + $0x294] ss:$8 sps:$4 sm:$0xff]  }
 0x587   :  { %4152 = vmatpush2.bf16.msra.mxu1 %v5008_v50  ;;  %4162 = vmatprep.subr.bf16.mxu0 %v5011_v51  ;;  %v5098_v50 = vld [vmem:[#allocation3 + $0x394] ss:$8 sps:$4 sm:$0xff]   ;;  %v5093_v51 = vld [vmem:[#allocation3 + $0x290] ss:$8 sps:$4 sm:$0xff]  }
 0x588   :  { %4203 = vmatprep.subr.bf16.mxu1 %v5014_v52  ;;  %v5096_v52 = vld [vmem:[#allocation3 + $0x390] ss:$8 sps:$4 sm:$0xff]  }
 0x589   :  { %4113 = vmatmul.mubr.bf16.vlgmr.msra.gmra.mxu0 %v3288_v1  ;;  %v5024_v1 = vld [vmem:[#allocation3 + $0x350] ss:$8 sps:$4 sm:$0xff]  }
 0x58a   :  { %4154 = vmatmul.mubr.bf16.vlgmr.msra.gmra.mxu1 %v3290_v54  ;;  %4163 = vmatpush1.bf16.msra.mxu0 %v5009_v53  ;;  %v5032_v54 = vld [vmem:[#allocation3 + $0x344] ss:$8 sps:$4 sm:$0xff]  }
 0x58b   :  { %4204 = vmatpush1.bf16.msra.mxu1 %v5012_v11  ;;  %4164 = vmatprep.subr.bf16.mxu0 %v5017_v56  ;;  %v5101_v53 = vld [vmem:[#allocation3 + $0x284] ss:$8 sps:$4 sm:$0xff]   ;;  %v5099_v56 = vld [vmem:[#allocation3 + $0x280] ss:$8 sps:$4 sm:$0xff]  }
 0x58c   :  { %4205 = vmatprep.subr.bf16.mxu1 %v5020_v47  ;;  %4194 = vmatprep.mubr.bf16.mxu0 %v3293_v22  ;;  %v5033_v22 = vld [vmem:[#allocation3 + $0x230] ss:$8 sps:$4 sm:$0xff]   ;;  %v5104_v11 = vld [vmem:[#allocation3 + $0x384] ss:$8 sps:$4 sm:$0xff]   ;;  %v5102_v47 = vld [vmem:[#allocation3 + $0x380] ss:$8 sps:$4 sm:$0xff]  }
 0x58d   :  { %4235 = vmatprep.mubr.bf16.mxu1 %v3295_v24  ;;  %v5044_v24 = vld [vmem:[#allocation3 + $0x324] ss:$8 sps:$4 sm:$0xff]  }
 0x58e   :  { %4165 = vmatpush1.bf16.msra.mxu0 %v5015_v10 }
 0x58f   :  { %4206 = vmatpush1.bf16.msra.mxu1 %v5018_v37  ;;  %4166 = vmatprep.subr.bf16.mxu0 %v5023_v13 }
 0x590   :  { %4207 = vmatprep.subr.bf16.mxu1 %v5026_v57 }
 0x592   :  { %4167 = vmatpush1.bf16.msra.mxu0 %v5021_v20 }
 0x593   :  { %4208 = vmatpush1.bf16.msra.mxu1 %v5024_v1  ;;  %4168 = vmatprep.subr.bf16.mxu0 %v5029_v27 }
 0x594   :  { %4209 = vmatprep.subr.bf16.mxu1 %v5032_v54 }
 0x596   :  { %4169 = vmatpush1.bf16.msra.mxu0 %v5027_v28  ;;  %v3428_v28 = vld [vmem:[%s5536_s6 + $0x2d] sm:$0x3] }
 0x597   :  { %4210 = vmatpush1.bf16.msra.mxu1 %v5030_v29  ;;  %4170 = vmatprep.subr.bf16.mxu0 %v5035_v31  ;;  %v3433_v29 = vrot.slane %v3428_v28, %v5273_v49  ;;  %v3437_v21 = vrot.slane %v3428_v28, %v5283_v60 }
 0x598   :  { %4211 = vmatprep.subr.bf16.mxu1 %v5038_v3 }
 0x59a   :  { %4171 = vmatpush1.bf16.msra.mxu0 %v5033_v22 }
 0x59b   :  { %4212 = vmatpush1.bf16.msra.mxu1 %v5036_v58  ;;  %4172 = vmatprep.subr.bf16.mxu0 %v5041_v59 }
 0x59c   :  { %4213 = vmatprep.subr.bf16.mxu1 %v5044_v24 }
 0x59e   :  { %4173 = vmatpush1.bf16.msra.mxu0 %v5039_v45 }
 0x59f   :  { %4214 = vmatpush1.bf16.msra.mxu1 %v5042_v12  ;;  %4174 = vmatprep.subr.bf16.mxu0 %v5047_v63 }
 0x5a0   :  { %4215 = vmatprep.subr.bf16.mxu1 %v5050_v32 }
 0x5a2   :  { %4175 = vmatpush1.bf16.msra.mxu0 %v5045_v0 }
 0x5a3   :  { %4216 = vmatpush1.bf16.msra.mxu1 %v5048_v5  ;;  %4176 = vmatprep.subr.bf16.mxu0 %v5053_v8 }
 0x5a4   :  { %4217 = vmatprep.subr.bf16.mxu1 %v5056_v9 }
 0x5a6   :  { %4177 = vmatpush1.bf16.msra.mxu0 %v5051_v55 }
 0x5a7   :  { %4218 = vmatpush1.bf16.msra.mxu1 %v5054_v61  ;;  %4178 = vmatprep.subr.bf16.mxu0 %v5059_v62 }
 0x5a8   :  { %4219 = vmatprep.subr.bf16.mxu1 %v5062_v15 }
 0x5aa   :  { %4179 = vmatpush2.bf16.msra.mxu0 %v5057_v16 }
 0x5ab   :  { %4220 = vmatpush2.bf16.msra.mxu1 %v5060_v18  ;;  %4180 = vmatprep.subr.bf16.mxu0 %v5065_v2 }
 0x5ac   :  { %4221 = vmatprep.subr.bf16.mxu1 %v5068_v4 }
 0x5ae   :  { %4181 = vmatpush2.bf16.msra.mxu0 %v5063_v19 }
 0x5af   :  { %4222 = vmatpush2.bf16.msra.mxu1 %v5066_v26  ;;  %4182 = vmatprep.subr.bf16.mxu0 %v5071_v30 }
 0x5b0   :  { %4223 = vmatprep.subr.bf16.mxu1 %v5074_v38 }
 0x5b2   :  { %4183 = vmatpush2.bf16.msra.mxu0 %v5069_v6 }
 0x5b3   :  { %4224 = vmatpush2.bf16.msra.mxu1 %v5072_v14  ;;  %4184 = vmatprep.subr.bf16.mxu0 %v5077_v25 }
 0x5b4   :  { %4225 = vmatprep.subr.bf16.mxu1 %v5080_v33 }
 0x5b6   :  { %4185 = vmatpush2.bf16.msra.mxu0 %v5075_v34 }
 0x5b7   :  { %4226 = vmatpush2.bf16.msra.mxu1 %v5078_v35  ;;  %4186 = vmatprep.subr.bf16.mxu0 %v5083_v36 }
 0x5b8   :  { %4227 = vmatprep.subr.bf16.mxu1 %v5086_v39 }
 0x5ba   :  { %4187 = vmatpush2.bf16.msra.mxu0 %v5081_v40 }
 0x5bb   :  { %4228 = vmatpush2.bf16.msra.mxu1 %v5084_v41  ;;  %4188 = vmatprep.subr.bf16.mxu0 %v5089_v42 }
 0x5bc   :  { %4229 = vmatprep.subr.bf16.mxu1 %v5092_v43 }
 0x5be   :  { %4189 = vmatpush2.bf16.msra.mxu0 %v5087_v44 }
 0x5bf   :  { %4230 = vmatpush2.bf16.msra.mxu1 %v5090_v46  ;;  %4190 = vmatprep.subr.bf16.mxu0 %v5095_v48 }
 0x5c0   :  { %4231 = vmatprep.subr.bf16.mxu1 %v5098_v50 }
 0x5c2   :  { %4191 = vmatpush2.bf16.msra.mxu0 %v5093_v51 }
 0x5c3   :  { %4232 = vmatpush2.bf16.msra.mxu1 %v5096_v52  ;;  %4192 = vmatprep.subr.bf16.mxu0 %v5101_v53 }
 0x5c4   :  { %4233 = vmatprep.subr.bf16.mxu1 %v5104_v11 }
 0x5c6   :  { %4193 = vmatpush2.bf16.msra.mxu0 %v5099_v56 }
 0x5c7   :  { %4234 = vmatpush2.bf16.msra.mxu1 %v5102_v47 }
 0x5c9   :  { %4195 = vmatmul.mubr.bf16.vlgmr.msra.gmra.mxu0 %v3292_v17 }
 0x5ca   :  { %4236 = vmatmul.mubr.bf16.vlgmr.msra.gmra.mxu1 %v3294_v23 }
 0x649   :  { %v4114_v10 = vpop.f32.mrf.mxu0 }
 0x64a   :  { %v4155_v37 = vpop.f32.mrf.mxu1  ;;  %v4115_v17 = vadd.f32 %v4114_v10, %v3433_v29 }
 0x64b   :  { %v4116_v13 = vpop.f32.mrf.mxu0 }
 0x64c   :  { %v4157_v57 = vpop.f32.mrf.mxu1  ;;  %v4117_v31 = vadd.f32 %v4116_v13, %v3437_v21  ;;  %v4156_v7 = vadd.f32 %v4155_v37, %v4115_v17 }
 0x64d   :  { %v4118_v20 = vpop.f32.mrf.mxu0 }
 0x64e   :  { %v4159_v1 = vpop.f32.mrf.mxu1  ;;  %v4158_v22 = vadd.f32 %v4157_v57, %v4117_v31 }
 0x64f   :  { %v4119_v27 = vpop.f32.mrf.mxu0 }
 0x650   :  { %v4160_v54 = vpop.f32.mrf.mxu1 }
 0x689   :  { %v4196_v23 = vpop.f32.mrf.mxu0 }
 0x68a   :  { %v4237_v3 = vpop.f32.mrf.mxu1  ;;  %v4197_v58 = vadd.f32 %v4196_v23, %v4156_v7 }
 0x68b   :  { %v4198_v59 = vpop.f32.mrf.mxu0 }
 0x68c   :  { %v4239_v24 = vpop.f32.mrf.mxu1  ;;  %v4238_v45 = vadd.f32 %v4237_v3, %v4197_v58  ;;  %v4199_v12 = vadd.f32 %v4198_v59, %v4158_v22 }
 0x68d   :  { %v4200_v63 = vpop.f32.mrf.mxu0 }
 0x68e   :  { %v4241_v32 = vpop.f32.mrf.mxu1  ;;  %5105 = vtanh.f32 %v4238_v45  ;;  %v4240_v0 = vadd.f32 %v4239_v24, %v4199_v12 }
 0x68f   :  { %v4201_v5 = vpop.f32.mrf.mxu0 }
 0x690   :  { %v4242_v8 = vpop.f32.mrf.mxu1  ;;  %5107 = vtanh.f32 %v4240_v0 }
 0x69b   :  { %v5106_v49 = vpop.eup %5105 }
 0x69c   :  { %4246 = vst [vmem:[%s5537_s7] sm:$0xff] %v5106_v49 }
 0x69d   :  { %v5108_v60 = vpop.eup %5107 }
 0x69e   :  { %4247 = vst [vmem:[%s5537_s7 + $0x8] sm:$0xff] %v5108_v60 }
 0x69f   :  { %4252 = vsyncpa [#allocation6], 1 }
 0x6a0   :  { %4253 = vsyncpa [#allocation8], 1 }
 0x6a1   :  { %4254 = vsyncmov [#allocation4] }
 0x6a4   :  { %s4255_s27 = vpop.sfrf %4254 }
 0x6a5   :  { %p4736_p6 = scmp.ne.s32.totalorder %s4255_s27, 0 }
 0x6a7   :  { %4259 = shalt.err (%p4736_p6)  }
 0x6a8   :  { %4261 = vsyncmov [#allocation4 + $0x1] }
 0x6ab   :  { %s4262_s28 = vpop.sfrf %4261 }
 0x6ac   :  { %p4737_p7 = scmp.ne.s32.totalorder %s4262_s28, 0 }
 0x6ae   :  { %4266 = shalt.err (%p4737_p7)  }

</bundles_post_ra>
